<compile_context>
chip_gen: v7x
topology: tpu7x:2x2x1
jax: 0.10.0
libtpu: 0.0.40
codegen_flags: <defaults>
</compile_context>

<pallas_src>
import math
import jax
import jax.numpy as jnp
from jax.experimental import pallas as pl
from jax.experimental.pallas import tpu as pltpu


# ---------------------------------------------------------------------------
# helpers (exact erf-based gelu; F.gelu default is the erf variant)
# ---------------------------------------------------------------------------
def _erf_f32(x):
    # Abramowitz & Stegun 7.1.26, |err| < 1.5e-7 (~float32 eps).  exp is
    # EUP-native; lax.erf has no guaranteed Mosaic lowering.
    a1, a2, a3 = 0.254829592, -0.284496736, 1.421413741
    a4, a5, p = -1.453152027, 1.061405429, 0.3275911
    sgn = jnp.where(x >= 0.0, 1.0, -1.0)
    z = jnp.abs(x)
    t = 1.0 / (1.0 + p * z)
    poly = ((((a5 * t + a4) * t + a3) * t + a2) * t + a1) * t
    return sgn * (1.0 - poly * jnp.exp(-z * z))


def _gelu_exact(x):
    return 0.5 * x * (1.0 + _erf_f32(x * (1.0 / math.sqrt(2.0))))


# ---------------------------------------------------------------------------
# Pallas kernels (grid = (B,), one batch element per grid step, "parallel")
# ---------------------------------------------------------------------------
def fused_project_in_dwconv_kernel(x_ref, w_in_ref, w_dw_ref, x1_ref, tpad_ref):
    """project_in (1x1 conv, first C out-channels only) + zero-pad + 3x3
    depthwise conv, all in VMEM.  tpad_ref: (H+2, W+2, C) scratch."""
    _, H, W, C = x_ref.shape
    # 1x1 conv == matmul; bf16 operands, f32 accumulate on the MXU.
    x = x_ref[0].reshape(H * W, C).astype(jnp.bfloat16)
    t = jnp.dot(x, w_in_ref[...], preferred_element_type=jnp.float32)

    # zero-padded scratch (conv padding=1).  Full re-zero each step (a ~tens
    # of KB full-vreg store) keeps the pad ring correct regardless of how the
    # "parallel" batch axis is sharded across TensorCores; the interior is
    # overwritten right after (cheap).
    tpad_ref[...] = jnp.zeros_like(tpad_ref)
    tpad_ref[1:H + 1, 1:W + 1, :] = t.reshape(H, W, C)

    # depthwise 3x3: 9-tap MAC, static unroll, f32 on the VPU.
    acc = jnp.zeros((H, W, C), jnp.float32)
    for k in range(9):
        dy, dx = k // 3, k % 3
        acc = acc + w_dw_ref[k] * tpad_ref[dy:dy + H, dx:dx + W, :]
    x1_ref[0] = acc


def spectral_se_kernel(xr_ref, xi_ref, w1_ref, w2_ref, or_ref, oi_ref):
    """xr_ref/xi_ref: (1, H, Wf, C) Re/Im of rfft2(x1).
    Applies SELayer channel gating to |z| and returns the gated Re/Im
    (scale*|z|*cos(angle) == scale*Re(z), same for Im — avoids atan2/cos/sin
    and is exact even at |z| == 0 since torch.angle(0) = 0)."""
    _, H, Wf, C = xr_ref.shape
    xr = xr_ref[0]
    xi = xi_ref[0]
    mag = jnp.sqrt(xr * xr + xi * xi)                       # |rfft2(x1)|
    # SELayer: adaptive avg-pool over spatial -> FC -> ReLU -> FC -> sigmoid.
    # FCs are done as VPU broadcast-multiply + reductions: Cr = C//16 is tiny,
    # so MXU matmuls would be padded ~64x in the lane dim (pure overhead).
    pooled = (jnp.sum(mag, axis=(0, 1)) * (1.0 / (H * Wf))).reshape(1, C)
    # w1_ref: (Cr, C) == torch fc1.weight;  h[j] = sum_c pooled[c] * w1[j, c]
    h = jnp.maximum(jnp.sum(pooled * w1_ref[...], axis=1, keepdims=True), 0.0)
    # w2_ref: (Cr, C) == torch fc2.weight.T; s[c] = sum_j h[j] * w2[j, c]
    s = jax.nn.sigmoid(jnp.sum(h * w2_ref[...], axis=0, keepdims=True))
    scale = s.reshape(1, 1, C)
    or_ref[0] = scale * xr
    oi_ref[0] = scale * xi


def gelu_gate_project_out_kernel(x1_ref, x2_ref, w_ref, o_ref):
    _, H, W, C = x1_ref.shape
    gated = _gelu_exact(x1_ref[0]) * x2_ref[0]              # f32 elementwise
    o = jnp.dot(gated.reshape(H * W, C).astype(jnp.bfloat16), w_ref[...],
                preferred_element_type=jnp.float32)
    o_ref[0] = o.reshape(H, W, C)


# ---------------------------------------------------------------------------
# wrapper
# ---------------------------------------------------------------------------
def sftffn_forward(x, params):
    """x: (B, H, W, C) float32 NHWC.  params are torch-shaped weights."""
    w_in, w_dw, w_out, fc1, fc2 = params
    B, H, W, C = x.shape
    Wf = W // 2 + 1
    Cr = fc1.shape[0]

    # --- weight reorganization (dead-half elimination + matmul form) -------
    # x1 = chunk(dwconv(project_in(x)), 2)[0]; the dwconv is depthwise, so
    # only the first C output channels of project_in / the first C depthwise
    # filters contribute.  The x2 half is discarded by the torch forward.
    w_in_x1 = jnp.transpose(w_in[:C, :, 0, 0]).astype(jnp.bfloat16)      # (C, C)
    w_dw_x1 = jnp.transpose(w_dw[:C, 0].reshape(C, 9))                   # (9, C)
    w_out_m = jnp.transpose(w_out[:, :, 0, 0]).astype(jnp.bfloat16)      # (C, C)
    w1_se = fc1                                                          # (Cr, C)
    w2_se = jnp.transpose(fc2)                                           # (Cr, C)

    cp = pltpu.CompilerParams(
        dimension_semantics=("parallel",),            # batch elems independent
        vmem_limit_bytes=48 * 1024 * 1024)            # headroom < v7x 64 MiB

    # 1+2) fused project_in + zero-pad + depthwise 3x3 conv -> x1
    x1 = pl.pallas_call(
        fused_project_in_dwconv_kernel,
        out_shape=jax.ShapeDtypeStruct((B, H, W, C), jnp.float32),
        grid=(B,),
        in_specs=[pl.BlockSpec((1, H, W, C), lambda b: (b, 0, 0, 0)),
                  pl.BlockSpec((C, C), lambda b: (0, 0)),
                  pl.BlockSpec((9, C), lambda b: (0, 0))],
        out_specs=pl.BlockSpec((1, H, W, C), lambda b: (b, 0, 0, 0)),
        scratch_shapes=[pltpu.VMEM((H + 2, W + 2, C), jnp.float32)],
        compiler_params=cp,
    )(x, w_in_x1, w_dw_x1)

    # 3) TODO(synk): FFT has no Pallas primitive; rfft2/irfft2 stay in XLA.
    xf = jnp.fft.rfft2(x1, axes=(1, 2))                   # (B, H, Wf, C) c64
    xr = jnp.real(xf)                                      # (B, H, Wf, C) f32
    xi = jnp.imag(xf)

    # 4) magnitude + SE channel gating in the frequency domain.
    #    Re/Im are separate in/out streams (no stack/unstack HBM copies).
    spec_blk = pl.BlockSpec((1, H, Wf, C), lambda b: (b, 0, 0, 0))
    zr, zi = pl.pallas_call(
        spectral_se_kernel,
        out_shape=(jax.ShapeDtypeStruct((B, H, Wf, C), jnp.float32),
                   jax.ShapeDtypeStruct((B, H, Wf, C), jnp.float32)),
        grid=(B,),
        in_specs=[spec_blk, spec_blk,
                  pl.BlockSpec((Cr, C), lambda b: (0, 0)),
                  pl.BlockSpec((Cr, C), lambda b: (0, 0))],
        out_specs=(spec_blk, spec_blk),
        compiler_params=cp,
    )(xr, xi, w1_se, w2_se)

    # 5) inverse FFT back to the spatial domain
    x2 = jnp.fft.irfft2(jax.lax.complex(zr, zi),
                        s=(H, W), axes=(1, 2)).astype(jnp.float32)

    # 6) gelu gate + project_out (1x1 conv == matmul)
    out = pl.pallas_call(
        gelu_gate_project_out_kernel,
        out_shape=jax.ShapeDtypeStruct((B, H, W, C), jnp.float32),
        grid=(B,),
        in_specs=[pl.BlockSpec((1, H, W, C), lambda b: (b, 0, 0, 0)),
                  pl.BlockSpec((1, H, W, C), lambda b: (b, 0, 0, 0)),
                  pl.BlockSpec((C, C), lambda b: (0, 0))],
        out_specs=pl.BlockSpec((1, H, W, C), lambda b: (b, 0, 0, 0)),
        compiler_params=cp,
    )(x1, x2, w_out_m)

    return out


# ---------------------------------------------------------------------------
# deterministic parameter init (torch shapes from SFTFFN / SELayer __init__)
# ---------------------------------------------------------------------------
def init_params(key, dim, reduction=16):
    C, C2, Cr = dim, 2 * dim, dim // reduction
    k1, k2, k3, k4, k5 = jax.random.split(key, 5)
    w_in = 0.1 * jax.random.normal(k1, (C2, C, 1, 1), jnp.float32)   # project_in
    w_dw = 0.1 * jax.random.normal(k2, (C2, 1, 3, 3), jnp.float32)   # dwconv (groups=2C)
    w_out = 0.1 * jax.random.normal(k3, (C, C, 1, 1), jnp.float32)   # project_out
    fc1 = 0.1 * jax.random.normal(k4, (Cr, C), jnp.float32)          # SE Linear(C, C//r)
    fc2 = 0.1 * jax.random.normal(k5, (C, Cr), jnp.float32)          # SE Linear(C//r, C)
    return w_in, w_dw, w_out, fc1, fc2


# ---------------------------------------------------------------------------
# plain-JAX reference (mirrors the torch forward, NHWC).
# matmul_dtype=bfloat16 mirrors the kernel's MXU input casts for a tight check.
# ---------------------------------------------------------------------------
def sftffn_reference(x, params, matmul_dtype=jnp.float32):
    w_in, w_dw, w_out, fc1, fc2 = params
    B, H, W, C = x.shape
    wi = jnp.transpose(w_in[:C, :, 0, 0]).astype(matmul_dtype)   # dead-half sliced
    wd = jnp.transpose(w_dw[:C, 0].reshape(C, 9))
    wo = jnp.transpose(w_out[:, :, 0, 0]).astype(matmul_dtype)
    t = jnp.einsum('bhwc,cd->bhwd', x.astype(matmul_dtype), wi,
                   preferred_element_type=jnp.float32)
    tp = jnp.pad(t, ((0, 0), (1, 1), (1, 1), (0, 0)))
    acc = 0.0
    for k in range(9):
        dy, dx = k // 3, k % 3
        acc = acc + wd[k] * tp[:, dy:dy + H, dx:dx + W, :]
    x1 = acc
    xf = jnp.fft.rfft2(x1, axes=(1, 2))
    mag = jnp.abs(xf)
    pha = jnp.angle(xf)
    pooled = jnp.mean(mag, axis=(1, 2))                          # SE avg-pool
    h = jnp.maximum(pooled @ fc1.T, 0.0)
    s = jax.nn.sigmoid(h @ fc2.T)
    mag = mag * s[:, None, None, :]
    x_fft = jax.lax.complex(mag * jnp.cos(pha), mag * jnp.sin(pha))
    x2 = jnp.fft.irfft2(x_fft, s=(H, W), axes=(1, 2))
    gated = 0.5 * x1 * (1.0 + jax.scipy.special.erf(x1 / jnp.sqrt(2.0))) * x2
    return jnp.einsum('bhwc,cd->bhwd', gated.astype(matmul_dtype), wo,
                      preferred_element_type=jnp.float32)


if __name__ == "__main__":
    B, C, H, W = 2, 32, 16, 16      # dim=32 -> SE hidden = 32 // 16 = 2
    key = jax.random.PRNGKey(0)
    kx, kp = jax.random.split(key)
    # layout: NHWC input (the PyTorch module would see the NCHW transpose)
    x = jax.random.normal(kx, (B, H, W, C), jnp.float32)
    params = init_params(kp, C)

    out = jax.jit(sftffn_forward)(x, params)
    out = jax.block_until_ready(out)
    assert out.shape == (B, H, W, C)

    # tight check: reference mirrors the kernel's bf16 MXU-input casts
    ref_bf = sftffn_reference(x, params, matmul_dtype=jnp.bfloat16)
    scl = float(jnp.max(jnp.abs(ref_bf))) + 1e-6
    err = float(jnp.max(jnp.abs(out - ref_bf)))
    assert err / scl < 1e-2, f"mismatch vs bf16-matmul ref: rel={err / scl}"

    # loose check: pure-f32 torch-mirror; residual is bf16 MXU quantization
    ref32 = sftffn_reference(x, params, matmul_dtype=jnp.float32)
    scl32 = float(jnp.max(jnp.abs(ref32))) + 1e-6
    err32 = float(jnp.max(jnp.abs(out - ref32)))
    assert err32 / scl32 < 5e-2, f"mismatch vs f32 ref: rel={err32 / scl32}"

    print("KERNEL_OK")
</pallas_src>

<mosaic_0001>
module attributes {stable_mosaic.version = 11 : i64} {
  func.func @fused_project_in_dwconv_kernel(%arg0: i32, %arg1: memref<1x16x16x32xf32, #tpu.memory_space<vmem>>, %arg2: memref<32x32xbf16, #tpu.memory_space<vmem>>, %arg3: memref<9x32xf32, #tpu.memory_space<vmem>>, %arg4: memref<1x16x16x32xf32, #tpu.memory_space<vmem>>, %arg5: memref<18x18x32xf32, #tpu.memory_space<vmem>>) attributes {dimension_semantics = [#tpu.dimension_semantics<parallel>], iteration_bounds = array<i64: 2>, scalar_prefetch = 0 : i64, scratch_operands = 1 : i64, tpu.core_type = #tpu.core_type<tc>, window_params = [{transform_indices = @transform_0, window_bounds = array<i64: 1, 16, 16, 32>}, {pipeline_mode = #tpu.pipeline_mode<synchronous>, transform_indices = @transform_1, window_bounds = array<i64: 32, 32>}, {pipeline_mode = #tpu.pipeline_mode<synchronous>, transform_indices = @transform_2, window_bounds = array<i64: 9, 32>}, {transform_indices = @transform_3, window_bounds = array<i64: 1, 16, 16, 32>}]} {
    %c0 = arith.constant 0 : index
    %c0_0 = arith.constant 0 : index
    %c0_1 = arith.constant 0 : index
    %c0_2 = arith.constant 0 : index
    %0 = vector.load %arg1[%c0, %c0_0, %c0_1, %c0_2] : memref<1x16x16x32xf32, #tpu.memory_space<vmem>>, vector<1x16x16x32xf32>
    %1 = vector.shape_cast %0 : vector<1x16x16x32xf32> to vector<16x16x32xf32>
    %2 = vector.shape_cast %1 : vector<16x16x32xf32> to vector<256x32xf32>
    %3 = arith.truncf %2 : vector<256x32xf32> to vector<256x32xbf16>
    %c0_3 = arith.constant 0 : index
    %c0_4 = arith.constant 0 : index
    %4 = vector.load %arg2[%c0_3, %c0_4] : memref<32x32xbf16, #tpu.memory_space<vmem>>, vector<32x32xbf16>
    %cst = arith.constant dense<0.000000e+00> : vector<256x32xf32>
    %5 = tpu.matmul %3, %4, %cst {dimension_numbers = #tpu.dot_dimension_numbers<[1], [0], [0], [1], [0, 0, 1, 1], [], []>} : vector<256x32xbf16>, vector<32x32xbf16>, vector<256x32xf32> -> vector<256x32xf32>
    %cst_5 = arith.constant 0.000000e+00 : f32
    %6 = vector.broadcast %cst_5 : f32 to vector<18x18x32xf32>
    %c0_6 = arith.constant 0 : index
    %c0_7 = arith.constant 0 : index
    %c0_8 = arith.constant 0 : index
    %7 = vector.load %arg5[%c0_6, %c0_7, %c0_8] : memref<18x18x32xf32, #tpu.memory_space<vmem>>, vector<18x18x32xf32>
    tpu.vector_store %arg5[%c0_6, %c0_7, %c0_8], %6 {strides = array<i32>} : memref<18x18x32xf32, #tpu.memory_space<vmem>>, vector<18x18x32xf32>,
    %8 = vector.shape_cast %5 : vector<256x32xf32> to vector<16x16x32xf32>
    %c1 = arith.constant 1 : index
    %c1_9 = arith.constant 1 : index
    %c0_10 = arith.constant 0 : index
    %9 = vector.load %arg5[%c1, %c1_9, %c0_10] : memref<18x18x32xf32, #tpu.memory_space<vmem>>, vector<16x16x32xf32>
    tpu.vector_store %arg5[%c1, %c1_9, %c0_10], %8 {strides = array<i32>} : memref<18x18x32xf32, #tpu.memory_space<vmem>>, vector<16x16x32xf32>,
    %cst_11 = arith.constant 0.000000e+00 : f32
    %10 = vector.broadcast %cst_11 : f32 to vector<16x16x32xf32>
    %c0_12 = arith.constant 0 : index
    %c0_13 = arith.constant 0 : index
    %11 = vector.load %arg3[%c0_12, %c0_13] : memref<9x32xf32, #tpu.memory_space<vmem>>, vector<1x32xf32>
    %12 = vector.shape_cast %11 : vector<1x32xf32> to vector<32xf32>
    %c0_14 = arith.constant 0 : index
    %c0_15 = arith.constant 0 : index
    %c0_16 = arith.constant 0 : index
    %13 = vector.load %arg5[%c0_14, %c0_15, %c0_16] : memref<18x18x32xf32, #tpu.memory_space<vmem>>, vector<16x16x32xf32>
    %14 = vector.shape_cast %12 : vector<32xf32> to vector<1x1x32xf32>
    %15 = vector.broadcast %14 : vector<1x1x32xf32> to vector<16x16x32xf32>
    %16 = arith.mulf %15, %13 : vector<16x16x32xf32>
    %17 = arith.addf %10, %16 : vector<16x16x32xf32>
    %c1_17 = arith.constant 1 : index
    %c0_18 = arith.constant 0 : index
    %18 = vector.load %arg3[%c1_17, %c0_18] : memref<9x32xf32, #tpu.memory_space<vmem>>, vector<1x32xf32>
    %19 = vector.shape_cast %18 : vector<1x32xf32> to vector<32xf32>
    %c0_19 = arith.constant 0 : index
    %c1_20 = arith.constant 1 : index
    %c0_21 = arith.constant 0 : index
    %20 = vector.load %arg5[%c0_19, %c1_20, %c0_21] : memref<18x18x32xf32, #tpu.memory_space<vmem>>, vector<16x16x32xf32>
    %21 = vector.shape_cast %19 : vector<32xf32> to vector<1x1x32xf32>
    %22 = vector.broadcast %21 : vector<1x1x32xf32> to vector<16x16x32xf32>
    %23 = arith.mulf %22, %20 : vector<16x16x32xf32>
    %24 = arith.addf %17, %23 : vector<16x16x32xf32>
    %c2 = arith.constant 2 : index
    %c0_22 = arith.constant 0 : index
    %25 = vector.load %arg3[%c2, %c0_22] : memref<9x32xf32, #tpu.memory_space<vmem>>, vector<1x32xf32>
    %26 = vector.shape_cast %25 : vector<1x32xf32> to vector<32xf32>
    %c0_23 = arith.constant 0 : index
    %c2_24 = arith.constant 2 : index
    %c0_25 = arith.constant 0 : index
    %27 = vector.load %arg5[%c0_23, %c2_24, %c0_25] : memref<18x18x32xf32, #tpu.memory_space<vmem>>, vector<16x16x32xf32>
    %28 = vector.shape_cast %26 : vector<32xf32> to vector<1x1x32xf32>
    %29 = vector.broadcast %28 : vector<1x1x32xf32> to vector<16x16x32xf32>
    %30 = arith.mulf %29, %27 : vector<16x16x32xf32>
    %31 = arith.addf %24, %30 : vector<16x16x32xf32>
    %c3 = arith.constant 3 : index
    %c0_26 = arith.constant 0 : index
    %32 = vector.load %arg3[%c3, %c0_26] : memref<9x32xf32, #tpu.memory_space<vmem>>, vector<1x32xf32>
    %33 = vector.shape_cast %32 : vector<1x32xf32> to vector<32xf32>
    %c1_27 = arith.constant 1 : index
    %c0_28 = arith.constant 0 : index
    %c0_29 = arith.constant 0 : index
    %34 = vector.load %arg5[%c1_27, %c0_28, %c0_29] : memref<18x18x32xf32, #tpu.memory_space<vmem>>, vector<16x16x32xf32>
    %35 = vector.shape_cast %33 : vector<32xf32> to vector<1x1x32xf32>
    %36 = vector.broadcast %35 : vector<1x1x32xf32> to vector<16x16x32xf32>
    %37 = arith.mulf %36, %34 : vector<16x16x32xf32>
    %38 = arith.addf %31, %37 : vector<16x16x32xf32>
    %c4 = arith.constant 4 : index
    %c0_30 = arith.constant 0 : index
    %39 = vector.load %arg3[%c4, %c0_30] : memref<9x32xf32, #tpu.memory_space<vmem>>, vector<1x32xf32>
    %40 = vector.shape_cast %39 : vector<1x32xf32> to vector<32xf32>
    %c1_31 = arith.constant 1 : index
    %c1_32 = arith.constant 1 : index
    %c0_33 = arith.constant 0 : index
    %41 = vector.load %arg5[%c1_31, %c1_32, %c0_33] : memref<18x18x32xf32, #tpu.memory_space<vmem>>, vector<16x16x32xf32>
    %42 = vector.shape_cast %40 : vector<32xf32> to vector<1x1x32xf32>
    %43 = vector.broadcast %42 : vector<1x1x32xf32> to vector<16x16x32xf32>
    %44 = arith.mulf %43, %41 : vector<16x16x32xf32>
    %45 = arith.addf %38, %44 : vector<16x16x32xf32>
    %c5 = arith.constant 5 : index
    %c0_34 = arith.constant 0 : index
    %46 = vector.load %arg3[%c5, %c0_34] : memref<9x32xf32, #tpu.memory_space<vmem>>, vector<1x32xf32>
    %47 = vector.shape_cast %46 : vector<1x32xf32> to vector<32xf32>
    %c1_35 = arith.constant 1 : index
    %c2_36 = arith.constant 2 : index
    %c0_37 = arith.constant 0 : index
    %48 = vector.load %arg5[%c1_35, %c2_36, %c0_37] : memref<18x18x32xf32, #tpu.memory_space<vmem>>, vector<16x16x32xf32>
    %49 = vector.shape_cast %47 : vector<32xf32> to vector<1x1x32xf32>
    %50 = vector.broadcast %49 : vector<1x1x32xf32> to vector<16x16x32xf32>
    %51 = arith.mulf %50, %48 : vector<16x16x32xf32>
    %52 = arith.addf %45, %51 : vector<16x16x32xf32>
    %c6 = arith.constant 6 : index
    %c0_38 = arith.constant 0 : index
    %53 = vector.load %arg3[%c6, %c0_38] : memref<9x32xf32, #tpu.memory_space<vmem>>, vector<1x32xf32>
    %54 = vector.shape_cast %53 : vector<1x32xf32> to vector<32xf32>
    %c2_39 = arith.constant 2 : index
    %c0_40 = arith.constant 0 : index
    %c0_41 = arith.constant 0 : index
    %55 = vector.load %arg5[%c2_39, %c0_40, %c0_41] : memref<18x18x32xf32, #tpu.memory_space<vmem>>, vector<16x16x32xf32>
    %56 = vector.shape_cast %54 : vector<32xf32> to vector<1x1x32xf32>
    %57 = vector.broadcast %56 : vector<1x1x32xf32> to vector<16x16x32xf32>
    %58 = arith.mulf %57, %55 : vector<16x16x32xf32>
    %59 = arith.addf %52, %58 : vector<16x16x32xf32>
    %c7 = arith.constant 7 : index
    %c0_42 = arith.constant 0 : index
    %60 = vector.load %arg3[%c7, %c0_42] : memref<9x32xf32, #tpu.memory_space<vmem>>, vector<1x32xf32>
    %61 = vector.shape_cast %60 : vector<1x32xf32> to vector<32xf32>
    %c2_43 = arith.constant 2 : index
    %c1_44 = arith.constant 1 : index
    %c0_45 = arith.constant 0 : index
    %62 = vector.load %arg5[%c2_43, %c1_44, %c0_45] : memref<18x18x32xf32, #tpu.memory_space<vmem>>, vector<16x16x32xf32>
    %63 = vector.shape_cast %61 : vector<32xf32> to vector<1x1x32xf32>
    %64 = vector.broadcast %63 : vector<1x1x32xf32> to vector<16x16x32xf32>
    %65 = arith.mulf %64, %62 : vector<16x16x32xf32>
    %66 = arith.addf %59, %65 : vector<16x16x32xf32>
    %c8 = arith.constant 8 : index
    %c0_46 = arith.constant 0 : index
    %67 = vector.load %arg3[%c8, %c0_46] : memref<9x32xf32, #tpu.memory_space<vmem>>, vector<1x32xf32>
    %68 = vector.shape_cast %67 : vector<1x32xf32> to vector<32xf32>
    %c2_47 = arith.constant 2 : index
    %c2_48 = arith.constant 2 : index
    %c0_49 = arith.constant 0 : index
    %69 = vector.load %arg5[%c2_47, %c2_48, %c0_49] : memref<18x18x32xf32, #tpu.memory_space<vmem>>, vector<16x16x32xf32>
    %70 = vector.shape_cast %68 : vector<32xf32> to vector<1x1x32xf32>
    %71 = vector.broadcast %70 : vector<1x1x32xf32> to vector<16x16x32xf32>
    %72 = arith.mulf %71, %69 : vector<16x16x32xf32>
    %73 = arith.addf %66, %72 : vector<16x16x32xf32>
    %c0_50 = arith.constant 0 : index
    %c0_51 = arith.constant 0 : index
    %c0_52 = arith.constant 0 : index
    %c0_53 = arith.constant 0 : index
    %74 = vector.load %arg4[%c0_50, %c0_51, %c0_52, %c0_53] : memref<1x16x16x32xf32, #tpu.memory_space<vmem>>, vector<1x16x16x32xf32>
    %75 = vector.shape_cast %74 : vector<1x16x16x32xf32> to vector<16x16x32xf32>
    %76 = vector.shape_cast %73 : vector<16x16x32xf32> to vector<1x16x16x32xf32>
    tpu.vector_store %arg4[%c0_50, %c0_51, %c0_52, %c0_53], %76 {strides = array<i32>} : memref<1x16x16x32xf32, #tpu.memory_space<vmem>>, vector<1x16x16x32xf32>,
    return
  }
  func.func @transform_0(%arg0: i32) -> (i32, i32, i32, i32) {
    %c0_i32 = arith.constant 0 : i32
    %c0_i32_0 = arith.constant 0 : i32
    %c0_i32_1 = arith.constant 0 : i32
    %c0_i32_2 = arith.constant 0 : i32
    return %arg0, %c0_i32, %c0_i32_0, %c0_i32_1 : i32, i32, i32, i32
  }
  func.func @transform_1(%arg0: i32) -> (i32, i32) {
    %c0_i32 = arith.constant 0 : i32
    %c0_i32_0 = arith.constant 0 : i32
    %c0_i32_1 = arith.constant 0 : i32
    return %c0_i32, %c0_i32_0 : i32, i32
  }
  func.func @transform_2(%arg0: i32) -> (i32, i32) {
    %c0_i32 = arith.constant 0 : i32
    %c0_i32_0 = arith.constant 0 : i32
    %c0_i32_1 = arith.constant 0 : i32
    return %c0_i32, %c0_i32_0 : i32, i32
  }
  func.func @transform_3(%arg0: i32) -> (i32, i32, i32, i32) {
    %c0_i32 = arith.constant 0 : i32
    %c0_i32_0 = arith.constant 0 : i32
    %c0_i32_1 = arith.constant 0 : i32
    %c0_i32_2 = arith.constant 0 : i32
    return %arg0, %c0_i32, %c0_i32_0, %c0_i32_1 : i32, i32, i32, i32
  }
}

module attributes {stable_mosaic.version = 11 : i64} {
  func.func @spectral_se_kernel(%arg0: i32, %arg1: memref<1x16x9x32xf32, #tpu.memory_space<vmem>>, %arg2: memref<1x16x9x32xf32, #tpu.memory_space<vmem>>, %arg3: memref<2x32xf32, #tpu.memory_space<vmem>>, %arg4: memref<2x32xf32, #tpu.memory_space<vmem>>, %arg5: memref<1x16x9x32xf32, #tpu.memory_space<vmem>>, %arg6: memref<1x16x9x32xf32, #tpu.memory_space<vmem>>) attributes {dimension_semantics = [#tpu.dimension_semantics<parallel>], iteration_bounds = array<i64: 2>, scalar_prefetch = 0 : i64, scratch_operands = 0 : i64, tpu.core_type = #tpu.core_type<tc>, window_params = [{transform_indices = @transform_0, window_bounds = array<i64: 1, 16, 9, 32>}, {transform_indices = @transform_1, window_bounds = array<i64: 1, 16, 9, 32>}, {pipeline_mode = #tpu.pipeline_mode<synchronous>, transform_indices = @transform_2, window_bounds = array<i64: 2, 32>}, {pipeline_mode = #tpu.pipeline_mode<synchronous>, transform_indices = @transform_3, window_bounds = array<i64: 2, 32>}, {transform_indices = @transform_4, window_bounds = array<i64: 1, 16, 9, 32>}, {transform_indices = @transform_5, window_bounds = array<i64: 1, 16, 9, 32>}]} {
    %c0 = arith.constant 0 : index
    %c0_0 = arith.constant 0 : index
    %c0_1 = arith.constant 0 : index
    %c0_2 = arith.constant 0 : index
    %0 = vector.load %arg1[%c0, %c0_0, %c0_1, %c0_2] : memref<1x16x9x32xf32, #tpu.memory_space<vmem>>, vector<1x16x9x32xf32>
    %1 = vector.shape_cast %0 : vector<1x16x9x32xf32> to vector<16x9x32xf32>
    %c0_3 = arith.constant 0 : index
    %c0_4 = arith.constant 0 : index
    %c0_5 = arith.constant 0 : index
    %c0_6 = arith.constant 0 : index
    %2 = vector.load %arg2[%c0_3, %c0_4, %c0_5, %c0_6] : memref<1x16x9x32xf32, #tpu.memory_space<vmem>>, vector<1x16x9x32xf32>
    %3 = vector.shape_cast %2 : vector<1x16x9x32xf32> to vector<16x9x32xf32>
    %4 = arith.mulf %1, %1 : vector<16x9x32xf32>
    %5 = arith.mulf %3, %3 : vector<16x9x32xf32>
    %6 = arith.addf %4, %5 : vector<16x9x32xf32>
    %7 = math.sqrt %6 : vector<16x9x32xf32>
    %cst = arith.constant dense<0.000000e+00> : vector<32xf32>
    %8 = vector.multi_reduction <add>, %7, %cst [0, 1] : vector<16x9x32xf32> to vector<32xf32>
    %cst_7 = arith.constant 0.0069444445 : f32
    %9 = vector.broadcast %cst_7 : f32 to vector<32xf32>
    %10 = arith.mulf %8, %9 : vector<32xf32>
    %11 = vector.shape_cast %10 : vector<32xf32> to vector<1x32xf32>
    %c0_8 = arith.constant 0 : index
    %c0_9 = arith.constant 0 : index
    %12 = vector.load %arg3[%c0_8, %c0_9] : memref<2x32xf32, #tpu.memory_space<vmem>>, vector<2x32xf32>
    %13 = vector.broadcast %11 : vector<1x32xf32> to vector<2x32xf32>
    %14 = arith.mulf %13, %12 : vector<2x32xf32>
    %cst_10 = arith.constant dense<0.000000e+00> : vector<2xf32>
    %15 = vector.multi_reduction <add>, %14, %cst_10 [1] : vector<2x32xf32> to vector<2xf32>
    %16 = vector.shape_cast %15 : vector<2xf32> to vector<2x1xf32>
    %cst_11 = arith.constant 0.000000e+00 : f32
    %17 = vector.broadcast %cst_11 : f32 to vector<2x1xf32>
    %18 = arith.maximumf %16, %17 : vector<2x1xf32>
    %c0_12 = arith.constant 0 : index
    %c0_13 = arith.constant 0 : index
    %19 = vector.load %arg4[%c0_12, %c0_13] : memref<2x32xf32, #tpu.memory_space<vmem>>, vector<2x32xf32>
    %20 = vector.broadcast %18 : vector<2x1xf32> to vector<2x32xf32>
    %21 = arith.mulf %20, %19 : vector<2x32xf32>
    %cst_14 = arith.constant dense<0.000000e+00> : vector<32xf32>
    %22 = vector.multi_reduction <add>, %21, %cst_14 [0] : vector<2x32xf32> to vector<32xf32>
    %23 = vector.shape_cast %22 : vector<32xf32> to vector<1x32xf32>
    %24 = arith.negf %23 : vector<1x32xf32>
    %25 = math.exp %24 : vector<1x32xf32>
    %cst_15 = arith.constant 1.000000e+00 : f32
    %26 = vector.broadcast %cst_15 : f32 to vector<1x32xf32>
    %27 = arith.addf %26, %25 : vector<1x32xf32>
    %28 = arith.divf %26, %27 : vector<1x32xf32>
    %29 = vector.shape_cast %28 : vector<1x32xf32> to vector<1x1x32xf32>
    %30 = vector.broadcast %29 : vector<1x1x32xf32> to vector<16x9x32xf32>
    %31 = arith.mulf %30, %1 : vector<16x9x32xf32>
    %c0_16 = arith.constant 0 : index
    %c0_17 = arith.constant 0 : index
    %c0_18 = arith.constant 0 : index
    %c0_19 = arith.constant 0 : index
    %32 = vector.load %arg5[%c0_16, %c0_17, %c0_18, %c0_19] : memref<1x16x9x32xf32, #tpu.memory_space<vmem>>, vector<1x16x9x32xf32>
    %33 = vector.shape_cast %32 : vector<1x16x9x32xf32> to vector<16x9x32xf32>
    %34 = vector.shape_cast %31 : vector<16x9x32xf32> to vector<1x16x9x32xf32>
    tpu.vector_store %arg5[%c0_16, %c0_17, %c0_18, %c0_19], %34 {strides = array<i32>} : memref<1x16x9x32xf32, #tpu.memory_space<vmem>>, vector<1x16x9x32xf32>,
    %35 = vector.broadcast %29 : vector<1x1x32xf32> to vector<16x9x32xf32>
    %36 = arith.mulf %35, %3 : vector<16x9x32xf32>
    %c0_20 = arith.constant 0 : index
    %c0_21 = arith.constant 0 : index
    %c0_22 = arith.constant 0 : index
    %c0_23 = arith.constant 0 : index
    %37 = vector.load %arg6[%c0_20, %c0_21, %c0_22, %c0_23] : memref<1x16x9x32xf32, #tpu.memory_space<vmem>>, vector<1x16x9x32xf32>
    %38 = vector.shape_cast %37 : vector<1x16x9x32xf32> to vector<16x9x32xf32>
    %39 = vector.shape_cast %36 : vector<16x9x32xf32> to vector<1x16x9x32xf32>
    tpu.vector_store %arg6[%c0_20, %c0_21, %c0_22, %c0_23], %39 {strides = array<i32>} : memref<1x16x9x32xf32, #tpu.memory_space<vmem>>, vector<1x16x9x32xf32>,
    return
  }
  func.func @transform_0(%arg0: i32) -> (i32, i32, i32, i32) {
    %c0_i32 = arith.constant 0 : i32
    %c0_i32_0 = arith.constant 0 : i32
    %c0_i32_1 = arith.constant 0 : i32
    %c0_i32_2 = arith.constant 0 : i32
    return %arg0, %c0_i32, %c0_i32_0, %c0_i32_1 : i32, i32, i32, i32
  }
  func.func @transform_1(%arg0: i32) -> (i32, i32, i32, i32) {
    %c0_i32 = arith.constant 0 : i32
    %c0_i32_0 = arith.constant 0 : i32
    %c0_i32_1 = arith.constant 0 : i32
    %c0_i32_2 = arith.constant 0 : i32
    return %arg0, %c0_i32, %c0_i32_0, %c0_i32_1 : i32, i32, i32, i32
  }
  func.func @transform_2(%arg0: i32) -> (i32, i32) {
    %c0_i32 = arith.constant 0 : i32
    %c0_i32_0 = arith.constant 0 : i32
    %c0_i32_1 = arith.constant 0 : i32
    return %c0_i32, %c0_i32_0 : i32, i32
  }
  func.func @transform_3(%arg0: i32) -> (i32, i32) {
    %c0_i32 = arith.constant 0 : i32
    %c0_i32_0 = arith.constant 0 : i32
    %c0_i32_1 = arith.constant 0 : i32
    return %c0_i32, %c0_i32_0 : i32, i32
  }
  func.func @transform_4(%arg0: i32) -> (i32, i32, i32, i32) {
    %c0_i32 = arith.constant 0 : i32
    %c0_i32_0 = arith.constant 0 : i32
    %c0_i32_1 = arith.constant 0 : i32
    %c0_i32_2 = arith.constant 0 : i32
    return %arg0, %c0_i32, %c0_i32_0, %c0_i32_1 : i32, i32, i32, i32
  }
  func.func @transform_5(%arg0: i32) -> (i32, i32, i32, i32) {
    %c0_i32 = arith.constant 0 : i32
    %c0_i32_0 = arith.constant 0 : i32
    %c0_i32_1 = arith.constant 0 : i32
    %c0_i32_2 = arith.constant 0 : i32
    return %arg0, %c0_i32, %c0_i32_0, %c0_i32_1 : i32, i32, i32, i32
  }
}

module attributes {stable_mosaic.version = 11 : i64} {
  func.func @gelu_gate_project_out_kernel(%arg0: i32, %arg1: memref<1x16x16x32xf32, #tpu.memory_space<vmem>>, %arg2: memref<1x16x16x32xf32, #tpu.memory_space<vmem>>, %arg3: memref<32x32xbf16, #tpu.memory_space<vmem>>, %arg4: memref<1x16x16x32xf32, #tpu.memory_space<vmem>>) attributes {dimension_semantics = [#tpu.dimension_semantics<parallel>], iteration_bounds = array<i64: 2>, scalar_prefetch = 0 : i64, scratch_operands = 0 : i64, tpu.core_type = #tpu.core_type<tc>, window_params = [{transform_indices = @transform_0, window_bounds = array<i64: 1, 16, 16, 32>}, {transform_indices = @transform_1, window_bounds = array<i64: 1, 16, 16, 32>}, {pipeline_mode = #tpu.pipeline_mode<synchronous>, transform_indices = @transform_2, window_bounds = array<i64: 32, 32>}, {transform_indices = @transform_3, window_bounds = array<i64: 1, 16, 16, 32>}]} {
    %c0 = arith.constant 0 : index
    %c0_0 = arith.constant 0 : index
    %c0_1 = arith.constant 0 : index
    %c0_2 = arith.constant 0 : index
    %0 = vector.load %arg1[%c0, %c0_0, %c0_1, %c0_2] : memref<1x16x16x32xf32, #tpu.memory_space<vmem>>, vector<1x16x16x32xf32>
    %1 = vector.shape_cast %0 : vector<1x16x16x32xf32> to vector<16x16x32xf32>
    %cst = arith.constant 5.000000e-01 : f32
    %2 = vector.broadcast %cst : f32 to vector<16x16x32xf32>
    %3 = arith.mulf %2, %1 : vector<16x16x32xf32>
    %cst_3 = arith.constant 0.707106769 : f32
    %4 = vector.broadcast %cst_3 : f32 to vector<16x16x32xf32>
    %5 = arith.mulf %1, %4 : vector<16x16x32xf32>
    %cst_4 = arith.constant 0.000000e+00 : f32
    %6 = vector.broadcast %cst_4 : f32 to vector<16x16x32xf32>
    %7 = arith.cmpf oge, %5, %6 : vector<16x16x32xf32>
    %cst_5 = arith.constant 1.000000e+00 : f32
    %cst_6 = arith.constant -1.000000e+00 : f32
    %8 = vector.broadcast %cst_5 : f32 to vector<16x16x32xf32>
    %9 = vector.broadcast %cst_6 : f32 to vector<16x16x32xf32>
    %10 = arith.select %7, %8, %9 : vector<16x16x32xi1>, vector<16x16x32xf32>
    %11 = math.absf %5 : vector<16x16x32xf32>
    %cst_7 = arith.constant 0.327591091 : f32
    %12 = vector.broadcast %cst_7 : f32 to vector<16x16x32xf32>
    %13 = arith.mulf %12, %11 : vector<16x16x32xf32>
    %cst_8 = arith.constant 1.000000e+00 : f32
    %14 = vector.broadcast %cst_8 : f32 to vector<16x16x32xf32>
    %15 = arith.addf %14, %13 : vector<16x16x32xf32>
    %cst_9 = arith.constant 1.000000e+00 : f32
    %16 = vector.broadcast %cst_9 : f32 to vector<16x16x32xf32>
    %17 = arith.divf %16, %15 : vector<16x16x32xf32>
    %cst_10 = arith.constant 1.06140542 : f32
    %18 = vector.broadcast %cst_10 : f32 to vector<16x16x32xf32>
    %19 = arith.mulf %18, %17 : vector<16x16x32xf32>
    %cst_11 = arith.constant -1.45315206 : f32
    %20 = vector.broadcast %cst_11 : f32 to vector<16x16x32xf32>
    %21 = arith.addf %19, %20 : vector<16x16x32xf32>
    %22 = arith.mulf %21, %17 : vector<16x16x32xf32>
    %cst_12 = arith.constant 1.42141378 : f32
    %23 = vector.broadcast %cst_12 : f32 to vector<16x16x32xf32>
    %24 = arith.addf %22, %23 : vector<16x16x32xf32>
    %25 = arith.mulf %24, %17 : vector<16x16x32xf32>
    %cst_13 = arith.constant -0.284496725 : f32
    %26 = vector.broadcast %cst_13 : f32 to vector<16x16x32xf32>
    %27 = arith.addf %25, %26 : vector<16x16x32xf32>
    %28 = arith.mulf %27, %17 : vector<16x16x32xf32>
    %cst_14 = arith.constant 0.254829586 : f32
    %29 = vector.broadcast %cst_14 : f32 to vector<16x16x32xf32>
    %30 = arith.addf %28, %29 : vector<16x16x32xf32>
    %31 = arith.mulf %30, %17 : vector<16x16x32xf32>
    %cst_15 = arith.constant 0.000000e+00 : f32
    %32 = vector.broadcast %cst_15 : f32 to vector<16x16x32xf32>
    %33 = arith.subf %32, %11 : vector<16x16x32xf32>
    %34 = arith.mulf %33, %11 : vector<16x16x32xf32>
    %35 = math.exp %34 : vector<16x16x32xf32>
    %36 = arith.mulf %31, %35 : vector<16x16x32xf32>
    %cst_16 = arith.constant 1.000000e+00 : f32
    %37 = vector.broadcast %cst_16 : f32 to vector<16x16x32xf32>
    %38 = arith.subf %37, %36 : vector<16x16x32xf32>
    %39 = arith.mulf %10, %38 : vector<16x16x32xf32>
    %cst_17 = arith.constant 1.000000e+00 : f32
    %40 = vector.broadcast %cst_17 : f32 to vector<16x16x32xf32>
    %41 = arith.addf %40, %39 : vector<16x16x32xf32>
    %42 = arith.mulf %3, %41 : vector<16x16x32xf32>
    %c0_18 = arith.constant 0 : index
    %c0_19 = arith.constant 0 : index
    %c0_20 = arith.constant 0 : index
    %c0_21 = arith.constant 0 : index
    %43 = vector.load %arg2[%c0_18, %c0_19, %c0_20, %c0_21] : memref<1x16x16x32xf32, #tpu.memory_space<vmem>>, vector<1x16x16x32xf32>
    %44 = vector.shape_cast %43 : vector<1x16x16x32xf32> to vector<16x16x32xf32>
    %45 = arith.mulf %42, %44 : vector<16x16x32xf32>
    %46 = vector.shape_cast %45 : vector<16x16x32xf32> to vector<256x32xf32>
    %47 = arith.truncf %46 : vector<256x32xf32> to vector<256x32xbf16>
    %c0_22 = arith.constant 0 : index
    %c0_23 = arith.constant 0 : index
    %48 = vector.load %arg3[%c0_22, %c0_23] : memref<32x32xbf16, #tpu.memory_space<vmem>>, vector<32x32xbf16>
    %cst_24 = arith.constant dense<0.000000e+00> : vector<256x32xf32>
    %49 = tpu.matmul %47, %48, %cst_24 {dimension_numbers = #tpu.dot_dimension_numbers<[1], [0], [0], [1], [0, 0, 1, 1], [], []>} : vector<256x32xbf16>, vector<32x32xbf16>, vector<256x32xf32> -> vector<256x32xf32>
    %50 = vector.shape_cast %49 : vector<256x32xf32> to vector<16x16x32xf32>
    %c0_25 = arith.constant 0 : index
    %c0_26 = arith.constant 0 : index
    %c0_27 = arith.constant 0 : index
    %c0_28 = arith.constant 0 : index
    %51 = vector.load %arg4[%c0_25, %c0_26, %c0_27, %c0_28] : memref<1x16x16x32xf32, #tpu.memory_space<vmem>>, vector<1x16x16x32xf32>
    %52 = vector.shape_cast %51 : vector<1x16x16x32xf32> to vector<16x16x32xf32>
    %53 = vector.shape_cast %50 : vector<16x16x32xf32> to vector<1x16x16x32xf32>
    tpu.vector_store %arg4[%c0_25, %c0_26, %c0_27, %c0_28], %53 {strides = array<i32>} : memref<1x16x16x32xf32, #tpu.memory_space<vmem>>, vector<1x16x16x32xf32>,
    return
  }
  func.func @transform_0(%arg0: i32) -> (i32, i32, i32, i32) {
    %c0_i32 = arith.constant 0 : i32
    %c0_i32_0 = arith.constant 0 : i32
    %c0_i32_1 = arith.constant 0 : i32
    %c0_i32_2 = arith.constant 0 : i32
    return %arg0, %c0_i32, %c0_i32_0, %c0_i32_1 : i32, i32, i32, i32
  }
  func.func @transform_1(%arg0: i32) -> (i32, i32, i32, i32) {
    %c0_i32 = arith.constant 0 : i32
    %c0_i32_0 = arith.constant 0 : i32
    %c0_i32_1 = arith.constant 0 : i32
    %c0_i32_2 = arith.constant 0 : i32
    return %arg0, %c0_i32, %c0_i32_0, %c0_i32_1 : i32, i32, i32, i32
  }
  func.func @transform_2(%arg0: i32) -> (i32, i32) {
    %c0_i32 = arith.constant 0 : i32
    %c0_i32_0 = arith.constant 0 : i32
    %c0_i32_1 = arith.constant 0 : i32
    return %c0_i32, %c0_i32_0 : i32, i32
  }
  func.func @transform_3(%arg0: i32) -> (i32, i32, i32, i32) {
    %c0_i32 = arith.constant 0 : i32
    %c0_i32_0 = arith.constant 0 : i32
    %c0_i32_1 = arith.constant 0 : i32
    %c0_i32_2 = arith.constant 0 : i32
    return %arg0, %c0_i32, %c0_i32_0, %c0_i32_1 : i32, i32, i32, i32
  }
}

</mosaic_0001>

<bundles_post_ra>
// kernel: squeeze.4
= control target key start
LH: loop header
LB: loop body
LE: loop exit
PB: predicated region body
PF: predicated region fallthrough
CT: control target
= control target key end

     0   :  { %vm16_vm0 = vcmask 261120   ;;  %s61_s0 = inlined_call_operand.vmem [shape: f32[32,3,3], index: 0, kind: input, shape index: {}]   ;;  %s62_s1 = inlined_call_operand.vmem [shape: f32[32,9], index: 1, kind: output, shape index: {}]  }
   0x1   :  { %v29_v0 = vld [vmem:[%s61_s0 + $0x8] sm:$0xf]  ;;  %v30_v1 = vld [vmem:[%s61_s0 + $0x4] sm:$0xf]  ;;  %v13_v2 = vld [vmem:[%s61_s0] sm:$0xf] }
   0x2   :  { %8 = vst [vmem:[#allocation0 + $0x10] sm:$0xf] %v29_v0  ;;  %12 = vst [vmem:[#allocation0 + $0x8] sm:$0xf] %v30_v1 }
   0x3   :  { %14 = vst [vmem:[#allocation0] sm:$0xf] %v13_v2 }
   0x9   :  { %v19_v4 = vld [vmem:[#allocation0 + $0x8] sm:$0x7]   ;;  %v24_v5 = vld [vmem:[#allocation0 + $0x10] sm:$0x7]  }
   0xa   :  { %v15_v3 = vld [vmem:[#allocation0] sm:$0x7]   ;;  %31 = vst.msk [vmem:[%s62_s1 + $0x3] sm:$0x7] %vm16_vm0, %v19_v4   ;;  %32 = vst.msk [vmem:[%s62_s1 + $0x6] sm:$0x7] %vm16_vm0, %v24_v5  }
   0xb   :  { %17 = vst.msk [vmem:[%s62_s1] sm:$0x7] %vm16_vm0, %v15_v3  }

// kernel: sftffn_forward.3
= control target key start
LH: loop header
LB: loop body
LE: loop exit
PB: predicated region body
PF: predicated region fallthrough
CT: control target
= control target key end

     0   :  { %8 = vsyncpa [#allocation4], 0  ;;  %s2957_s0 = inlined_call_operand.hbm [shape: f32[2,16,16,32], index: 0, kind: input, shape index: {}]   ;;  %s2958_s1 = inlined_call_operand.vmem [shape: bf16[32,32], index: 1, kind: input, shape index: {}]   ;;  %s2959_s2 = inlined_call_operand.vmem [shape: f32[9,32], index: 2, kind: input, shape index: {}]   ;;  %s2960_s3 = inlined_call_operand.vmem [shape: f32[2,16,16,32], index: 3, kind: output, shape index: {}]  }
   0x1   :  { %10 = vsyncpa [#allocation4 + $0x1], 0  ;;  %s1805_s12 = smov 0   ;;  %s1807_s13 = smov 0  }
   0x2   :  { %s1809_s14 = smov 0   ;;  %s1811_s15 = smov 0  }
   0x3 LB: > { %s1824_s16 = sadd.s32 4294967295, %s1779_s15   ;;  %s1827_s17 = sadd.s32 1, %s1779_s15   ;;  %s1779_s15 = sphi %s1811_s15, %s3043_s15   ;;  %s1775_s14 = sphi %s1809_s14, %s3042_s14   ;;  %s1771_s13 = sphi %s1807_s13, %s3041_s13   ;;  %s1767_s12 = sphi %s1805_s12, %s3040_s12  }
   0x4   : > { %s20_s18 = ssub.s32 %s1779_s15, %s1827_s17  ;;  %s23_s19 = sadd.s32 1, %s1775_s14 }
   0x5   : > { %p21_p0 = scmp.eq.s32.totalorder %s20_s18, 0  ;;  %p30_p1 = scmp.ne.s32.totalorder %s1775_s14, %s1771_s13 }
   0x6   : > { %p31_p2 = scmp.eq.s32.totalorder %s1779_s15, 0  ;;  %p36_p3 = scmp.ne.s32.totalorder %s1771_s13, %s1767_s12 }
   0x7   : > { %s1837_s20 = scalar_select %p21_p0, %s1775_s14, %s23_s19  }
   0x8   : > { %p32_p4 = por %p31_p2, %p30_p1  ;;  %p37_p5 = scmp.eq.s32.totalorder %s1824_s16, 0 }
   0x9   : > { %p1668_p6 = scmp.lt.s32.totalorder %s1779_s15, 2  ;;  %s134_s22 = sand.u32 1, %s1775_s14  }
   0xa   : > { %p1841_p7 = por %p37_p5, %p36_p3  ;;  %s1566_s23 = sshll.u32 %s134_s22, 8 }
   0xb   : > { %s1602_s24 = sshll.u32 %s1779_s15, 12  ;;  %s138_s28 = scalar_lea.vmem [#allocation3], %s1566_s23 }
   0xc   : > { %s1850_s27 = scalar_lea.hbm %s2957_s0, %s1602_s24  ;;  %s145_s29 = sshll.u32 %s138_s28, 4  ;;  %s1852_s29 = int_to_ptr.vmem [resolvable:$true] %s145_s29 }
   0xd   : > { %p1854_p8 = pnand %p1668_p6, %p32_p4  ;;  %s1859_s4 = scalar_lea.sflag [#allocation4], %s134_s22 }
   0xe   : > { %s1715_s5 = scalar_lea.hbm %s1850_s27, 4096  ;;  %s1720_s8 = scalar_lea.hbm %s2957_s0, 8192 }
   0xf   : > { %p1716_p10 = scmp.ne.s32.totalorder %s1850_s27, %s1715_s5  ;;  %p1717_p11 = pneg %p1854_p8 }
  0x10   : > { %p1721_p0 = scmp.lt.u32.totalorder %s1850_s27, %s2957_s0  ;;  %p1722_p1 = scmp.lt.u32.totalorder %s1720_s8, %s1715_s5 }
  0x11   : > { %p1718_p12 = pnand %p1717_p11, %p1716_p10  ;;  %p1724_p3 = scmp.lt.u32.totalorder %s1715_s5, %s1850_s27 }
  0x12   : > { %p1723_p2 = por %p1722_p1, %p1721_p0 }
  0x13   : > { %p1719_p13 = pneg %p1718_p12 }
  0x14   : > { %p1725_p4 = por %p1724_p3, %p1723_p2 }
  0x16   : > { %p1726_p5 = pnand %p1725_p4, %p1719_p13 }
  0x18   : > { %1729 = shalt.err (!%p1726_p5)
}
  0x19   : > { %s1730_s11 = scalar_lea.vmem %s1852_s29, 4096  ;;  %s1781_s12 = smov [#allocation3]  }
  0x1a   : > { %p1731_p6 = scmp.ne.s32.totalorder %s1852_s29, %s1730_s11  ;;  %s1735_s18 = sshll.u32 %s1781_s12, 4  ;;  %s1736_s18 = int_to_ptr.vmem [resolvable:$false] %s1735_s18 }
  0x1b   : > { %s1737_s19 = scalar_lea.vmem %s1736_s18, 8192  ;;  %p1738_p9 = scmp.lt.s32.totalorder %s1852_s29, %s1736_s18 }
  0x1c   : > { %p1733_p10 = pnand %p1731_p6, %p1717_p11  ;;  %p1739_p0 = scmp.lt.s32.totalorder %s1737_s19, %s1730_s11 }
  0x1e   : > { %p1734_p12 = pneg %p1733_p10  ;;  %p1740_p1 = por %p1739_p0, %p1738_p9 }
  0x20   : > { %p1741_p2 = pnand %p1740_p1, %p1734_p12 }
  0x22   : > { %1744 = shalt.err (!%p1741_p2)
}
  0x23   : > { %s1782_s22 = smov 128   ;;  %s1783_s23 = smov 8  }
  0x24   : > { %1667 = dma.hbm_to_vmem [thread:$0]  (!%p1854_p8), %s1850_s27, 4096, %s1852_s29, %s1859_s4, %s1782_s22, %s1782_s22, %s1783_s23  }
  0x25   : > { %p153_p11 = scmp.lt.s32.totalorder %s1779_s15, 3  ;;  %p2963_p13 = scmp.ge.s32.totalorder %s1779_s15, 1 }
  0x27   : > { %p154_p3 = pnand %p2963_p13, %p153_p11 }
  0x29   : > { %157 = sbr.rel (%p154_p3) target bundleno = 425 (0x1a9), region = 32 }
  0x30   : > { %s159_s24 = sand.u32 1, %s1771_s13  }
  0x31   : > { %s1570_s25 = sshll.u32 %s159_s24, 8  ;;  %s160_s26 = scalar_lea.sflag [#allocation4], %s159_s24 }
  0x32   : > { %s1891_s28 = scalar_lea.vmem [#allocation3], %s1570_s25 }
  0x33   : > { %1762 = dma.done.wait (%p1841_p7), %s160_s26, 4096  }
  0x34   : > { %1764 = vsyncadd (%p1841_p7), %s160_s26, 4294963200  ;;  %v1704_v0 = vld [vmem:[%s2958_s1] sm:$0xff]   ;;  %v1705_v1 = vld [vmem:[%s2958_s1 + $0x8] sm:$0xff]   ;;  %vm256_vm0 = vcmask 261120   ;;  %v1784_v50 = vmov 0.0   ;;  %vm468_vm1 = vcmask 254976  }
  0x35   : > { %1622 = vmatprep.subr.bf16.mxu0 %v1704_v0  ;;  %1658 = vmatprep.subr.bf16.mxu1 %v1704_v0  ;;  %v192_v2 = vld [vmem:[%s1891_s28] sm:$0xff]  ;;  %v193_v3 = vld [vmem:[%s1891_s28 + $0x8] sm:$0xff]  ;;  %v194_v7 = vld [vmem:[%s1891_s28 + $0x10] sm:$0xff]  ;;  %473 = vst.msk [vmem:[#allocation2 + $0x30] sm:$0xff] %vm256_vm0, %v1784_v50  ;;  %p186_p7 = scmp.lt.s32.totalorder %s1824_s16, 1 }
  0x36   : > { %v208_v4 = vld [vmem:[%s1891_s28 + $0x80] sm:$0xff]  ;;  %1623 = vmatpush3.bf16.msra.mxu0 %v1704_v0  ;;  %1660 = vmatpush3.bf16.msra.mxu1 %v1704_v0  ;;  %v224_v5 = vpack.c.bf16 %v193_v3, %v192_v2  ;;  %v209_v6 = vld [vmem:[%s1891_s28 + $0x88] sm:$0xff]  ;;  %v195_v8 = vld [vmem:[%s1891_s28 + $0x18] sm:$0xff]  ;;  %474 = vst.msk [vmem:[#allocation2 + $0x38] sm:$0xff] %vm256_vm0, %v1784_v50 }
  0x37   : > { %1624 = vmatprep.subr.bf16.mxu0 %v1705_v1  ;;  %1659 = vmatprep.subr.bf16.mxu1 %v1705_v1  ;;  %v232_v9 = vpack.c.bf16 %v209_v6, %v208_v4  ;;  %v210_v10 = vld [vmem:[%s1891_s28 + $0x90] sm:$0xff]  ;;  %v211_v11 = vld [vmem:[%s1891_s28 + $0x98] sm:$0xff]  ;;  %v196_v12 = vld [vmem:[%s1891_s28 + $0x20] sm:$0xff]  ;;  %v225_v16 = vpack.c.bf16 %v195_v8, %v194_v7  ;;  %466 = vst.msk [vmem:[#allocation2] sm:$0xff] %vm256_vm0, %v1784_v50  ;;  %s3045_s16 = smov (!%p186_p7, %s1824_s16), 1 }
  0x38   : > { %1626 = vmatprep.mubr.msk.bf16.mxu0 %vm256_vm0, %v224_v5  ;;  %v197_v13 = vld [vmem:[%s1891_s28 + $0x28] sm:$0xff]  ;;  %v212_v14 = vld [vmem:[%s1891_s28 + $0xa0] sm:$0xff]  ;;  %v233_v17 = vpack.c.bf16 %v211_v11, %v210_v10  ;;  %v198_v20 = vld [vmem:[%s1891_s28 + $0x30] sm:$0xff]  ;;  %467 = vst.msk [vmem:[#allocation2 + $0x8] sm:$0xff] %vm256_vm0, %v1784_v50  ;;  %s1603_s5 = sshll.u32 %s3045_s16, 8 }
  0x39   : > { %v213_v15 = vld [vmem:[%s1891_s28 + $0xa8] sm:$0xff]  ;;  %1642 = vmatprep.mubr.msk.bf16.mxu1 %vm256_vm0, %v232_v9  ;;  %v226_v18 = vpack.c.bf16 %v197_v13, %v196_v12  ;;  %v199_v21 = vld [vmem:[%s1891_s28 + $0x38] sm:$0xff]  ;;  %v214_v22 = vld [vmem:[%s1891_s28 + $0xb0] sm:$0xff]  ;;  %470 = vst.msk [vmem:[#allocation2 + $0x18] sm:$0xff] %vm256_vm0, %v1784_v50  ;;  %s2263_s15 = scalar_lea.vmem %s2960_s3, %s1603_s5 }
  0x3a   : > { %1625 = vmatpush3.bf16.msra.mxu0 %v1705_v1  ;;  %1661 = vmatpush3.bf16.msra.mxu1 %v1705_v1  ;;  %v234_v19 = vpack.c.bf16 %v213_v15, %v212_v14  ;;  %v215_v23 = vld [vmem:[%s1891_s28 + $0xb8] sm:$0xff]  ;;  %v200_v24 = vld [vmem:[%s1891_s28 + $0x40] sm:$0xff]  ;;  %v201_v25 = vld [vmem:[%s1891_s28 + $0x48] sm:$0xff]  ;;  %v227_v28 = vpack.c.bf16 %v199_v21, %v198_v20  ;;  %471 = vst.msk [vmem:[#allocation2 + $0x20] sm:$0xff] %vm256_vm0, %v1784_v50 }
  0x3b   : > { %v216_v26 = vld [vmem:[%s1891_s28 + $0xc0] sm:$0xff]  ;;  %v217_v27 = vld [vmem:[%s1891_s28 + $0xc8] sm:$0xff]  ;;  %v235_v29 = vpack.c.bf16 %v215_v23, %v214_v22  ;;  %v228_v30 = vpack.c.bf16 %v201_v25, %v200_v24  ;;  %v202_v32 = vld [vmem:[%s1891_s28 + $0x50] sm:$0xff]  ;;  %476 = vst.msk [vmem:[#allocation2 + $0x48] sm:$0xff] %vm256_vm0, %v1784_v50 }
  0x3c   : > { %v236_v31 = vpack.c.bf16 %v217_v27, %v216_v26  ;;  %v203_v33 = vld [vmem:[%s1891_s28 + $0x58] sm:$0xff]  ;;  %v218_v34 = vld [vmem:[%s1891_s28 + $0xd0] sm:$0xff]  ;;  %v204_v36 = vld [vmem:[%s1891_s28 + $0x60] sm:$0xff]  ;;  %477 = vst.msk [vmem:[#allocation2 + $0x50] sm:$0xff] %vm256_vm0, %v1784_v50 }
  0x3d   : > { %1627 = vmatmul.mubr.msk.bf16.vlgmr.msra.gmra.mrb[0].mxu0 %vm256_vm0, %v225_v16  ;;  %1643 = vmatmul.mubr.msk.bf16.vlgmr.msra.gmra.mrb[0].mxu1 %vm256_vm0, %v233_v17  ;;  %v219_v35 = vld [vmem:[%s1891_s28 + $0xd8] sm:$0xff]  ;;  %v205_v37 = vld [vmem:[%s1891_s28 + $0x68] sm:$0xff]  ;;  %v220_v38 = vld [vmem:[%s1891_s28 + $0xe0] sm:$0xff]  ;;  %v229_v40 = vpack.c.bf16 %v203_v33, %v202_v32  ;;  %479 = vst.msk [vmem:[#allocation2 + $0x60] sm:$0xff] %vm256_vm0, %v1784_v50 }
  0x3e   : > { %1630 = vmatprep.mubr.msk.bf16.mxu0 %vm256_vm0, %v226_v18  ;;  %1646 = vmatprep.mubr.msk.bf16.mxu1 %vm256_vm0, %v234_v19  ;;  %v221_v39 = vld [vmem:[%s1891_s28 + $0xe8] sm:$0xff]  ;;  %v237_v41 = vpack.c.bf16 %v219_v35, %v218_v34  ;;  %v230_v42 = vpack.c.bf16 %v205_v37, %v204_v36  ;;  %v206_v44 = vld [vmem:[%s1891_s28 + $0x70] sm:$0xff]  ;;  %v207_v45 = vld [vmem:[%s1891_s28 + $0x78] sm:$0xff]  ;;  %480 = vst.msk [vmem:[#allocation2 + $0x68] sm:$0xff] %vm256_vm0, %v1784_v50 }
  0x3f   : > { %v238_v43 = vpack.c.bf16 %v221_v39, %v220_v38  ;;  %v222_v46 = vld [vmem:[%s1891_s28 + $0xf0] sm:$0xff]  ;;  %v223_v47 = vld [vmem:[%s1891_s28 + $0xf8] sm:$0xff]  ;;  %v231_v48 = vpack.c.bf16 %v207_v45, %v206_v44  ;;  %482 = vst.msk [vmem:[#allocation2 + $0x78] sm:$0xff] %vm256_vm0, %v1784_v50  ;;  %483 = vst.msk [vmem:[#allocation2 + $0x80] sm:$0xff] %vm256_vm0, %v1784_v50 }
  0x40   : > { %v239_v49 = vpack.c.bf16 %v223_v47, %v222_v46  ;;  %485 = vst.msk [vmem:[#allocation2 + $0x90] sm:$0xff] %vm256_vm0, %v1784_v50  ;;  %486 = vst.msk [vmem:[#allocation2 + $0x98] sm:$0xff] %vm256_vm0, %v1784_v50  ;;  %v2008_v51 = vld [vmem:[%s2959_s2] ss:$0 sm:$0xff]  ;;  %v2013_v52 = vld [vmem:[%s2959_s2 + $0x1] ss:$0 sm:$0xff] }
  0x41   : > { %488 = vst.msk [vmem:[#allocation2 + $0xa8] sm:$0xff] %vm256_vm0, %v1784_v50  ;;  %489 = vst.msk [vmem:[#allocation2 + $0xb0] sm:$0xff] %vm256_vm0, %v1784_v50  ;;  %v555_v53 = vld [vmem:[#allocation2] sm:$0xff]  ;;  %v556_v55 = vld [vmem:[#allocation2 + $0x8] sm:$0xff] }
  0x42   : > { %491 = vst.msk [vmem:[#allocation2 + $0xc0] sm:$0xff] %vm256_vm0, %v1784_v50  ;;  %492 = vst.msk [vmem:[#allocation2 + $0xc8] sm:$0xff] %vm256_vm0, %v1784_v50  ;;  %v656_v54 = vld [vmem:[#allocation2 + $0x1] sm:$0xff]  ;;  %v591_v59 = vmul.f32 %v2008_v51, %v555_v53  ;;  %v592_v61 = vmul.f32 %v2008_v51, %v556_v55 }
  0x43   : > { %494 = vst.msk [vmem:[#allocation2 + $0xd8] sm:$0xff] %vm256_vm0, %v1784_v50  ;;  %495 = vst.msk [vmem:[#allocation2 + $0xe0] sm:$0xff] %vm256_vm0, %v1784_v50  ;;  %v692_v60 = vmul.f32 %v2013_v52, %v656_v54  ;;  %v2024_v0 = vld [vmem:[%s2959_s2 + $0x2] ss:$0 sm:$0xff]  ;;  %v2037_v12 = vld [vmem:[%s2959_s2 + $0x3] ss:$0 sm:$0xff] }
  0x44   : > { %497 = vst.msk [vmem:[#allocation2 + $0xf0] sm:$0xff] %vm256_vm0, %v1784_v50  ;;  %498 = vst.msk [vmem:[#allocation2 + $0xf8] sm:$0xff] %vm256_vm0, %v1784_v50  ;;  %v757_v1 = vld [vmem:[#allocation2 + $0x2] sm:$0xff] }
  0x45   : > { %1631 = vmatmul.mubr.msk.bf16.gmra.mrb[4].mxu0 %vm256_vm0, %v227_v28  ;;  %1647 = vmatmul.mubr.msk.bf16.gmra.mrb[4].mxu1 %vm256_vm0, %v235_v29  ;;  %500 = vst.msk [vmem:[#allocation2 + $0x108] sm:$0xff] %vm256_vm0, %v1784_v50  ;;  %501 = vst.msk [vmem:[#allocation2 + $0x110] sm:$0xff] %vm256_vm0, %v1784_v50  ;;  %v724_v8 = vadd.f32 %v692_v60, %v591_v59  ;;  %v793_v9 = vmul.f32 %v2024_v0, %v757_v1  ;;  %v2042_v13 = vld [vmem:[%s2959_s2 + $0x4] ss:$0 sm:$0xff]  ;;  %v2047_v14 = vld [vmem:[%s2959_s2 + $0x6] ss:$0 sm:$0xff] }
  0x46   : > { %1634 = vmatprep.mubr.msk.bf16.mxu0 %vm256_vm0, %v228_v30  ;;  %1650 = vmatprep.mubr.msk.bf16.mxu1 %vm256_vm0, %v236_v31  ;;  %503 = vst.msk [vmem:[#allocation2 + $0x120] sm:$0xff] %vm256_vm0, %v1784_v50  ;;  %504 = vst.msk [vmem:[#allocation2 + $0x128] sm:$0xff] %vm256_vm0, %v1784_v50  ;;  %v2052_v15 = vld [vmem:[%s2959_s2 + $0x7] ss:$0 sm:$0xff]  ;;  %v2114_v1 = vld [vmem:[%s2959_s2 + $0x5] ss:$0 sm:$0xff] }
  0x47   : > { %506 = vst.msk [vmem:[#allocation2 + $0x138] sm:$0xff] %vm256_vm0, %v1784_v50  ;;  %507 = vst.msk [vmem:[#allocation2 + $0x140] sm:$0xff] %vm256_vm0, %v1784_v50  ;;  %v825_v19 = vadd.f32 %v793_v9, %v724_v8 }
  0x48   : > { %509 = vst.msk [vmem:[#allocation2 + $0x150] sm:$0xff] %vm256_vm0, %v1784_v50  ;;  %510 = vst.msk [vmem:[#allocation2 + $0x158] sm:$0xff] %vm256_vm0, %v1784_v50 }
  0x49   : > { %512 = vst.msk [vmem:[#allocation2 + $0x168] sm:$0xff] %vm256_vm0, %v1784_v50  ;;  %513 = vst.msk [vmem:[#allocation2 + $0x170] sm:$0xff] %vm256_vm0, %v1784_v50 }
  0x4a   : > { %515 = vst.msk [vmem:[#allocation2 + $0x180] sm:$0xff] %vm256_vm0, %v1784_v50  ;;  %516 = vst.msk [vmem:[#allocation2 + $0x188] sm:$0xff] %vm256_vm0, %v1784_v50 }
  0x4b   : > { %518 = vst.msk [vmem:[#allocation2 + $0x198] sm:$0xff] %vm256_vm0, %v1784_v50  ;;  %519 = vst.msk [vmem:[#allocation2 + $0x1a0] sm:$0xff] %vm256_vm0, %v1784_v50 }
  0x4c   : > { %475 = vst.msk [vmem:[#allocation2 + $0x40] sm:$0x3] %vm468_vm1, %v1784_v50  ;;  %469 = vst.msk [vmem:[#allocation2 + $0x10] sm:$0x3] %vm468_vm1, %v1784_v50 }
  0x4d   : > { %1635 = vmatmul.mubr.msk.bf16.gmra.mrb[8].mxu0 %vm256_vm0, %v229_v40  ;;  %1651 = vmatmul.mubr.msk.bf16.gmra.mrb[8].mxu1 %vm256_vm0, %v237_v41  ;;  %472 = vst.msk [vmem:[#allocation2 + $0x28] sm:$0x3] %vm468_vm1, %v1784_v50  ;;  %478 = vst.msk [vmem:[#allocation2 + $0x58] sm:$0x3] %vm468_vm1, %v1784_v50 }
  0x4e   : > { %1638 = vmatprep.mubr.msk.bf16.mxu0 %vm256_vm0, %v230_v42  ;;  %1654 = vmatprep.mubr.msk.bf16.mxu1 %vm256_vm0, %v238_v43  ;;  %481 = vst.msk [vmem:[#allocation2 + $0x70] sm:$0x3] %vm468_vm1, %v1784_v50  ;;  %484 = vst.msk [vmem:[#allocation2 + $0x88] sm:$0x3] %vm468_vm1, %v1784_v50 }
  0x4f   : > { %487 = vst.msk [vmem:[#allocation2 + $0xa0] sm:$0x3] %vm468_vm1, %v1784_v50  ;;  %490 = vst.msk [vmem:[#allocation2 + $0xb8] sm:$0x3] %vm468_vm1, %v1784_v50 }
  0x50   : > { %493 = vst.msk [vmem:[#allocation2 + $0xd0] sm:$0x3] %vm468_vm1, %v1784_v50  ;;  %496 = vst.msk [vmem:[#allocation2 + $0xe8] sm:$0x3] %vm468_vm1, %v1784_v50 }
  0x51   : > { %499 = vst.msk [vmem:[#allocation2 + $0x100] sm:$0x3] %vm468_vm1, %v1784_v50  ;;  %502 = vst.msk [vmem:[#allocation2 + $0x118] sm:$0x3] %vm468_vm1, %v1784_v50 }
  0x52   : > { %505 = vst.msk [vmem:[#allocation2 + $0x130] sm:$0x3] %vm468_vm1, %v1784_v50  ;;  %508 = vst.msk [vmem:[#allocation2 + $0x148] sm:$0x3] %vm468_vm1, %v1784_v50 }
  0x53   : > { %511 = vst.msk [vmem:[#allocation2 + $0x160] sm:$0x3] %vm468_vm1, %v1784_v50  ;;  %514 = vst.msk [vmem:[#allocation2 + $0x178] sm:$0x3] %vm468_vm1, %v1784_v50  ;;  %v657_v56 = vld [vmem:[#allocation2 + $0x9] sm:$0xff] }
  0x54   : > { %517 = vst.msk [vmem:[#allocation2 + $0x190] sm:$0x3] %vm468_vm1, %v1784_v50  ;;  %520 = vst.msk [vmem:[#allocation2 + $0x1a8] sm:$0x3] %vm468_vm1, %v1784_v50  ;;  %v693_v62 = vmul.f32 %v2013_v52, %v657_v56  ;;  %v758_v3 = vld [vmem:[#allocation2 + $0xa] sm:$0xff] }
  0x55   : > { %1639 = vmatmul.mubr.msk.bf16.gmra.mrb[12].mxu0 %vm256_vm0, %v231_v48  ;;  %1655 = vmatmul.mubr.msk.bf16.gmra.mrb[12].mxu1 %vm256_vm0, %v239_v49  ;;  %v794_v11 = vmul.f32 %v2024_v0, %v758_v3 }
  0x56   : > { %v725_v10 = vadd.f32 %v693_v62, %v592_v61 }
  0x58   : > { %v2054_v20 = vadd.f32 %v794_v11, %v725_v10  ;;  %v2131_v10 = vld [vmem:[%s2959_s2 + $0x8] ss:$0 sm:$0xff] }
 0x110   : > { %v1628_v57 = vpop.f32.mrb[0].mxu0  ;;  %v1644_v58 = vpop.f32.mrb[0].mxu1 }
 0x111   : > { %524 = vst.msk [vmem:[#allocation2 + $0x31] sm:$0xff] %vm256_vm0, %v1628_v57  ;;  %540 = vst.msk [vmem:[#allocation2 + $0xf1] sm:$0xff] %vm256_vm0, %v1644_v58  ;;  %v339_v63 = vpop.f32.mrb[1].mxu0  ;;  %v403_v2 = vpop.f32.mrb[1].mxu1 }
 0x112   : > { %522 = vst.msk [vmem:[#allocation2 + $0x19] sm:$0xff] %vm256_vm0, %v339_v63  ;;  %538 = vst.msk [vmem:[#allocation2 + $0xd9] sm:$0xff] %vm256_vm0, %v403_v2  ;;  %v1629_v4 = vpop.f32.mrb[2].mxu0  ;;  %v1645_v5 = vpop.f32.mrb[2].mxu1 }
 0x113   : > { %525 = vst.msk [vmem:[#allocation2 + $0x39] sm:$0xff] %vm256_vm0, %v1629_v4  ;;  %541 = vst.msk [vmem:[#allocation2 + $0xf9] sm:$0xff] %vm256_vm0, %v1645_v5  ;;  %v342_v6 = vpop.f32.mrb[3].mxu0  ;;  %v406_v7 = vpop.f32.mrb[3].mxu1 }
 0x114   : > { %523 = vst.msk [vmem:[#allocation2 + $0x21] sm:$0xff] %vm256_vm0, %v342_v6  ;;  %539 = vst.msk [vmem:[#allocation2 + $0xe1] sm:$0xff] %vm256_vm0, %v406_v7 }
 0x118   : > { %v559_v16 = vld [vmem:[#allocation2 + $0x30] sm:$0xff]  ;;  %v1632_v21 = vpop.f32.mrb[4].mxu0  ;;  %v1648_v22 = vpop.f32.mrb[4].mxu1 }
 0x119   : > { %v660_v17 = vld [vmem:[#allocation2 + $0x31] sm:$0xff]  ;;  %v595_v23 = vmul.f32 %v2008_v51, %v559_v16  ;;  %v2059_v25 = vmul.f32 %v2037_v12, %v559_v16  ;;  %v658_v29 = vld [vmem:[#allocation2 + $0x19] sm:$0xff]  ;;  %528 = vst.msk [vmem:[#allocation2 + $0x61] sm:$0xff] %vm256_vm0, %v1632_v21  ;;  %544 = vst.msk [vmem:[#allocation2 + $0x121] sm:$0xff] %vm256_vm0, %v1648_v22  ;;  %v355_v30 = vpop.f32.mrb[5].mxu0  ;;  %v419_v31 = vpop.f32.mrb[5].mxu1  ;;  %v2067_v32 = vmul.f32 %v2047_v14, %v559_v16 }
 0x11a   : > { %v575_v18 = vld [vmem:[#allocation2 + $0xf0] sm:$0xff]  ;;  %v696_v24 = vmul.f32 %v2013_v52, %v660_v17  ;;  %v2062_v26 = vmul.f32 %v2042_v13, %v660_v17  ;;  %v557_v28 = vld [vmem:[#allocation2 + $0x18] sm:$0xff]  ;;  %v2070_v33 = vmul.f32 %v2052_v15, %v660_v17  ;;  %526 = vst.msk [vmem:[#allocation2 + $0x49] sm:$0xff] %vm256_vm0, %v355_v30  ;;  %542 = vst.msk [vmem:[#allocation2 + $0x109] sm:$0xff] %vm256_vm0, %v419_v31  ;;  %v1633_v38 = vpop.f32.mrb[6].mxu0  ;;  %v1649_v39 = vpop.f32.mrb[6].mxu1 }
 0x11b   : > { %v676_v27 = vld [vmem:[#allocation2 + $0xf1] sm:$0xff]  ;;  %v611_v34 = vmul.f32 %v2008_v51, %v575_v18  ;;  %v674_v37 = vld [vmem:[#allocation2 + $0xd9] sm:$0xff]  ;;  %v2077_v41 = vmul.f32 %v2037_v12, %v575_v18  ;;  %v2083_v43 = vmul.f32 %v2047_v14, %v575_v18  ;;  %529 = vst.msk [vmem:[#allocation2 + $0x69] sm:$0xff] %vm256_vm0, %v1633_v38  ;;  %545 = vst.msk [vmem:[#allocation2 + $0x129] sm:$0xff] %vm256_vm0, %v1649_v39  ;;  %v358_v44 = vpop.f32.mrb[7].mxu0  ;;  %v422_v45 = vpop.f32.mrb[7].mxu1 }
 0x11c   : > { %v712_v35 = vmul.f32 %v2013_v52, %v676_v27  ;;  %v573_v36 = vld [vmem:[#allocation2 + $0xd8] sm:$0xff]  ;;  %v728_v40 = vadd.f32 %v696_v24, %v595_v23  ;;  %v2080_v42 = vmul.f32 %v2042_v13, %v676_v27  ;;  %v2090_v47 = vmul.f32 %v2052_v15, %v676_v27  ;;  %527 = vst.msk [vmem:[#allocation2 + $0x51] sm:$0xff] %vm256_vm0, %v358_v44 }
 0x11d   : > { %2964 = vst [vmem:[#allocation6_spill] sm:$0xff] %v2083_v43  ;;  %v593_v48 = vmul.f32 %v2008_v51, %v557_v28  ;;  %v694_v49 = vmul.f32 %v2013_v52, %v658_v29  ;;  %v560_v50 = vld [vmem:[#allocation2 + $0x38] sm:$0xff]  ;;  %543 = vst.msk [vmem:[#allocation2 + $0x111] sm:$0xff] %vm256_vm0, %v422_v45  ;;  %v894_v53 = vmul.f32 %v2037_v12, %v557_v28 }
 0x11e   : > { %v2087_v46 = vadd.f32 %v712_v35, %v611_v34  ;;  %2965 = vst [vmem:[#allocation7_spill] sm:$0xff] %v2090_v47  ;;  %v995_v54 = vmul.f32 %v2042_v13, %v658_v29  ;;  %v609_v55 = vmul.f32 %v2008_v51, %v573_v36  ;;  %v710_v56 = vmul.f32 %v2013_v52, %v674_v37  ;;  %v661_v57 = vld [vmem:[#allocation2 + $0x39] sm:$0xff] }
 0x11f   : > { %v761_v58 = vld [vmem:[#allocation2 + $0x32] sm:$0xff]  ;;  %v762_v59 = vld [vmem:[#allocation2 + $0x3a] sm:$0xff]  ;;  %v2100_v60 = vadd.f32 %v694_v49, %v593_v48  ;;  %v2103_v61 = vmul.f32 %v2037_v12, %v573_v36  ;;  %v2106_v62 = vmul.f32 %v2042_v13, %v674_v37  ;;  %v2109_v63 = vmul.f32 %v2047_v14, %v573_v36 }
 0x120   : > { %v926_v2 = vadd.f32 %v894_v53, %v825_v19  ;;  %v2116_v3 = vadd.f32 %v710_v56, %v609_v55  ;;  %v2119_v4 = vmul.f32 %v2052_v15, %v674_v37  ;;  %v596_v5 = vmul.f32 %v2008_v51, %v560_v50  ;;  %v576_v11 = vld [vmem:[#allocation2 + $0xf8] sm:$0xff]  ;;  %v1636_v17 = vpop.f32.mrb[8].mxu0  ;;  %v1652_v18 = vpop.f32.mrb[8].mxu1  ;;  %v558_v55 = vld [vmem:[#allocation2 + $0x20] sm:$0xff] }
 0x121   : > { %2966 = vst [vmem:[#allocation8_spill] sm:$0xff] %v2103_v61  ;;  %2967 = vst [vmem:[#allocation9_spill] sm:$0xff] %v2106_v62  ;;  %v697_v6 = vmul.f32 %v2013_v52, %v661_v57  ;;  %v797_v7 = vmul.f32 %v2024_v0, %v761_v58  ;;  %v798_v8 = vmul.f32 %v2024_v0, %v762_v59  ;;  %v677_v16 = vld [vmem:[#allocation2 + $0xf9] sm:$0xff]  ;;  %v371_v28 = vpop.f32.mrb[9].mxu0  ;;  %v435_v29 = vpop.f32.mrb[9].mxu1  ;;  %v659_v56 = vld [vmem:[#allocation2 + $0x21] sm:$0xff] }
 0x122   : > { %2968 = vst [vmem:[#allocation10_spill] sm:$0xff] %v2109_v63  ;;  %2969 = vst [vmem:[#allocation11_spill] sm:$0xff] %v2119_v4  ;;  %v2126_v9 = vmul.f32 %v2037_v12, %v560_v50  ;;  %v2133_v19 = vadd.f32 %v995_v54, %v926_v2  ;;  %v2136_v21 = vmul.f32 %v2042_v13, %v661_v57  ;;  %v777_v24 = vld [vmem:[#allocation2 + $0xf2] sm:$0xff]  ;;  %v778_v27 = vld [vmem:[#allocation2 + $0xfa] sm:$0xff]  ;;  %v1637_v36 = vpop.f32.mrb[10].mxu0  ;;  %v1653_v37 = vpop.f32.mrb[10].mxu1 }
 0x123   : > { %v2139_v22 = vmul.f32 %v2114_v1, %v761_v58  ;;  %v2142_v23 = vmul.f32 %v2114_v1, %v762_v59  ;;  %532 = vst.msk [vmem:[#allocation2 + $0x91] sm:$0xff] %vm256_vm0, %v1636_v17  ;;  %548 = vst.msk [vmem:[#allocation2 + $0x151] sm:$0xff] %vm256_vm0, %v1652_v18  ;;  %v729_v30 = vadd.f32 %v697_v6, %v596_v5  ;;  %v374_v45 = vpop.f32.mrb[11].mxu0  ;;  %v438_v48 = vpop.f32.mrb[11].mxu1  ;;  %v759_v5 = vld [vmem:[#allocation2 + $0x1a] sm:$0xff]  ;;  %v760_v6 = vld [vmem:[#allocation2 + $0x22] sm:$0xff] }
 0x124   : > { %v2146_v31 = vadd.f32 %v797_v7, %v728_v40  ;;  %v2149_v34 = vmul.f32 %v2047_v14, %v560_v50  ;;  %v2152_v35 = vmul.f32 %v2052_v15, %v661_v57  ;;  %530 = vst.msk [vmem:[#allocation2 + $0x79] sm:$0xff] %vm256_vm0, %v371_v28  ;;  %546 = vst.msk [vmem:[#allocation2 + $0x139] sm:$0xff] %vm256_vm0, %v435_v29  ;;  %v574_v28 = vld [vmem:[#allocation2 + $0xe0] sm:$0xff] }
 0x125   : > { %v2157_v38 = vmul.f32 %v2131_v10, %v761_v58  ;;  %v2160_v39 = vmul.f32 %v2131_v10, %v762_v59  ;;  %v612_v40 = vmul.f32 %v2008_v51, %v576_v11  ;;  %v713_v44 = vmul.f32 %v2013_v52, %v677_v16  ;;  %533 = vst.msk [vmem:[#allocation2 + $0x99] sm:$0xff] %vm256_vm0, %v1637_v36 }
 0x126   : > { %549 = vst.msk [vmem:[#allocation2 + $0x159] sm:$0xff] %vm256_vm0, %v1653_v37  ;;  %v2166_v49 = vadd.f32 %v798_v8, %v729_v30  ;;  %v813_v50 = vmul.f32 %v2024_v0, %v777_v24  ;;  %v814_v53 = vmul.f32 %v2024_v0, %v778_v27  ;;  %v2171_v54 = vmul.f32 %v2037_v12, %v576_v11  ;;  %v775_v37 = vld [vmem:[#allocation2 + $0xda] sm:$0xff] }
 0x127   : > { %531 = vst.msk [vmem:[#allocation2 + $0x81] sm:$0xff] %vm256_vm0, %v374_v45  ;;  %547 = vst.msk [vmem:[#allocation2 + $0x141] sm:$0xff] %vm256_vm0, %v438_v48  ;;  %v745_v57 = vadd.f32 %v713_v44, %v612_v40  ;;  %v2176_v58 = vmul.f32 %v2042_v13, %v677_v16  ;;  %v2179_v59 = vmul.f32 %v2114_v1, %v777_v24  ;;  %v776_v45 = vld [vmem:[#allocation2 + $0xe2] sm:$0xff] }
 0x128   : > { %v2182_v2 = vmul.f32 %v2114_v1, %v778_v27  ;;  %v2186_v7 = vadd.f32 %v813_v50, %v2087_v46  ;;  %v2189_v8 = vmul.f32 %v2047_v14, %v576_v11  ;;  %v2192_v17 = vmul.f32 %v2052_v15, %v677_v16  ;;  %v675_v11 = vld [vmem:[#allocation2 + $0xe1] sm:$0xff]  ;;  %v1640_v48 = vpop.f32.mrb[12].mxu0  ;;  %v1656_v50 = vpop.f32.mrb[12].mxu1 }
 0x129   : > { %v2195_v18 = vmul.f32 %v2131_v10, %v777_v24  ;;  %v2197_v29 = vadd.f32 %v814_v53, %v745_v57  ;;  %v2200_v30 = vmul.f32 %v2131_v10, %v778_v27  ;;  %v594_v46 = vmul.f32 %v2008_v51, %v558_v55  ;;  %536 = vst.msk [vmem:[#allocation2 + $0xc1] sm:$0xff] %vm256_vm0, %v1640_v48  ;;  %v451_v63 = vpop.f32.mrb[13].mxu1 }
 0x12a   : > { %2970 = vst [vmem:[#allocation12_spill] sm:$0xff] %v2189_v8  ;;  %2971 = vst [vmem:[#allocation13_spill] sm:$0xff] %v2192_v17  ;;  %v695_v36 = vmul.f32 %v2013_v52, %v659_v56  ;;  %v795_v16 = vmul.f32 %v2024_v0, %v759_v5  ;;  %v796_v40 = vmul.f32 %v2024_v0, %v760_v6 }
 0x12b   : > { %2972 = vst [vmem:[#allocation14_spill] sm:$0xff] %v2195_v18  ;;  %2973 = vst [vmem:[#allocation15_spill] sm:$0xff] %v2200_v30  ;;  %v895_v44 = vmul.f32 %v2037_v12, %v558_v55  ;;  %v996_v24 = vmul.f32 %v2042_v13, %v659_v56  ;;  %v1096_v53 = vmul.f32 %v2114_v1, %v759_v5  ;;  %v387_v55 = vpop.f32.mrb[13].mxu0 }
 0x12c   : > { %v727_v27 = vadd.f32 %v695_v36, %v594_v46  ;;  %v1097_v57 = vmul.f32 %v2114_v1, %v760_v6  ;;  %v610_v4 = vmul.f32 %v2008_v51, %v574_v28  ;;  %552 = vst.msk [vmem:[#allocation2 + $0x181] sm:$0xff] %vm256_vm0, %v1656_v50  ;;  %v827_v56 = vadd.f32 %v795_v16, %v2100_v60  ;;  %v1641_v5 = vpop.f32.mrb[14].mxu0  ;;  %v1657_v6 = vpop.f32.mrb[14].mxu1 }
 0x12d   : > { %v927_v30 = vadd.f32 %v895_v44, %v2054_v20  ;;  %v711_v18 = vmul.f32 %v2013_v52, %v675_v11  ;;  %v811_v46 = vmul.f32 %v2024_v0, %v775_v37  ;;  %534 = vst.msk [vmem:[#allocation2 + $0xa9] sm:$0xff] %vm256_vm0, %v387_v55  ;;  %550 = vst.msk [vmem:[#allocation2 + $0x169] sm:$0xff] %vm256_vm0, %v451_v63  ;;  %v390_v20 = vpop.f32.mrb[15].mxu0  ;;  %v454_v16 = vpop.f32.mrb[15].mxu1 }
 0x12e   : > { %v828_v36 = vadd.f32 %v796_v40, %v727_v27  ;;  %v1128_v48 = vadd.f32 %v1096_v53, %v2133_v19  ;;  %v812_v50 = vmul.f32 %v2024_v0, %v776_v45  ;;  %v2227_v60 = vmul.f32 %v2037_v12, %v574_v28  ;;  %537 = vst.msk [vmem:[#allocation2 + $0xc9] sm:$0xff] %vm256_vm0, %v1641_v5  ;;  %v579_v5 = vld [vmem:[#allocation2 + $0x120] sm:$0xff] }
 0x12f   : > { %553 = vst.msk [vmem:[#allocation2 + $0x189] sm:$0xff] %vm256_vm0, %v1657_v6  ;;  %v928_v44 = vadd.f32 %v2059_v25, %v827_v56  ;;  %v1028_v63 = vadd.f32 %v996_v24, %v927_v30  ;;  %v743_v55 = vadd.f32 %v711_v18, %v610_v4  ;;  %v843_v17 = vadd.f32 %v811_v46, %v2116_v3  ;;  %v563_v25 = vld [vmem:[#allocation2 + $0x60] sm:$0xff] }
 0x130   : > { %2974 = vst [vmem:[#allocation16_spill] sm:$0xff] %v2227_v60  ;;  %535 = vst.msk [vmem:[#allocation2 + $0xb1] sm:$0xff] %vm256_vm0, %v390_v20  ;;  %v2237_v19 = vadd.f32 %v2126_v9, %v828_v36  ;;  %v1230_v40 = vadd.f32 %v2067_v32, %v1128_v48  ;;  %v2241_v27 = vmul.f32 %v2042_v13, %v675_v11  ;;  %v664_v24 = vld [vmem:[#allocation2 + $0x61] sm:$0xff] }
 0x131   : > { %551 = vst.msk [vmem:[#allocation2 + $0x171] sm:$0xff] %vm256_vm0, %v454_v16  ;;  %v2244_v53 = vmul.f32 %v2114_v1, %v775_v37  ;;  %v1129_v4 = vadd.f32 %v1097_v57, %v1028_v63  ;;  %v844_v18 = vadd.f32 %v812_v50, %v743_v55  ;;  %v944_v3 = vadd.f32 %v2077_v41, %v843_v17  ;;  %v577_v55 = vld [vmem:[#allocation2 + $0x108] sm:$0xff] }
 0x132   : > { %2975 = vst [vmem:[#allocation17_spill] sm:$0xff] %v2241_v27  ;;  %v2248_v30 = vmul.f32 %v2114_v1, %v776_v45  ;;  %v1331_v9 = vadd.f32 %v2070_v33, %v1230_v40  ;;  %v2252_v56 = vmul.f32 %v2047_v14, %v574_v28  ;;  %v2255_v32 = vmul.f32 %v2052_v15, %v675_v11  ;;  %v680_v11 = vld [vmem:[#allocation2 + $0x121] sm:$0xff] }
 0x133   : > { %2976 = vst [vmem:[#allocation18_spill] sm:$0xff] %v2244_v53  ;;  %v2258_v46 = vmul.f32 %v2131_v10, %v775_v37  ;;  %v1231_v41 = vadd.f32 %v2149_v34, %v1129_v4  ;;  %v2267_v33 = vadd.f32 %v2171_v54, %v844_v18  ;;  %v2270_v17 = vmul.f32 %v2131_v10, %v776_v45  ;;  %v561_v34 = vld [vmem:[#allocation2 + $0x48] sm:$0xff] }
 0x134   : > { %2977 = vst [vmem:[#allocation19_spill] sm:$0xff] %v2248_v30  ;;  %2978 = vst [vmem:[#allocation20_spill] sm:$0xff] %v2252_v56  ;;  %v599_v28 = vmul.f32 %v2008_v51, %v563_v25  ;;  %v1432_v37 = vadd.f32 %v2157_v38, %v1331_v9  ;;  %v700_v57 = vmul.f32 %v2013_v52, %v664_v24  ;;  %v662_v38 = vld [vmem:[#allocation2 + $0x49] sm:$0xff] }
 0x135   : > { %2979 = vst [vmem:[#allocation21_spill] sm:$0xff] %v2255_v32  ;;  %2980 = vst [vmem:[#allocation22_spill] sm:$0xff] %v2258_v46  ;;  %v2276_v6 = vmul.f32 %v2037_v12, %v563_v25  ;;  %v2279_v36 = vmul.f32 %v2042_v13, %v664_v24  ;;  %v1332_v54 = vadd.f32 %v2152_v35, %v1231_v41  ;;  %v564_v46 = vld [vmem:[#allocation2 + $0x68] sm:$0xff] }
 0x136   : > { %2981 = vst [vmem:[#allocation23_spill] sm:$0xff] %v2270_v17  ;;  %v2283_v48 = vmul.f32 %v2047_v14, %v563_v25  ;;  %v2286_v45 = vmul.f32 %v2052_v15, %v664_v24  ;;  %v615_v50 = vmul.f32 %v2008_v51, %v579_v5  ;;  %1464 = vst.msk [vmem:[%s2263_s15] sm:$0xff] %vm256_vm0, %v1432_v37  ;;  %v678_v24 = vld [vmem:[#allocation2 + $0x109] sm:$0xff] }
 0x137   : > { %v732_v20 = vadd.f32 %v700_v57, %v599_v28  ;;  %v716_v16 = vmul.f32 %v2013_v52, %v680_v11  ;;  %v2293_v63 = vmul.f32 %v2037_v12, %v579_v5  ;;  %v2296_v35 = vmul.f32 %v2042_v13, %v680_v11  ;;  %v665_v32 = vld [vmem:[#allocation2 + $0x69] sm:$0xff] }
 0x138   : > { %v1433_v40 = vadd.f32 %v2160_v39, %v1332_v54  ;;  %v2300_v25 = vmul.f32 %v2047_v14, %v579_v5  ;;  %v2303_v4 = vmul.f32 %v2052_v15, %v680_v11  ;;  %v597_v18 = vmul.f32 %v2008_v51, %v561_v34  ;;  %v766_v56 = vld [vmem:[#allocation2 + $0x6a] sm:$0xff] }
 0x139   : > { %2982 = vst [vmem:[#allocation24_spill] sm:$0xff] %v2296_v35  ;;  %v748_v9 = vadd.f32 %v716_v16, %v615_v50  ;;  %v698_v41 = vmul.f32 %v2013_v52, %v662_v38  ;;  %v898_v28 = vmul.f32 %v2037_v12, %v561_v34  ;;  %v999_v37 = vmul.f32 %v2042_v13, %v662_v38  ;;  %v679_v35 = vld [vmem:[#allocation2 + $0x111] sm:$0xff] }
 0x13a   : > { %1465 = vst.msk [vmem:[%s2263_s15 + $0x8] sm:$0xff] %vm256_vm0, %v1433_v40  ;;  %v1029_v39 = vadd.f32 %v2062_v26, %v928_v44  ;;  %v1200_v5 = vmul.f32 %v2047_v14, %v561_v34  ;;  %v1301_v57 = vmul.f32 %v2052_v15, %v662_v38  ;;  %v613_v11 = vmul.f32 %v2008_v51, %v577_v55  ;;  %v765_v38 = vld [vmem:[#allocation2 + $0x62] sm:$0xff] }
 0x13b   : > { %v2315_v54 = vadd.f32 %v698_v41, %v597_v18  ;;  %v930_v50 = vadd.f32 %v898_v28, %v2146_v31  ;;  %v714_v16 = vmul.f32 %v2013_v52, %v678_v24  ;;  %v914_v17 = vmul.f32 %v2037_v12, %v577_v55 }
 0x13c   : > { %v1130_v40 = vadd.f32 %v2139_v22, %v1029_v39  ;;  %v1015_v26 = vmul.f32 %v2042_v13, %v678_v24  ;;  %v1045_v44 = vadd.f32 %v2080_v42, %v944_v3  ;;  %v1216_v34 = vmul.f32 %v2047_v14, %v577_v55 }
 0x13d   : > { %v2324_v18 = vadd.f32 %v999_v37, %v930_v50  ;;  %v2326_v41 = vadd.f32 %v714_v16, %v613_v11  ;;  %v946_v31 = vadd.f32 %v914_v17, %v2186_v7  ;;  %v1317_v28 = vmul.f32 %v2052_v15, %v678_v24  ;;  %v781_v50 = vld [vmem:[#allocation2 + $0x122] sm:$0xff] }
 0x13e   : > { %v1232_v47 = vadd.f32 %v1200_v5, %v1130_v40  ;;  %v1146_v8 = vadd.f32 %v2179_v59, %v1045_v44  ;;  %v600_v22 = vmul.f32 %v2008_v51, %v564_v46  ;;  %v701_v39 = vmul.f32 %v2013_v52, %v665_v32  ;;  %v580_v59 = vld [vmem:[#allocation2 + $0x128] sm:$0xff] }
 0x13f   : > { %v2333_v42 = vadd.f32 %v1015_v26, %v946_v31  ;;  %v801_v3 = vmul.f32 %v2024_v0, %v765_v38  ;;  %v802_v55 = vmul.f32 %v2024_v0, %v766_v56  ;;  %v2338_v37 = vmul.f32 %v2037_v12, %v564_v46  ;;  %v681_v5 = vld [vmem:[#allocation2 + $0x129] sm:$0xff] }
 0x140   : > { %v2340_v11 = vadd.f32 %v1301_v57, %v1232_v47  ;;  %v1248_v7 = vadd.f32 %v1216_v34, %v1146_v8  ;;  %v733_v17 = vadd.f32 %v701_v39, %v600_v22  ;;  %v2343_v24 = vmul.f32 %v2042_v13, %v665_v32  ;;  %v782_v47 = vld [vmem:[#allocation2 + $0x12a] sm:$0xff] }
 0x141   : > { %v2345_v16 = vadd.f32 %v801_v3, %v732_v20  ;;  %v2348_v40 = vmul.f32 %v2114_v1, %v765_v38  ;;  %v2351_v26 = vmul.f32 %v2114_v1, %v766_v56  ;;  %v2354_v44 = vmul.f32 %v2047_v14, %v564_v46  ;;  %v562_v3 = vld [vmem:[#allocation2 + $0x50] sm:$0xff] }
 0x142   : > { %2983 = vst [vmem:[#allocation25_spill] sm:$0xff] %v2343_v24  ;;  %v2356_v8 = vadd.f32 %v1317_v28, %v1248_v7  ;;  %v2358_v57 = vadd.f32 %v802_v55, %v733_v17  ;;  %v2361_v34 = vmul.f32 %v2052_v15, %v665_v32  ;;  %v2364_v20 = vmul.f32 %v2131_v10, %v765_v38  ;;  %v763_v7 = vld [vmem:[#allocation2 + $0x4a] sm:$0xff]  ;;  %v764_v17 = vld [vmem:[#allocation2 + $0x52] sm:$0xff] }
 0x143   : > { %2984 = vst [vmem:[#allocation26_spill] sm:$0xff] %v2351_v26  ;;  %v2367_v31 = vmul.f32 %v2131_v10, %v766_v56  ;;  %v616_v22 = vmul.f32 %v2008_v51, %v580_v59  ;;  %v717_v39 = vmul.f32 %v2013_v52, %v681_v5  ;;  %v817_v46 = vmul.f32 %v2024_v0, %v781_v50  ;;  %v663_v56 = vld [vmem:[#allocation2 + $0x51] sm:$0xff] }
 0x144   : > { %2985 = vst [vmem:[#allocation27_spill] sm:$0xff] %v2358_v57  ;;  %v818_v28 = vmul.f32 %v2024_v0, %v782_v47  ;;  %v2374_v55 = vmul.f32 %v2037_v12, %v580_v59  ;;  %v2377_v32 = vmul.f32 %v2042_v13, %v681_v5  ;;  %v2380_v38 = vmul.f32 %v2114_v1, %v781_v50 }
 0x145   : > { %v749_v43 = vadd.f32 %v717_v39, %v616_v22  ;;  %v2382_v30 = vadd.f32 %v817_v46, %v748_v9  ;;  %v2385_v53 = vmul.f32 %v2114_v1, %v782_v47  ;;  %v2388_v27 = vmul.f32 %v2047_v14, %v580_v59 }
 0x146   : > { %2986 = vst [vmem:[#allocation28_spill] sm:$0xff] %v2377_v32  ;;  %2987 = vst [vmem:[#allocation29_spill] sm:$0xff] %v2380_v38  ;;  %v2391_v62 = vmul.f32 %v2052_v15, %v681_v5  ;;  %v2394_v60 = vmul.f32 %v2131_v10, %v781_v50  ;;  %v2397_v61 = vmul.f32 %v2131_v10, %v782_v47 }
 0x147   : > { %2988 = vst [vmem:[#allocation30_spill] sm:$0xff] %v2382_v30  ;;  %2989 = vst [vmem:[#allocation31_spill] sm:$0xff] %v2385_v53  ;;  %v598_v32 = vmul.f32 %v2008_v51, %v562_v3  ;;  %v2400_v22 = vadd.f32 %v818_v28, %v749_v43  ;;  %v699_v9 = vmul.f32 %v2013_v52, %v663_v56 }
 0x148   : > { %v799_v39 = vmul.f32 %v2024_v0, %v763_v7  ;;  %v800_v59 = vmul.f32 %v2024_v0, %v764_v17  ;;  %v899_v46 = vmul.f32 %v2037_v12, %v562_v3  ;;  %v1000_v5 = vmul.f32 %v2042_v13, %v663_v56 }
 0x149   : > { %2990 = vst [vmem:[#allocation32_spill] sm:$0xff] %v2400_v22  ;;  %v1030_v50 = vadd.f32 %v2136_v21, %v2237_v19  ;;  %v1100_v47 = vmul.f32 %v2114_v1, %v763_v7  ;;  %v731_v53 = vadd.f32 %v699_v9, %v598_v32  ;;  %v1101_v43 = vmul.f32 %v2114_v1, %v764_v17  ;;  %v578_v22 = vld [vmem:[#allocation2 + $0x110] sm:$0xff] }
 0x14a   : > { %v831_v26 = vadd.f32 %v799_v39, %v2315_v54  ;;  %v1201_v28 = vmul.f32 %v2047_v14, %v562_v3  ;;  %v931_v57 = vadd.f32 %v899_v46, %v2166_v49  ;;  %v1302_v30 = vmul.f32 %v2052_v15, %v663_v56  ;;  %v779_v21 = vld [vmem:[#allocation2 + $0x10a] sm:$0xff]  ;;  %v780_v9 = vld [vmem:[#allocation2 + $0x112] sm:$0xff] }
 0x14b   : > { %v1131_v24 = vadd.f32 %v2142_v23, %v1030_v50  ;;  %v1132_v38 = vadd.f32 %v1100_v47, %v2324_v18  ;;  %v832_v19 = vadd.f32 %v800_v59, %v731_v53  ;;  %v1402_v54 = vmul.f32 %v2131_v10, %v763_v7 }
 0x14c   : > { %v2418_v32 = vadd.f32 %v2276_v6, %v831_v26  ;;  %v1403_v3 = vmul.f32 %v2131_v10, %v764_v17  ;;  %v1032_v39 = vadd.f32 %v1000_v5, %v931_v57  ;;  %v614_v18 = vmul.f32 %v2008_v51, %v578_v22 }
 0x14d   : > { %v1233_v49 = vadd.f32 %v1201_v28, %v1131_v24  ;;  %v1234_v23 = vadd.f32 %v2283_v48, %v1132_v38  ;;  %v2425_v56 = vadd.f32 %v2338_v37, %v832_v19  ;;  %v1434_v53 = vadd.f32 %v1402_v54, %v2340_v11 }
 0x14e   : > { %v715_v6 = vmul.f32 %v2013_v52, %v679_v35  ;;  %v815_v26 = vmul.f32 %v2024_v0, %v779_v21  ;;  %v1133_v59 = vadd.f32 %v1101_v43, %v1032_v39  ;;  %v816_v24 = vmul.f32 %v2024_v0, %v780_v9 }
 0x14f   : > { %v1334_v7 = vadd.f32 %v1302_v30, %v1233_v49  ;;  %v1335_v17 = vadd.f32 %v2286_v45, %v1234_v23  ;;  %1466 = vst.msk [vmem:[%s2263_s15 + $0x10] sm:$0xff] %vm256_vm0, %v1434_v53  ;;  %v915_v57 = vmul.f32 %v2037_v12, %v578_v22  ;;  %v1016_v11 = vmul.f32 %v2042_v13, %v679_v35  ;;  %v684_v53 = vld [vmem:[#allocation2 + $0x151] sm:$0xff] }
 0x150   : > { %v747_v48 = vadd.f32 %v715_v6, %v614_v18  ;;  %v847_v37 = vadd.f32 %v815_v26, %v2326_v41  ;;  %v1235_v38 = vadd.f32 %v2354_v44, %v1133_v59  ;;  %v1046_v45 = vadd.f32 %v2176_v58, %v2267_v33  ;;  %v567_v33 = vld [vmem:[#allocation2 + $0x90] sm:$0xff]  ;;  %v565_v59 = vld [vmem:[#allocation2 + $0x78] sm:$0xff] }
 0x151   : > { %v1435_v46 = vadd.f32 %v1403_v3, %v1334_v7  ;;  %v1436_v30 = vadd.f32 %v2364_v20, %v1335_v17  ;;  %v947_v50 = vadd.f32 %v915_v57, %v2197_v29  ;;  %v1116_v41 = vmul.f32 %v2114_v1, %v779_v21  ;;  %v668_v29 = vld [vmem:[#allocation2 + $0x91] sm:$0xff] }
 0x152   : > { %v848_v5 = vadd.f32 %v816_v24, %v747_v48  ;;  %v2443_v47 = vadd.f32 %v2293_v63, %v847_v37  ;;  %v1336_v43 = vadd.f32 %v2361_v34, %v1235_v38  ;;  %v1117_v44 = vmul.f32 %v2114_v1, %v780_v9  ;;  %v583_v18 = vld [vmem:[#allocation2 + $0x150] sm:$0xff] }
 0x153   : > { %1467 = vst.msk [vmem:[%s2263_s15 + $0x18] sm:$0xff] %vm256_vm0, %v1435_v46  ;;  %1468 = vst.msk [vmem:[%s2263_s15 + $0x20] sm:$0xff] %vm256_vm0, %v1436_v30  ;;  %v1147_v20 = vadd.f32 %v2182_v2, %v1046_v45  ;;  %v1217_v58 = vmul.f32 %v2047_v14, %v578_v22  ;;  %v1048_v28 = vadd.f32 %v1016_v11, %v947_v50  ;;  %v581_v11 = vld [vmem:[#allocation2 + $0x138] sm:$0xff] }
 0x154   : > { %v2455_v63 = vadd.f32 %v2374_v55, %v848_v5  ;;  %v1148_v19 = vadd.f32 %v1116_v41, %v2333_v42  ;;  %v1318_v34 = vmul.f32 %v2052_v15, %v679_v35  ;;  %v1437_v54 = vadd.f32 %v2367_v31, %v1336_v43 }
 0x155   : > { %v1249_v3 = vadd.f32 %v1217_v58, %v1147_v20  ;;  %v1418_v39 = vmul.f32 %v2131_v10, %v779_v21  ;;  %v1419_v2 = vmul.f32 %v2131_v10, %v780_v9  ;;  %v1149_v49 = vadd.f32 %v1117_v44, %v1048_v28 }
 0x156   : > { %v1250_v22 = vadd.f32 %v2300_v25, %v1148_v19  ;;  %v603_v23 = vmul.f32 %v2008_v51, %v567_v33  ;;  %v704_v55 = vmul.f32 %v2013_v52, %v668_v29  ;;  %1469 = vst.msk [vmem:[%s2263_s15 + $0x28] sm:$0xff] %vm256_vm0, %v1437_v54  ;;  %v2469_v31 = vmul.f32 %v2037_v12, %v567_v33  ;;  %v568_v19 = vld [vmem:[#allocation2 + $0x98] sm:$0xff]  ;;  %v2991_v54 = vld [vmem:[#allocation24_spill] sm:$0xff] }
 0x157   : > { %v1350_v35 = vadd.f32 %v1318_v34, %v1249_v3  ;;  %v1450_v42 = vadd.f32 %v1418_v39, %v2356_v8  ;;  %v2472_v21 = vmul.f32 %v2042_v13, %v668_v29  ;;  %v1251_v25 = vadd.f32 %v2388_v27, %v1149_v49  ;;  %v666_v27 = vld [vmem:[#allocation2 + $0x79] sm:$0xff] }
 0x158   : > { %v1351_v9 = vadd.f32 %v2303_v4, %v1250_v22  ;;  %v736_v6 = vadd.f32 %v704_v55, %v603_v23  ;;  %v2477_v26 = vmul.f32 %v2047_v14, %v567_v33  ;;  %v2482_v8 = vmul.f32 %v2052_v15, %v668_v29  ;;  %v669_v34 = vld [vmem:[#allocation2 + $0x99] sm:$0xff]  ;;  %v2992_v23 = vld [vmem:[#allocation30_spill] sm:$0xff] }
 0x159   : > { %v1451_v7 = vadd.f32 %v1419_v2, %v1350_v35  ;;  %1482 = vst.msk [vmem:[%s2263_s15 + $0x90] sm:$0xff] %vm256_vm0, %v1450_v42  ;;  %v619_v17 = vmul.f32 %v2008_v51, %v583_v18  ;;  %v720_v24 = vmul.f32 %v2013_v52, %v684_v53  ;;  %v1352_v48 = vadd.f32 %v2391_v62, %v1251_v25  ;;  %v769_v2 = vld [vmem:[#allocation2 + $0x92] sm:$0xff]  ;;  %v770_v49 = vld [vmem:[#allocation2 + $0x9a] sm:$0xff]  ;;  %v2993_v35 = vld [vmem:[#allocation29_spill] sm:$0xff] }
 0x15a   : > { %v1452_v4 = vadd.f32 %v2394_v60, %v1351_v9  ;;  %v2489_v37 = vmul.f32 %v2037_v12, %v583_v18  ;;  %v2492_v57 = vmul.f32 %v2042_v13, %v684_v53  ;;  %v2499_v46 = vmul.f32 %v2047_v14, %v583_v18  ;;  %v682_v60 = vld [vmem:[#allocation2 + $0x139] sm:$0xff] }
 0x15b   : > { %1483 = vst.msk [vmem:[%s2263_s15 + $0x98] sm:$0xff] %vm256_vm0, %v1451_v7  ;;  %v2496_v38 = vadd.f32 %v720_v24, %v619_v17  ;;  %v2502_v30 = vmul.f32 %v2052_v15, %v684_v53  ;;  %v601_v62 = vmul.f32 %v2008_v51, %v565_v59  ;;  %v1453_v45 = vadd.f32 %v2397_v61, %v1352_v48 }
 0x15c   : > { %1484 = vst.msk [vmem:[%s2263_s15 + $0xa0] sm:$0xff] %vm256_vm0, %v1452_v4  ;;  %v702_v5 = vmul.f32 %v2013_v52, %v666_v27  ;;  %v902_v50 = vmul.f32 %v2037_v12, %v565_v59  ;;  %v1003_v41 = vmul.f32 %v2042_v13, %v666_v27  ;;  %v1033_v43 = vadd.f32 %v2279_v36, %v2418_v32  ;;  %v584_v4 = vld [vmem:[#allocation2 + $0x158] sm:$0xff] }
 0x15d   : > { %v1204_v44 = vmul.f32 %v2047_v14, %v565_v59  ;;  %v1305_v20 = vmul.f32 %v2052_v15, %v666_v27  ;;  %v617_v58 = vmul.f32 %v2008_v51, %v581_v11  ;;  %1485 = vst.msk [vmem:[%s2263_s15 + $0xa8] sm:$0xff] %vm256_vm0, %v1453_v45  ;;  %v718_v29 = vmul.f32 %v2013_v52, %v682_v60 }
 0x15e   : > { %v2518_v61 = vadd.f32 %v702_v5, %v601_v62  ;;  %v934_v33 = vadd.f32 %v902_v50, %v2345_v16  ;;  %v918_v28 = vmul.f32 %v2037_v12, %v581_v11  ;;  %v1134_v36 = vadd.f32 %v2348_v40, %v1033_v43  ;;  %v785_v62 = vld [vmem:[#allocation2 + $0x152] sm:$0xff] }
 0x15f   : > { %v1019_v32 = vmul.f32 %v2042_v13, %v682_v60  ;;  %v1049_v3 = vadd.f32 %v2991_v54, %v2443_v47  ;;  %v1220_v39 = vmul.f32 %v2047_v14, %v581_v11  ;;  %v2530_v16 = vadd.f32 %v718_v29, %v617_v58  ;;  %v685_v11 = vld [vmem:[#allocation2 + $0x159] sm:$0xff] }
 0x160   : > { %v2528_v22 = vadd.f32 %v1003_v41, %v934_v33  ;;  %v950_v55 = vadd.f32 %v918_v28, %v2992_v23  ;;  %v1321_v18 = vmul.f32 %v2052_v15, %v682_v60  ;;  %v1236_v53 = vadd.f32 %v1204_v44, %v1134_v36  ;;  %v786_v41 = vld [vmem:[#allocation2 + $0x15a] sm:$0xff] }
 0x161   : > { %v1150_v40 = vadd.f32 %v2993_v35, %v1049_v3  ;;  %v604_v42 = vmul.f32 %v2008_v51, %v568_v19  ;;  %v705_v25 = vmul.f32 %v2013_v52, %v669_v34  ;;  %v805_v9 = vmul.f32 %v2024_v0, %v769_v2  ;;  %v667_v3 = vld [vmem:[#allocation2 + $0x81] sm:$0xff] }
 0x162   : > { %v2537_v47 = vadd.f32 %v1019_v32, %v950_v55  ;;  %v806_v59 = vmul.f32 %v2024_v0, %v770_v49  ;;  %v2542_v7 = vmul.f32 %v2037_v12, %v568_v19  ;;  %v2544_v17 = vadd.f32 %v1305_v20, %v1236_v53 }
 0x163   : > { %v1252_v24 = vadd.f32 %v1220_v39, %v1150_v40  ;;  %v737_v27 = vadd.f32 %v705_v25, %v604_v42  ;;  %v2547_v48 = vmul.f32 %v2042_v13, %v669_v34  ;;  %v2549_v60 = vadd.f32 %v805_v9, %v736_v6  ;;  %v767_v39 = vld [vmem:[#allocation2 + $0x7a] sm:$0xff] }
 0x164   : > { %v2552_v45 = vmul.f32 %v2114_v1, %v769_v2  ;;  %v2555_v5 = vmul.f32 %v2114_v1, %v770_v49  ;;  %v2558_v50 = vmul.f32 %v2047_v14, %v568_v19  ;;  %v2565_v20 = vmul.f32 %v2052_v15, %v669_v34  ;;  %v566_v19 = vld [vmem:[#allocation2 + $0x80] sm:$0xff] }
 0x165   : > { %2994 = vst [vmem:[#allocation24_spill] sm:$0xff] %v2547_v48  ;;  %v2560_v43 = vadd.f32 %v1321_v18, %v1252_v24  ;;  %v2562_v44 = vadd.f32 %v806_v59, %v737_v27  ;;  %v2568_v6 = vmul.f32 %v2131_v10, %v769_v2  ;;  %v2571_v58 = vmul.f32 %v2131_v10, %v770_v49  ;;  %v768_v2 = vld [vmem:[#allocation2 + $0x82] sm:$0xff] }
 0x166   : > { %2995 = vst [vmem:[#allocation30_spill] sm:$0xff] %v2555_v5  ;;  %v620_v33 = vmul.f32 %v2008_v51, %v584_v4  ;;  %v721_v29 = vmul.f32 %v2013_v52, %v685_v11  ;;  %v821_v28 = vmul.f32 %v2024_v0, %v785_v62  ;;  %v822_v36 = vmul.f32 %v2024_v0, %v786_v41  ;;  %v683_v48 = vld [vmem:[#allocation2 + $0x141] sm:$0xff] }
 0x167   : > { %2996 = vst [vmem:[#allocation29_spill] sm:$0xff] %v2562_v44  ;;  %v2578_v32 = vmul.f32 %v2037_v12, %v584_v4  ;;  %v2581_v34 = vmul.f32 %v2042_v13, %v685_v11  ;;  %v2584_v54 = vmul.f32 %v2114_v1, %v785_v62  ;;  %v2590_v55 = vmul.f32 %v2114_v1, %v786_v41 }
 0x168   : > { %v753_v49 = vadd.f32 %v721_v29, %v620_v33  ;;  %v2587_v23 = vadd.f32 %v821_v28, %v2496_v38  ;;  %v2593_v18 = vmul.f32 %v2047_v14, %v584_v4  ;;  %v2596_v53 = vmul.f32 %v2052_v15, %v685_v11  ;;  %v3000_v4 = vld [vmem:[#allocation25_spill] sm:$0xff] }
 0x169   : > { %2997 = vst [vmem:[#allocation33_spill] sm:$0xff] %v2581_v34  ;;  %2998 = vst [vmem:[#allocation34_spill] sm:$0xff] %v2590_v55  ;;  %v2599_v35 = vmul.f32 %v2131_v10, %v785_v62  ;;  %v2602_v40 = vmul.f32 %v2131_v10, %v786_v41  ;;  %v602_v42 = vmul.f32 %v2008_v51, %v566_v19  ;;  %v3002_v34 = vld [vmem:[#allocation26_spill] sm:$0xff] }
 0x16a   : > { %v2605_v25 = vadd.f32 %v822_v36, %v753_v49  ;;  %v703_v38 = vmul.f32 %v2013_v52, %v667_v3  ;;  %v803_v9 = vmul.f32 %v2024_v0, %v767_v39  ;;  %v804_v59 = vmul.f32 %v2024_v0, %v768_v2  ;;  %v582_v36 = vld [vmem:[#allocation2 + $0x140] sm:$0xff]  ;;  %v3001_v49 = vld [vmem:[#allocation27_spill] sm:$0xff] }
 0x16b   : > { %v903_v24 = vmul.f32 %v2037_v12, %v566_v19  ;;  %v1004_v27 = vmul.f32 %v2042_v13, %v667_v3  ;;  %v1034_v11 = vadd.f32 %v3000_v4, %v2425_v56  ;;  %v1104_v62 = vmul.f32 %v2114_v1, %v767_v39  ;;  %v783_v56 = vld [vmem:[#allocation2 + $0x13a] sm:$0xff] }
 0x16c   : > { %2999 = vst [vmem:[#allocation35_spill] sm:$0xff] %v2605_v25  ;;  %v735_v41 = vadd.f32 %v703_v38, %v602_v42  ;;  %v835_v33 = vadd.f32 %v803_v9, %v2518_v61  ;;  %v1105_v29 = vmul.f32 %v2114_v1, %v768_v2  ;;  %v1205_v28 = vmul.f32 %v2047_v14, %v566_v19  ;;  %v784_v38 = vld [vmem:[#allocation2 + $0x142] sm:$0xff] }
 0x16d   : > { %v935_v55 = vadd.f32 %v903_v24, %v3001_v49  ;;  %v1135_v25 = vadd.f32 %v3002_v34, %v1034_v11  ;;  %v1136_v5 = vadd.f32 %v1104_v62, %v2528_v22  ;;  %v1306_v44 = vmul.f32 %v2052_v15, %v667_v3 }
 0x16e   : > { %v836_v4 = vadd.f32 %v804_v59, %v735_v41  ;;  %v2623_v42 = vadd.f32 %v2469_v31, %v835_v33  ;;  %v1406_v61 = vmul.f32 %v2131_v10, %v767_v39  ;;  %v1407_v19 = vmul.f32 %v2131_v10, %v768_v2 }
 0x16f   : > { %v1036_v9 = vadd.f32 %v1004_v27, %v935_v55  ;;  %v1237_v24 = vadd.f32 %v1205_v28, %v1135_v25  ;;  %v1238_v34 = vadd.f32 %v2477_v26, %v1136_v5  ;;  %v618_v22 = vmul.f32 %v2008_v51, %v582_v36  ;;  %v672_v28 = vld [vmem:[#allocation2 + $0xc1] sm:$0xff] }
 0x170   : > { %v2630_v3 = vadd.f32 %v2542_v7, %v836_v4  ;;  %v1438_v59 = vadd.f32 %v1406_v61, %v2544_v17  ;;  %v719_v31 = vmul.f32 %v2013_v52, %v683_v48  ;;  %v819_v11 = vmul.f32 %v2024_v0, %v783_v56 }
 0x171   : > { %v1137_v62 = vadd.f32 %v1105_v29, %v1036_v9  ;;  %v1338_v39 = vadd.f32 %v1306_v44, %v1237_v24  ;;  %v1339_v2 = vadd.f32 %v2482_v8, %v1238_v34  ;;  %v820_v55 = vmul.f32 %v2024_v0, %v784_v38  ;;  %v3003_v8 = vld [vmem:[#allocation28_spill] sm:$0xff] }
 0x172   : > { %1470 = vst.msk [vmem:[%s2263_s15 + $0x30] sm:$0xff] %vm256_vm0, %v1438_v59  ;;  %v751_v51 = vadd.f32 %v719_v31, %v618_v22  ;;  %v851_v26 = vadd.f32 %v819_v11, %v2530_v16  ;;  %v919_v7 = vmul.f32 %v2037_v12, %v582_v36  ;;  %v1020_v17 = vmul.f32 %v2042_v13, %v683_v48  ;;  %v3004_v0 = vld [vmem:[#allocation32_spill] sm:$0xff] }
 0x173   : > { %v1239_v52 = vadd.f32 %v2558_v50, %v1137_v62  ;;  %v1439_v5 = vadd.f32 %v1407_v19, %v1338_v39  ;;  %v1440_v44 = vadd.f32 %v2568_v6, %v1339_v2  ;;  %v1050_v25 = vadd.f32 %v3003_v8, %v2455_v63  ;;  %v3005_v50 = vld [vmem:[#allocation31_spill] sm:$0xff]  ;;  %v571_v29 = vld [vmem:[#allocation2 + $0xc0] sm:$0xff]  ;;  %v569_v39 = vld [vmem:[#allocation2 + $0xa8] sm:$0xff] }
 0x174   : > { %v852_v27 = vadd.f32 %v820_v55, %v751_v51  ;;  %v951_v41 = vadd.f32 %v919_v7, %v3004_v0  ;;  %v2648_v33 = vadd.f32 %v2489_v37, %v851_v26  ;;  %v1120_v16 = vmul.f32 %v2114_v1, %v783_v56  ;;  %v2694_v34 = vld [vmem:[%s2959_s2 + $0x4] ss:$0 sm:$0xff]  ;;  %v2704_v11 = vld [vmem:[%s2959_s2 + $0x6] ss:$0 sm:$0xff]  ;;  %v670_v2 = vld [vmem:[#allocation2 + $0xa9] sm:$0xff] }
 0x175   : > { %v1340_v12 = vadd.f32 %v2565_v20, %v1239_v52  ;;  %1471 = vst.msk [vmem:[%s2263_s15 + $0x38] sm:$0xff] %vm256_vm0, %v1439_v5  ;;  %1472 = vst.msk [vmem:[%s2263_s15 + $0x40] sm:$0xff] %vm256_vm0, %v1440_v44  ;;  %v1121_v13 = vmul.f32 %v2114_v1, %v784_v38  ;;  %v1151_v6 = vadd.f32 %v3005_v50, %v1050_v25  ;;  %v585_v44 = vld [vmem:[#allocation2 + $0x168] sm:$0xff] }
 0x176   : > { %v1221_v63 = vmul.f32 %v2047_v14, %v582_v36  ;;  %v2660_v49 = vadd.f32 %v2578_v32, %v852_v27  ;;  %v1052_v37 = vadd.f32 %v1020_v17, %v951_v41  ;;  %v1152_v4 = vadd.f32 %v1120_v16, %v2537_v47  ;;  %v2671_v32 = vld [vmem:[%s2959_s2] ss:$0 sm:$0xff]  ;;  %v686_v8 = vld [vmem:[#allocation2 + $0x169] sm:$0xff] }
 0x177   : > { %v1322_v20 = vmul.f32 %v2052_v15, %v683_v48  ;;  %v1441_v61 = vadd.f32 %v2571_v58, %v1340_v12  ;;  %v1422_v1 = vmul.f32 %v2131_v10, %v783_v56  ;;  %v1423_v9 = vmul.f32 %v2131_v10, %v784_v38  ;;  %v2677_v15 = vld [vmem:[%s2959_s2 + $0x1] ss:$0 sm:$0xff]  ;;  %v2686_v56 = vld [vmem:[%s2959_s2 + $0x3] ss:$0 sm:$0xff] }
 0x178   : > { %v1253_v19 = vadd.f32 %v1221_v63, %v1151_v6  ;;  %v1153_v24 = vadd.f32 %v1121_v13, %v1052_v37  ;;  %v1254_v14 = vadd.f32 %v2499_v46, %v1152_v4  ;;  %v607_v36 = vmul.f32 %v2671_v32, %v571_v29  ;;  %v888_v48 = vld [vmem:[#allocation2 + $0x180] sm:$0xff]  ;;  %v673_v37 = vld [vmem:[#allocation2 + $0xc9] sm:$0xff] }
 0x179   : > { %v708_v47 = vmul.f32 %v2677_v15, %v672_v28  ;;  %v989_v58 = vld [vmem:[#allocation2 + $0x181] sm:$0xff]  ;;  %1473 = vst.msk [vmem:[%s2263_s15 + $0x48] sm:$0xff] %vm256_vm0, %v1441_v61  ;;  %v1454_v46 = vadd.f32 %v1422_v1, %v2560_v43  ;;  %v2689_v38 = vmul.f32 %v2686_v56, %v571_v29  ;;  %v2697_v22 = vmul.f32 %v2694_v34, %v672_v28 }
 0x17a   : > { %v1354_v10 = vadd.f32 %v1322_v20, %v1253_v19  ;;  %v1255_v59 = vadd.f32 %v2593_v18, %v1153_v24  ;;  %v1355_v43 = vadd.f32 %v2502_v30, %v1254_v14  ;;  %v2707_v62 = vmul.f32 %v2704_v11, %v571_v29  ;;  %v2714_v18 = vld [vmem:[%s2959_s2 + $0x7] ss:$0 sm:$0xff]  ;;  %v572_v29 = vld [vmem:[#allocation2 + $0xc8] sm:$0xff] }
 0x17b   : > { %v740_v31 = vadd.f32 %v708_v47, %v607_v36  ;;  %1486 = vst.msk [vmem:[%s2263_s15 + $0xb0] sm:$0xff] %vm256_vm0, %v1454_v46  ;;  %v2717_v30 = vmul.f32 %v2714_v18, %v672_v28  ;;  %v2720_v51 = vmul.f32 %v2686_v56, %v888_v48  ;;  %v2723_v26 = vmul.f32 %v2694_v34, %v989_v58  ;;  %v773_v4 = vld [vmem:[#allocation2 + $0xc2] sm:$0xff]  ;;  %v774_v20 = vld [vmem:[#allocation2 + $0xca] sm:$0xff] }
 0x17c   : > { %v1455_v55 = vadd.f32 %v1423_v9, %v1354_v10  ;;  %v1356_v7 = vadd.f32 %v2596_v53, %v1255_v59  ;;  %v1456_v17 = vadd.f32 %v2599_v35, %v1355_v43  ;;  %v2728_v52 = vmul.f32 %v2704_v11, %v888_v48  ;;  %v889_v46 = vld [vmem:[#allocation2 + $0x188] sm:$0xff] }
 0x17d   : > { %v2731_v5 = vmul.f32 %v2714_v18, %v989_v58  ;;  %v605_v25 = vmul.f32 %v2671_v32, %v569_v39  ;;  %v706_v27 = vmul.f32 %v2677_v15, %v670_v2  ;;  %v906_v0 = vmul.f32 %v2686_v56, %v569_v39 }
 0x17e   : > { %1487 = vst.msk [vmem:[%s2263_s15 + $0xb8] sm:$0xff] %vm256_vm0, %v1455_v55  ;;  %v1007_v53 = vmul.f32 %v2694_v34, %v670_v2  ;;  %v1457_v35 = vadd.f32 %v2602_v40, %v1356_v7  ;;  %1488 = vst.msk [vmem:[%s2263_s15 + $0xc0] sm:$0xff] %vm256_vm0, %v1456_v17  ;;  %v1037_v41 = vadd.f32 %v2472_v21, %v2623_v42  ;;  %v990_v7 = vld [vmem:[#allocation2 + $0x189] sm:$0xff] }
 0x17f   : > { %3006 = vst [vmem:[#allocation25_spill] sm:$0xff] %v2731_v5  ;;  %v1208_v16 = vmul.f32 %v2704_v11, %v569_v39  ;;  %v1309_v12 = vmul.f32 %v2714_v18, %v670_v2  ;;  %v2746_v13 = vadd.f32 %v706_v27, %v605_v25  ;;  %v938_v50 = vadd.f32 %v906_v0, %v2549_v60  ;;  %v2786_v39 = vld [vmem:[%s2959_s2 + $0x5] ss:$0 sm:$0xff] }
 0x180   : > { %v621_v6 = vmul.f32 %v2671_v32, %v585_v44  ;;  %v722_v63 = vmul.f32 %v2677_v15, %v686_v8  ;;  %1489 = vst.msk [vmem:[%s2263_s15 + $0xc8] sm:$0xff] %vm256_vm0, %v1457_v35  ;;  %v1138_v40 = vadd.f32 %v2552_v45, %v1037_v41  ;;  %v922_v28 = vmul.f32 %v2686_v56, %v585_v44  ;;  %v1090_v17 = vld [vmem:[#allocation2 + $0x182] sm:$0xff] }
 0x181   : > { %v1023_v21 = vmul.f32 %v2694_v34, %v686_v8  ;;  %v1053_v42 = vadd.f32 %v2492_v57, %v2648_v33  ;;  %v2758_v60 = vadd.f32 %v1007_v53, %v938_v50  ;;  %v1224_v19 = vmul.f32 %v2704_v11, %v585_v44  ;;  %v2771_v33 = vld [vmem:[%s2959_s2 + $0x2] ss:$0 sm:$0xff]  ;;  %v1091_v44 = vld [vmem:[#allocation2 + $0x18a] sm:$0xff] }
 0x182   : > { %v2760_v61 = vadd.f32 %v722_v63, %v621_v6  ;;  %v1325_v1 = vmul.f32 %v2714_v18, %v686_v8  ;;  %v1240_v9 = vadd.f32 %v1208_v16, %v1138_v40  ;;  %v954_v45 = vadd.f32 %v922_v28, %v2587_v23  ;;  %v3008_v35 = vld [vmem:[#allocation8_spill] sm:$0xff]  ;;  %v570_v50 = vld [vmem:[#allocation2 + $0xb0] sm:$0xff] }
 0x183   : > { %v1154_v24 = vadd.f32 %v2584_v54, %v1053_v42  ;;  %v608_v14 = vmul.f32 %v2671_v32, %v572_v29  ;;  %v709_v57 = vmul.f32 %v2677_v15, %v673_v37  ;;  %v809_v36 = vmul.f32 %v2771_v33, %v773_v4  ;;  %v671_v6 = vld [vmem:[#allocation2 + $0xb1] sm:$0xff] }
 0x184   : > { %v810_v47 = vmul.f32 %v2771_v33, %v774_v20  ;;  %v909_v48 = vmul.f32 %v2686_v56, %v572_v29  ;;  %v2776_v58 = vadd.f32 %v1309_v12, %v1240_v9  ;;  %v2778_v23 = vadd.f32 %v1023_v21, %v954_v45  ;;  %v771_v63 = vld [vmem:[#allocation2 + $0xaa] sm:$0xff]  ;;  %v772_v42 = vld [vmem:[#allocation2 + $0xb2] sm:$0xff] }
 0x185   : > { %v1256_v54 = vadd.f32 %v1224_v19, %v1154_v24  ;;  %v2781_v10 = vmul.f32 %v2694_v34, %v673_v37  ;;  %v741_v59 = vadd.f32 %v709_v57, %v608_v14  ;;  %v841_v43 = vadd.f32 %v809_v36, %v740_v31  ;;  %v2801_v31 = vld [vmem:[%s2959_s2 + $0x8] ss:$0 sm:$0xff] }
 0x186   : > { %v1110_v2 = vmul.f32 %v2786_v39, %v773_v4  ;;  %v2790_v55 = vmul.f32 %v2786_v39, %v774_v20  ;;  %v1211_v25 = vmul.f32 %v2704_v11, %v572_v29  ;;  %v2796_v27 = vmul.f32 %v2714_v18, %v673_v37  ;;  %v3009_v37 = vld [vmem:[#allocation16_spill] sm:$0xff]  ;;  %v3014_v36 = vld [vmem:[#allocation17_spill] sm:$0xff] }
 0x187   : > { %v2792_v8 = vadd.f32 %v1325_v1, %v1256_v54  ;;  %v2804_v0 = vmul.f32 %v2801_v31, %v773_v4  ;;  %v842_v53 = vadd.f32 %v810_v47, %v741_v59  ;;  %v942_v41 = vadd.f32 %v3008_v35, %v841_v43  ;;  %v3015_v54 = vld [vmem:[#allocation18_spill] sm:$0xff] }
 0x188   : > { %v2808_v16 = vmul.f32 %v2801_v31, %v774_v20  ;;  %v2811_v12 = vmul.f32 %v2686_v56, %v889_v46  ;;  %v2814_v29 = vmul.f32 %v2694_v34, %v990_v7  ;;  %v2817_v40 = vmul.f32 %v2786_v39, %v1090_v17  ;;  %v3010_v20 = vld [vmem:[#allocation9_spill] sm:$0xff] }
 0x189   : > { %3007 = vst [vmem:[#allocation27_spill] sm:$0xff] %v2792_v8  ;;  %v2820_v28 = vmul.f32 %v2786_v39, %v1091_v44  ;;  %v2823_v21 = vmul.f32 %v2704_v11, %v889_v46  ;;  %v943_v4 = vadd.f32 %v3009_v37, %v842_v53  ;;  %v1043_v19 = vadd.f32 %v3010_v20, %v942_v41  ;;  %v3016_v53 = vld [vmem:[#allocation24_spill] sm:$0xff]  ;;  %v3017_v41 = vld [vmem:[#allocation19_spill] sm:$0xff]  ;;  %v3018_v20 = vld [vmem:[#allocation6_spill] sm:$0xff] }
 0x18a   : > { %v2828_v1 = vmul.f32 %v2714_v18, %v990_v7  ;;  %v2831_v9 = vmul.f32 %v2801_v31, %v1090_v17  ;;  %v2834_v45 = vmul.f32 %v2801_v31, %v1091_v44  ;;  %v606_v24 = vmul.f32 %v2671_v32, %v570_v50 }
 0x18b   : > { %v707_v14 = vmul.f32 %v2677_v15, %v671_v6  ;;  %v807_v57 = vmul.f32 %v2771_v33, %v771_v63  ;;  %v1044_v47 = vadd.f32 %v3014_v36, %v943_v4  ;;  %v1144_v46 = vadd.f32 %v3015_v54, %v1043_v19 }
 0x18c   : > { %3011 = vst [vmem:[#allocation26_spill] sm:$0xff] %v2828_v1  ;;  %3012 = vst [vmem:[#allocation28_spill] sm:$0xff] %v2831_v9  ;;  %v808_v59 = vmul.f32 %v2771_v33, %v772_v42  ;;  %v907_v43 = vmul.f32 %v2686_v56, %v570_v50  ;;  %v1008_v44 = vmul.f32 %v2694_v34, %v671_v6  ;;  %v3019_v9 = vld [vmem:[#allocation29_spill] sm:$0xff]  ;;  %v3022_v1 = vld [vmem:[#allocation7_spill] sm:$0xff] }
 0x18d   : > { %3013 = vst [vmem:[#allocation32_spill] sm:$0xff] %v2834_v45  ;;  %v739_v7 = vadd.f32 %v707_v14, %v606_v24  ;;  %v839_v17 = vadd.f32 %v807_v57, %v2746_v13  ;;  %v1038_v35 = vadd.f32 %v3016_v53, %v2630_v3  ;;  %v1145_v37 = vadd.f32 %v3017_v41, %v1044_v47  ;;  %v3020_v14 = vld [vmem:[#allocation30_spill] sm:$0xff]  ;;  %v3021_v57 = vld [vmem:[#allocation12_spill] sm:$0xff] }
 0x18e   : > { %v1246_v45 = vadd.f32 %v3018_v20, %v1144_v46  ;;  %v939_v4 = vadd.f32 %v907_v43, %v3019_v9  ;;  %v1108_v19 = vmul.f32 %v2786_v39, %v771_v63  ;;  %v1109_v24 = vmul.f32 %v2786_v39, %v772_v42 }
 0x18f   : > { %v840_v36 = vadd.f32 %v808_v59, %v739_v7  ;;  %v940_v54 = vadd.f32 %v2689_v38, %v839_v17  ;;  %v1139_v13 = vadd.f32 %v3020_v14, %v1038_v35  ;;  %v1247_v8 = vadd.f32 %v3021_v57, %v1145_v37  ;;  %v3023_v38 = vld [vmem:[#allocation13_spill] sm:$0xff]  ;;  %v3024_v17 = vld [vmem:[#allocation14_spill] sm:$0xff]  ;;  %v3025_v37 = vld [vmem:[#allocation15_spill] sm:$0xff] }
 0x190   : > { %v1347_v5 = vadd.f32 %v3022_v1, %v1246_v45  ;;  %v1040_v3 = vadd.f32 %v1008_v44, %v939_v4  ;;  %v1140_v47 = vadd.f32 %v1108_v19, %v2758_v60  ;;  %v1209_v43 = vmul.f32 %v2704_v11, %v570_v50  ;;  %v586_v44 = vld [vmem:[#allocation2 + $0x170] sm:$0xff] }
 0x191   : > { %v941_v46 = vadd.f32 %v909_v48, %v840_v36  ;;  %v1041_v9 = vadd.f32 %v2697_v22, %v940_v54  ;;  %v1310_v59 = vmul.f32 %v2714_v18, %v671_v6  ;;  %v1348_v7 = vadd.f32 %v3023_v38, %v1247_v8  ;;  %v687_v22 = vld [vmem:[#allocation2 + $0x171] sm:$0xff]  ;;  %v3027_v54 = vld [vmem:[#allocation20_spill] sm:$0xff] }
 0x192   : > { %v1448_v53 = vadd.f32 %v3024_v17, %v1347_v5  ;;  %v1141_v35 = vadd.f32 %v1109_v24, %v1040_v3  ;;  %v1242_v41 = vadd.f32 %v2707_v62, %v1140_v47  ;;  %v1241_v60 = vadd.f32 %v1209_v43, %v1139_v13  ;;  %v787_v62 = vld [vmem:[#allocation2 + $0x16a] sm:$0xff]  ;;  %v788_v19 = vld [vmem:[#allocation2 + $0x172] sm:$0xff] }
 0x193   : > { %v1042_v1 = vadd.f32 %v2781_v10, %v941_v46  ;;  %v1142_v45 = vadd.f32 %v1110_v2, %v1041_v9  ;;  %v1410_v48 = vmul.f32 %v2801_v31, %v771_v63  ;;  %v1449_v50 = vadd.f32 %v3025_v37, %v1348_v7  ;;  %v3026_v2 = vld [vmem:[#allocation10_spill] sm:$0xff]  ;;  %v3028_v24 = vld [vmem:[#allocation11_spill] sm:$0xff]  ;;  %v3032_v7 = vld [vmem:[#allocation33_spill] sm:$0xff] }
 0x194   : > { %1480 = vst.msk [vmem:[%s2263_s15 + $0x80] sm:$0xff] %vm256_vm0, %v1448_v53  ;;  %v1243_v6 = vadd.f32 %v1211_v25, %v1141_v35  ;;  %v1343_v8 = vadd.f32 %v2717_v30, %v1242_v41  ;;  %v1411_v5 = vmul.f32 %v2801_v31, %v772_v42  ;;  %v1342_v4 = vadd.f32 %v1310_v59, %v1241_v60  ;;  %v3030_v47 = vld [vmem:[#allocation22_spill] sm:$0xff]  ;;  %v3031_v59 = vld [vmem:[#allocation35_spill] sm:$0xff]  ;;  %v1193_v53 = vld [vmem:[#allocation2 + $0x1a0] sm:$0xff] }
 0x195   : > { %v1143_v10 = vadd.f32 %v2790_v55, %v1042_v1  ;;  %v1244_v20 = vadd.f32 %v3026_v2, %v1142_v45  ;;  %v1442_v63 = vadd.f32 %v1410_v48, %v2776_v58  ;;  %1481 = vst.msk [vmem:[%s2263_s15 + $0x88] sm:$0xff] %vm256_vm0, %v1449_v50  ;;  %v622_v25 = vmul.f32 %v2671_v32, %v586_v44  ;;  %v1192_v17 = vld [vmem:[#allocation2 + $0x198] sm:$0xff]  ;;  %v3034_v48 = vld [vmem:[#allocation34_spill] sm:$0xff] }
 0x196   : > { %v1344_v36 = vadd.f32 %v2796_v27, %v1243_v6  ;;  %v1444_v30 = vadd.f32 %v2804_v0, %v1343_v8  ;;  %v723_v42 = vmul.f32 %v2677_v15, %v687_v22  ;;  %v1443_v13 = vadd.f32 %v1411_v5, %v1342_v4  ;;  %v3029_v0 = vld [vmem:[#allocation21_spill] sm:$0xff]  ;;  %v3033_v35 = vld [vmem:[#allocation23_spill] sm:$0xff] }
 0x197   : > { %v1245_v55 = vadd.f32 %v3027_v54, %v1143_v10  ;;  %v1345_v14 = vadd.f32 %v3028_v24, %v1244_v20  ;;  %1474 = vst.msk [vmem:[%s2263_s15 + $0x50] sm:$0xff] %vm256_vm0, %v1442_v63  ;;  %v823_v58 = vmul.f32 %v2771_v33, %v787_v62  ;;  %v824_v32 = vmul.f32 %v2771_v33, %v788_v19  ;;  %v1293_v50 = vld [vmem:[#allocation2 + $0x199] sm:$0xff]  ;;  %v1294_v6 = vld [vmem:[#allocation2 + $0x1a1] sm:$0xff] }
 0x198   : > { %v1445_v57 = vadd.f32 %v2808_v16, %v1344_v36  ;;  %1476 = vst.msk [vmem:[%s2263_s15 + $0x60] sm:$0xff] %vm256_vm0, %v1444_v30  ;;  %v755_v27 = vadd.f32 %v723_v42, %v622_v25  ;;  %v923_v15 = vmul.f32 %v2686_v56, %v586_v44  ;;  %1475 = vst.msk [vmem:[%s2263_s15 + $0x58] sm:$0xff] %vm256_vm0, %v1443_v13  ;;  %v1394_v20 = vld [vmem:[#allocation2 + $0x19a] sm:$0xff]  ;;  %v3035_v30 = vld [vmem:[#allocation25_spill] sm:$0xff] }
 0x199   : > { %v1346_v3 = vadd.f32 %v3029_v0, %v1245_v55  ;;  %v1446_v46 = vadd.f32 %v3030_v47, %v1345_v14  ;;  %v855_v9 = vadd.f32 %v823_v58, %v2760_v61  ;;  %v1024_v43 = vmul.f32 %v2694_v34, %v687_v22  ;;  %v3037_v55 = vld [vmem:[#allocation27_spill] sm:$0xff]  ;;  %v3038_v24 = vld [vmem:[#allocation28_spill] sm:$0xff] }
 0x19a   : > { %1477 = vst.msk [vmem:[%s2263_s15 + $0x68] sm:$0xff] %vm256_vm0, %v1445_v57  ;;  %v856_v16 = vadd.f32 %v824_v32, %v755_v27  ;;  %v955_v38 = vadd.f32 %v923_v15, %v3031_v59  ;;  %v1054_v33 = vadd.f32 %v3032_v7, %v2660_v49  ;;  %v1124_v56 = vmul.f32 %v2786_v39, %v787_v62  ;;  %v3039_v27 = vld [vmem:[#allocation32_spill] sm:$0xff] }
 0x19b   : > { %v1447_v41 = vadd.f32 %v3033_v35, %v1346_v3  ;;  %1478 = vst.msk [vmem:[%s2263_s15 + $0x70] sm:$0xff] %vm256_vm0, %v1446_v46  ;;  %v956_v61 = vadd.f32 %v2720_v51, %v855_v9  ;;  %v1125_v34 = vmul.f32 %v2786_v39, %v788_v19  ;;  %v1225_v1 = vmul.f32 %v2704_v11, %v586_v44 }
 0x19c   : > { %v957_v45 = vadd.f32 %v2811_v12, %v856_v16  ;;  %v1056_v60 = vadd.f32 %v1024_v43, %v955_v38  ;;  %v1155_v37 = vadd.f32 %v3034_v48, %v1054_v33  ;;  %v1156_v49 = vadd.f32 %v1124_v56, %v2778_v23  ;;  %v1395_v23 = vld [vmem:[#allocation2 + $0x1a2] sm:$0xff] }
 0x19d   : > { %1479 = vst.msk [vmem:[%s2263_s15 + $0x78] sm:$0xff] %vm256_vm0, %v1447_v41  ;;  %v1057_v8 = vadd.f32 %v2723_v26, %v956_v61  ;;  %v1228_v5 = vmul.f32 %v2704_v11, %v1192_v17  ;;  %v1229_v51 = vmul.f32 %v2704_v11, %v1193_v53  ;;  %v1326_v39 = vmul.f32 %v2714_v18, %v687_v22 }
 0x19e   : > { %v1058_v44 = vadd.f32 %v2814_v29, %v957_v45  ;;  %v1157_v12 = vadd.f32 %v1125_v34, %v1056_v60  ;;  %v1257_v10 = vadd.f32 %v1225_v1, %v1155_v37  ;;  %v1258_v2 = vadd.f32 %v2728_v52, %v1156_v49 }
 0x19f   : > { %v1158_v4 = vadd.f32 %v2817_v40, %v1057_v8  ;;  %v1329_v63 = vmul.f32 %v2714_v18, %v1293_v50  ;;  %v1330_v26 = vmul.f32 %v2714_v18, %v1294_v6  ;;  %v1426_v36 = vmul.f32 %v2801_v31, %v787_v62 }
 0x1a0   : > { %v1159_v11 = vadd.f32 %v2820_v28, %v1058_v44  ;;  %v1259_v22 = vadd.f32 %v2823_v21, %v1157_v12  ;;  %v1358_v29 = vadd.f32 %v1326_v39, %v1257_v10  ;;  %v1359_v25 = vadd.f32 %v3035_v30, %v1258_v2  ;;  %v3036_v28 = vld [vmem:[#allocation26_spill] sm:$0xff] }
 0x1a1   : > { %v1260_v52 = vadd.f32 %v1228_v5, %v1158_v4  ;;  %v1427_v42 = vmul.f32 %v2801_v31, %v788_v19  ;;  %v1430_v40 = vmul.f32 %v2801_v31, %v1394_v20  ;;  %v1431_v18 = vmul.f32 %v2801_v31, %v1395_v23 }
 0x1a2   : > { %v1261_v62 = vadd.f32 %v1229_v51, %v1159_v11  ;;  %v1360_v54 = vadd.f32 %v3036_v28, %v1259_v22  ;;  %v1458_v21 = vadd.f32 %v1426_v36, %v3037_v55  ;;  %v1460_v14 = vadd.f32 %v3038_v24, %v1359_v25 }
 0x1a3   : > { %v1361_v13 = vadd.f32 %v1329_v63, %v1260_v52  ;;  %v1459_v58 = vadd.f32 %v1427_v42, %v1358_v29 }
 0x1a4   : > { %v1362_v57 = vadd.f32 %v1330_v26, %v1261_v62  ;;  %v1461_v32 = vadd.f32 %v3039_v27, %v1360_v54  ;;  %1490 = vst.msk [vmem:[%s2263_s15 + $0xd0] sm:$0xff] %vm256_vm0, %v1458_v21  ;;  %1492 = vst.msk [vmem:[%s2263_s15 + $0xe0] sm:$0xff] %vm256_vm0, %v1460_v14 }
 0x1a5   : > { %v1462_v19 = vadd.f32 %v1430_v40, %v1361_v13  ;;  %1491 = vst.msk [vmem:[%s2263_s15 + $0xd8] sm:$0xff] %vm256_vm0, %v1459_v58 }
 0x1a6   : > { %v1463_v31 = vadd.f32 %v1431_v18, %v1362_v57  ;;  %1493 = vst.msk [vmem:[%s2263_s15 + $0xe8] sm:$0xff] %vm256_vm0, %v1461_v32 }
 0x1a7   : > { %1494 = vst.msk [vmem:[%s2263_s15 + $0xf0] sm:$0xff] %vm256_vm0, %v1462_v19 }
 0x1a8   : > { %1495 = vst.msk [vmem:[%s2263_s15 + $0xf8] sm:$0xff] %vm256_vm0, %v1463_v31 }
 0x1a9 PF: > { %p13_p8 = scmp.ge.s32.totalorder %s1827_s17, 4   ;;  %s3040_s12 = smov %s1771_s13 }
 0x1aa   : > { %s3041_s13 = smov %s1775_s14  ;;  %s3042_s14 = smov %s1837_s20 }
 0x1ab   : > { %s3043_s15 = smov %s1827_s17  ;;  %15 = sbr.rel (!%p13_p8) target bundleno = 3 (0x3), region = 74 }
 0x1b2   :  { %1517 = vsyncpa [#allocation4], 1 }
 0x1b3   :  { %1519 = vsyncpa [#allocation4 + $0x1], 1 }

// kernel: sftffn_forward.4
= control target key start
LH: loop header
LB: loop body
LE: loop exit
PB: predicated region body
PF: predicated region fallthrough
CT: control target
= control target key end

     0   :  { %s1150_s18 = smov 0   ;;  %s2047_s0 = inlined_call_operand.vmem [shape: f32[2,16,9,32], index: 0, kind: input, shape index: {}]   ;;  %s2048_s1 = inlined_call_operand.vmem [shape: f32[2,16,9,32], index: 1, kind: input, shape index: {}]   ;;  %s2049_s2 = inlined_call_operand.vmem [shape: f32[2,32], index: 2, kind: input, shape index: {}]   ;;  %s2050_s3 = inlined_call_operand.vmem [shape: f32[2,32], index: 3, kind: input, shape index: {}]   ;;  %s2051_s4 = inlined_call_operand.vmem [shape: f32[2,16,9,32], index: 4, kind: output, shape index: {0}]   ;;  %s2052_s5 = inlined_call_operand.vmem [shape: f32[2,16,9,32], index: 5, kind: output, shape index: {1}]  }
   0x1 LB: > { %s964_s19 = sadd.s32 4294967295, %s1118_s18   ;;  %p968_p0 = scmp.ge.s32.totalorder %s1118_s18, 1  ;;  %s1118_s18 = sphi %s1150_s18, %s16_s18  }
   0x2   : > { %p200_p1 = scmp.lt.s32.totalorder %s1118_s18, 3 }
   0x4   : > { %p201_p2 = pnand %p968_p0, %p200_p1 }
   0x6   : > { %204 = sbr.rel (%p201_p2) target bundleno = 363 (0x16b), region = 36 }
   0xd   : > { %p238_p3 = scmp.lt.s32.totalorder %s964_s19, 1  ;;  %vm642_vm7 = vcmask 261120   ;;  %vm644_vm8 = vcmask 253952  }
   0xf   : > { %s2084_s19 = smov (!%p238_p3, %s964_s19), 1 }
  0x10   : > { %s1158_s20 = sshll.u32 %s2084_s19, 8 }
  0x11   : > { %s1164_s23 = scalar_lea.vmem %s2047_s0, %s1158_s20  ;;  %s1188_s26 = scalar_lea.vmem %s2048_s1, %s1158_s20 }
  0x12   : > { %v258_v0 = vld [vmem:[%s1164_s23] sm:$0xff]  ;;  %v259_v1 = vld [vmem:[%s1164_s23 + $0x8] sm:$0x1]  ;;  %v260_v2 = vld [vmem:[%s1164_s23 + $0x10] sm:$0xff]  ;;  %s1780_s8 = scalar_lea.vmem %s2051_s4, %s1158_s20  ;;  %s1882_s11 = scalar_lea.vmem %s2052_s5, %s1158_s20 }
  0x13   : > { %v261_v3 = vld [vmem:[%s1164_s23 + $0x18] sm:$0x1]  ;;  %v262_v4 = vld [vmem:[%s1164_s23 + $0x20] sm:$0xff]  ;;  %v263_v5 = vld [vmem:[%s1164_s23 + $0x28] sm:$0x1]  ;;  %v1193_v21 = vmul.f32 %v258_v0, %v258_v0  ;;  %v1195_v22 = vmul.f32 %v259_v1, %v259_v1  ;;  %v1197_v23 = vmul.f32 %v260_v2, %v260_v2 }
  0x14   : > { %v264_v6 = vld [vmem:[%s1164_s23 + $0x30] sm:$0xff]  ;;  %v265_v7 = vld [vmem:[%s1164_s23 + $0x38] sm:$0x1]  ;;  %v266_v8 = vld [vmem:[%s1164_s23 + $0x40] sm:$0xff]  ;;  %v1202_v27 = vmul.f32 %v261_v3, %v261_v3  ;;  %v1204_v28 = vmul.f32 %v262_v4, %v262_v4  ;;  %v1206_v29 = vmul.f32 %v263_v5, %v263_v5 }
  0x15   : > { %v267_v9 = vld [vmem:[%s1164_s23 + $0x48] sm:$0x1]  ;;  %v268_v10 = vld [vmem:[%s1164_s23 + $0x50] sm:$0xff]  ;;  %v269_v11 = vld [vmem:[%s1164_s23 + $0x58] sm:$0x1]  ;;  %v1208_v30 = vmul.f32 %v264_v6, %v264_v6  ;;  %v1213_v34 = vmul.f32 %v265_v7, %v265_v7  ;;  %v1215_v35 = vmul.f32 %v266_v8, %v266_v8 }
  0x16   : > { %v270_v12 = vld [vmem:[%s1164_s23 + $0x60] sm:$0xff]  ;;  %v271_v13 = vld [vmem:[%s1164_s23 + $0x68] sm:$0x1]  ;;  %v272_v14 = vld [vmem:[%s1164_s23 + $0x70] sm:$0xff]  ;;  %v1217_v36 = vmul.f32 %v267_v9, %v267_v9  ;;  %v1219_v37 = vmul.f32 %v268_v10, %v268_v10  ;;  %v1224_v41 = vmul.f32 %v269_v11, %v269_v11 }
  0x17   : > { %v273_v15 = vld [vmem:[%s1164_s23 + $0x78] sm:$0x1]  ;;  %v274_v16 = vld [vmem:[%s1164_s23 + $0x80] sm:$0xff]  ;;  %v275_v17 = vld [vmem:[%s1164_s23 + $0x88] sm:$0x1]  ;;  %v1226_v42 = vmul.f32 %v270_v12, %v270_v12  ;;  %v1228_v43 = vmul.f32 %v271_v13, %v271_v13  ;;  %v1230_v44 = vmul.f32 %v272_v14, %v272_v14 }
  0x18   : > { %v276_v18 = vld [vmem:[%s1164_s23 + $0x90] sm:$0xff]  ;;  %v277_v19 = vld [vmem:[%s1164_s23 + $0x98] sm:$0x1]  ;;  %v278_v20 = vld [vmem:[%s1164_s23 + $0xa0] sm:$0xff]  ;;  %v1235_v48 = vmul.f32 %v273_v15, %v273_v15  ;;  %v1237_v49 = vmul.f32 %v274_v16, %v274_v16  ;;  %v1239_v50 = vmul.f32 %v275_v17, %v275_v17 }
  0x19   : > { %v279_v24 = vld [vmem:[%s1164_s23 + $0xa8] sm:$0x1]  ;;  %v280_v25 = vld [vmem:[%s1164_s23 + $0xb0] sm:$0xff]  ;;  %v281_v26 = vld [vmem:[%s1164_s23 + $0xb8] sm:$0x1]  ;;  %v1241_v51 = vmul.f32 %v276_v18, %v276_v18  ;;  %v1248_v55 = vmul.f32 %v277_v19, %v277_v19  ;;  %v1250_v56 = vmul.f32 %v278_v20, %v278_v20 }
  0x1a   : > { %v282_v31 = vld [vmem:[%s1164_s23 + $0xc0] sm:$0xff]  ;;  %v283_v32 = vld [vmem:[%s1164_s23 + $0xc8] sm:$0x1]  ;;  %v284_v33 = vld [vmem:[%s1164_s23 + $0xd0] sm:$0xff]  ;;  %v1252_v57 = vmul.f32 %v279_v24, %v279_v24  ;;  %v1254_v58 = vmul.f32 %v280_v25, %v280_v25  ;;  %v1259_v62 = vmul.f32 %v281_v26, %v281_v26 }
  0x1b   : > { %v285_v38 = vld [vmem:[%s1164_s23 + $0xd8] sm:$0x1]  ;;  %v286_v39 = vld [vmem:[%s1164_s23 + $0xe0] sm:$0xff]  ;;  %v287_v45 = vld [vmem:[%s1164_s23 + $0xe8] sm:$0x1]  ;;  %v1261_v63 = vmul.f32 %v282_v31, %v282_v31  ;;  %v1263_v0 = vmul.f32 %v283_v32, %v283_v32  ;;  %v1268_v5 = vmul.f32 %v284_v33, %v284_v33 }
  0x1c   : > { %v290_v40 = vld [vmem:[%s1188_s26] sm:$0xff]  ;;  %v288_v46 = vld [vmem:[%s1164_s23 + $0xf0] sm:$0xff]  ;;  %v291_v47 = vld [vmem:[%s1188_s26 + $0x8] sm:$0x1]  ;;  %v1270_v6 = vmul.f32 %v285_v38, %v285_v38  ;;  %v1272_v7 = vmul.f32 %v286_v39, %v286_v39  ;;  %v1277_v12 = vmul.f32 %v287_v45, %v287_v45 }
  0x1d   : > { %v1244_v52 = vld [vmem:[%s1164_s23 + $0xf8] sm:$0x1]  ;;  %v292_v53 = vld [vmem:[%s1188_s26 + $0x10] sm:$0xff]  ;;  %v294_v59 = vld [vmem:[%s1188_s26 + $0x20] sm:$0xff]  ;;  %v354_v1 = vmul.f32 %v290_v40, %v290_v40  ;;  %v355_v8 = vmul.f32 %v291_v47, %v291_v47  ;;  %v1279_v13 = vmul.f32 %v288_v46, %v288_v46 }
  0x1e   : > { %2061 = vst [vmem:[#allocation2_spill] sm:$0xff] %v1244_v52  ;;  %v293_v54 = vld [vmem:[%s1188_s26 + $0x18] sm:$0x1]  ;;  %v295_v60 = vld [vmem:[%s1188_s26 + $0x28] sm:$0x1]  ;;  %v296_v61 = vld [vmem:[%s1188_s26 + $0x30] sm:$0xff]  ;;  %v1283_v14 = vmul.f32 %v1244_v52, %v1244_v52  ;;  %v356_v15 = vmul.f32 %v292_v53, %v292_v53  ;;  %v358_v20 = vmul.f32 %v294_v59, %v294_v59 }
  0x1f   : > { %v297_v2 = vld [vmem:[%s1188_s26 + $0x38] sm:$0x1]  ;;  %v298_v3 = vld [vmem:[%s1188_s26 + $0x40] sm:$0xff]  ;;  %v299_v4 = vld [vmem:[%s1188_s26 + $0x48] sm:$0x1]  ;;  %2062 = vst [vmem:[#allocation3_spill] sm:$0xff] %v1279_v13  ;;  %v357_v19 = vmul.f32 %v293_v54, %v293_v54  ;;  %v359_v24 = vmul.f32 %v295_v60, %v295_v60  ;;  %v360_v25 = vmul.f32 %v296_v61, %v296_v61  ;;  %v1292_v40 = vadd.f32 %v354_v1, %v1193_v21 }
  0x20   : > { %v300_v9 = vld [vmem:[%s1188_s26 + $0x50] sm:$0xff]  ;;  %v301_v10 = vld [vmem:[%s1188_s26 + $0x58] sm:$0x1]  ;;  %v302_v11 = vld [vmem:[%s1188_s26 + $0x60] sm:$0xff]  ;;  %2063 = vst [vmem:[#allocation4_spill] sm:$0xff] %v1283_v14  ;;  %v361_v33 = vmul.f32 %v297_v2, %v297_v2  ;;  %v362_v38 = vmul.f32 %v298_v3, %v298_v3  ;;  %v363_v39 = vmul.f32 %v299_v4, %v299_v4  ;;  %v1300_v60 = vadd.f32 %v355_v8, %v1195_v22 }
  0x21   : > { %v303_v16 = vld [vmem:[%s1188_s26 + $0x68] sm:$0x1]  ;;  %v304_v17 = vld [vmem:[%s1188_s26 + $0x70] sm:$0xff]  ;;  %v305_v18 = vld [vmem:[%s1188_s26 + $0x78] sm:$0x1]  ;;  %v364_v53 = vmul.f32 %v300_v9, %v300_v9  ;;  %v365_v54 = vmul.f32 %v301_v10, %v301_v10  ;;  %v366_v59 = vmul.f32 %v302_v11, %v302_v11  ;;  %v1309_v4 = vadd.f32 %v356_v15, %v1197_v23 }
  0x22   : > { %v306_v26 = vld [vmem:[%s1188_s26 + $0x80] sm:$0xff]  ;;  %v307_v31 = vld [vmem:[%s1188_s26 + $0x88] sm:$0x1]  ;;  %v308_v32 = vld [vmem:[%s1188_s26 + $0x90] sm:$0xff]  ;;  %v367_v3 = vmul.f32 %v303_v16, %v303_v16  ;;  %v368_v21 = vmul.f32 %v304_v17, %v304_v17  ;;  %v369_v1 = vmul.f32 %v305_v18, %v305_v18  ;;  %v1318_v52 = vadd.f32 %v357_v19, %v1202_v27 }
  0x23   : > { %v1295_v45 = vld [vmem:[%s1188_s26 + $0x98] sm:$0x1]  ;;  %v310_v46 = vld [vmem:[%s1188_s26 + $0xa0] sm:$0xff]  ;;  %v311_v47 = vld [vmem:[%s1188_s26 + $0xa8] sm:$0x1]  ;;  %v370_v11 = vmul.f32 %v306_v26, %v306_v26  ;;  %v371_v22 = vmul.f32 %v307_v31, %v307_v31  ;;  %v372_v8 = vmul.f32 %v308_v32, %v308_v32  ;;  %v1329_v14 = vadd.f32 %v358_v20, %v1204_v28 }
  0x24   : > { %v1303_v61 = vld [vmem:[%s1188_s26 + $0xb0] sm:$0xff]  ;;  %v1306_v2 = vld [vmem:[%s1188_s26 + $0xb8] sm:$0x1]  ;;  %v1312_v9 = vld [vmem:[%s1188_s26 + $0xc0] sm:$0xff]  ;;  %v373_v18 = vmul.f32 %v1295_v45, %v1295_v45  ;;  %v374_v23 = vmul.f32 %v310_v46, %v310_v46  ;;  %v375_v15 = vmul.f32 %v311_v47, %v311_v47  ;;  %v1345_v32 = vadd.f32 %v359_v24, %v1206_v29 }
  0x25   : > { %2064 = vst [vmem:[#allocation5_spill] sm:$0xff] %v1306_v2  ;;  %2065 = vst [vmem:[#allocation6_spill] sm:$0xff] %v1312_v9  ;;  %v1315_v10 = vld [vmem:[%s1188_s26 + $0xc8] sm:$0x1]  ;;  %v1321_v16 = vld [vmem:[%s1188_s26 + $0xd0] sm:$0xff]  ;;  %v376_v27 = vmul.f32 %v1303_v61, %v1303_v61  ;;  %v377_v19 = vmul.f32 %v1306_v2, %v1306_v2  ;;  %992 = vrsqrt.f32 %v1292_v40  ;;  %v378_v28 = vmul.f32 %v1312_v9, %v1312_v9 }
  0x26   : > { %2066 = vst [vmem:[#allocation7_spill] sm:$0xff] %v1321_v16  ;;  %v1324_v17 = vld [vmem:[%s1188_s26 + $0xd8] sm:$0x1]  ;;  %v1332_v13 = vld [vmem:[%s1188_s26 + $0xe0] sm:$0xff]  ;;  %v1335_v26 = vld [vmem:[%s1188_s26 + $0xe8] sm:$0x1]  ;;  %v379_v20 = vmul.f32 %v1315_v10, %v1315_v10  ;;  %v1356_v47 = vadd.f32 %v360_v25, %v1208_v30  ;;  %994 = vrsqrt.f32 %v1300_v60  ;;  %v380_v2 = vmul.f32 %v1321_v16, %v1321_v16 }
  0x27   : > { %2067 = vst [vmem:[#allocation8_spill] sm:$0xff] %v1324_v17  ;;  %2068 = vst [vmem:[#allocation9_spill] sm:$0xff] %v1332_v13  ;;  %v1338_v31 = vld [vmem:[%s1188_s26 + $0xf0] sm:$0xff]  ;;  %v1349_v46 = vld [vmem:[%s1188_s26 + $0xf8] sm:$0x1]  ;;  %v381_v29 = vmul.f32 %v1324_v17, %v1324_v17  ;;  %v1364_v24 = vadd.f32 %v361_v33, %v1213_v34  ;;  %996 = vrsqrt.f32 %v1309_v4  ;;  %v382_v9 = vmul.f32 %v1332_v13, %v1332_v13 }
  0x28   : > { %2069 = vst [vmem:[#allocation10_spill] sm:$0xff] %v1335_v26  ;;  %2070 = vst [vmem:[#allocation11_spill] sm:$0xff] %v1338_v31  ;;  %v383_v30 = vmul.f32 %v1335_v26, %v1335_v26  ;;  %v384_v25 = vmul.f32 %v1338_v31, %v1338_v31  ;;  %998 = vrsqrt.f32 %v1318_v52  ;;  %v385_v16 = vmul.f32 %v1349_v46, %v1349_v46 }
  0x29   : > { %v1377_v17 = vadd.f32 %v362_v38, %v1215_v35  ;;  %v1380_v34 = vadd.f32 %v363_v39, %v1217_v36  ;;  %v1383_v33 = vadd.f32 %v364_v53, %v1219_v37  ;;  %v1386_v13 = vadd.f32 %v365_v54, %v1224_v41 }
  0x2a   : > { %v1389_v26 = vadd.f32 %v366_v59, %v1226_v42  ;;  %v1392_v31 = vadd.f32 %v367_v3, %v1228_v43  ;;  %1000 = vrsqrt.f32 %v1329_v14  ;;  %v1396_v35 = vadd.f32 %v368_v21, %v1230_v44 }
  0x2b   : > { %v1399_v36 = vadd.f32 %v369_v1, %v1235_v48  ;;  %v1402_v37 = vadd.f32 %v370_v11, %v1237_v49  ;;  %v1405_v41 = vadd.f32 %v371_v22, %v1239_v50  ;;  %v1408_v42 = vadd.f32 %v372_v8, %v1241_v51 }
  0x2c   : > { %v1411_v43 = vadd.f32 %v373_v18, %v1248_v55  ;;  %v1414_v38 = vadd.f32 %v374_v23, %v1250_v56  ;;  %1002 = vrsqrt.f32 %v1345_v32  ;;  %v1418_v44 = vadd.f32 %v375_v15, %v1252_v57 }
  0x2d   : > { %v1421_v48 = vadd.f32 %v376_v27, %v1254_v58  ;;  %v1424_v49 = vadd.f32 %v377_v19, %v1259_v62  ;;  %v1427_v50 = vadd.f32 %v378_v28, %v1261_v63  ;;  %v1430_v51 = vadd.f32 %v379_v20, %v1263_v0  ;;  %v2071_v63 = vld [vmem:[#allocation3_spill] sm:$0xff]  ;;  %v2072_v0 = vld [vmem:[#allocation4_spill] sm:$0xff] }
  0x2e   : > { %v1433_v55 = vadd.f32 %v380_v2, %v1268_v5  ;;  %v1436_v56 = vadd.f32 %v381_v29, %v1270_v6  ;;  %1004 = vrsqrt.f32 %v1356_v47  ;;  %v1440_v58 = vadd.f32 %v382_v9, %v1272_v7 }
  0x2f   : > { %v993_v57 = vpop.eup %992  ;;  %v1443_v62 = vadd.f32 %v383_v30, %v1277_v12  ;;  %v1446_v39 = vadd.f32 %v384_v25, %v2071_v63  ;;  %v1449_v53 = vadd.f32 %v385_v16, %v2072_v0  ;;  %vm420_vm0 = vcmp.eq.f32.partialorder %v1292_v40, inf }
  0x30   : > { %v995_v5 = vpop.eup %994  ;;  %vm422_vm1 = vcmp.eq.f32.partialorder %v1292_v40, 0.0  ;;  %v423_v6 = vand.u32 2147483648, %v1292_v40  ;;  %1006 = vrsqrt.f32 %v1364_v24  ;;  %vm427_vm2 = vcmp.eq.f32.partialorder %v1300_v60, inf }
  0x31   : > { %v997_v7 = vpop.eup %996  ;;  %vm429_vm3 = vcmp.eq.f32.partialorder %v1300_v60, 0.0  ;;  %v430_v12 = vand.u32 2147483648, %v1300_v60  ;;  %vm434_vm4 = vcmp.eq.f32.partialorder %v1309_v4, inf  ;;  %vm436_vm5 = vcmp.eq.f32.partialorder %v1309_v4, 0.0 }
  0x32   : > { %v999_v54 = vpop.eup %998  ;;  %v437_v59 = vand.u32 2147483648, %v1309_v4  ;;  %vm441_vm6 = vcmp.eq.f32.partialorder %v1318_v52, inf  ;;  %1008 = vrsqrt.f32 %v1377_v17  ;;  %v419_v2 = vmul.f32 %v993_v57, %v1292_v40 }
  0x33   : > { %v426_v3 = vmul.f32 %v995_v5, %v1300_v60  ;;  %vm443_vm9 = vcmp.eq.f32.partialorder %v1318_v52, 0.0  ;;  %v444_v21 = vand.u32 2147483648, %v1318_v52  ;;  %v433_v9 = vmul.f32 %v997_v7, %v1309_v4 }
  0x34   : > { %v1001_v1 = vpop.eup %1000  ;;  %vm448_vm10 = vcmp.eq.f32.partialorder %v1329_v14, inf  ;;  %vm450_vm11 = vcmp.eq.f32.partialorder %v1329_v14, 0.0  ;;  %1010 = vrsqrt.f32 %v1380_v34  ;;  %v440_v11 = vmul.f32 %v999_v54, %v1318_v52 }
  0x35   : > { %v451_v22 = vand.u32 2147483648, %v1329_v14  ;;  %vm455_vm12 = vcmp.eq.f32.partialorder %v1345_v32, inf  ;;  %1012 = vrsqrt.f32 %v1383_v33  ;;  %v458_v16 = vand.u32 2147483648, %v1345_v32 }
  0x36   : > { %v1003_v8 = vpop.eup %1002  ;;  %vm462_vm14 = vcmp.eq.f32.partialorder %v1356_v47, inf  ;;  %1014 = vrsqrt.f32 %v1386_v13  ;;  %v421_v18 = vsel %vm420_vm0, %v1292_v40, %v419_v2  ;;  %v428_v23 = vsel %vm427_vm2, %v1300_v60, %v426_v3 }
  0x37   : > { %v447_v15 = vmul.f32 %v1001_v1, %v1329_v14  ;;  %vm464_vm15 = vcmp.eq.f32.partialorder %v1356_v47, 0.0  ;;  %1016 = vrsqrt.f32 %v1389_v26  ;;  %v435_v19 = vsel %vm434_vm4, %v1309_v4, %v433_v9 }
  0x38   : > { %v1005_v27 = vpop.eup %1004  ;;  %v465_v28 = vand.u32 2147483648, %v1356_v47  ;;  %vm469_vm13 = vcmp.eq.f32.partialorder %v1364_v24, inf  ;;  %v472_v20 = vand.u32 2147483648, %v1364_v24  ;;  %v442_v29 = vsel %vm441_vm6, %v1318_v52, %v440_v11 }
  0x39   : > { %v454_v30 = vmul.f32 %v1003_v8, %v1345_v32  ;;  %vm471_vm0 = vcmp.eq.f32.partialorder %v1364_v24, 0.0  ;;  %vm476_vm2 = vcmp.eq.f32.partialorder %v1377_v17, inf  ;;  %v479_v25 = vand.u32 2147483648, %v1377_v17 }
  0x3a   : > { %v1007_v57 = vpop.eup %1006  ;;  %v424_v63 = vsel %vm422_vm1, %v423_v6, %v421_v18  ;;  %v431_v0 = vsel %vm429_vm3, %v430_v12, %v428_v23  ;;  %vm483_vm4 = vcmp.eq.f32.partialorder %v1380_v34, inf  ;;  %v486_v5 = vand.u32 2147483648, %v1380_v34 }
  0x3b   : > { %1018 = vrsqrt.f32 %v1392_v31  ;;  %v438_v7 = vsel %vm436_vm5, %v437_v59, %v435_v19  ;;  %v449_v54 = vsel %vm448_vm10, %v1329_v14, %v447_v15  ;;  %v461_v2 = vmul.f32 %v1005_v27, %v1356_v47 }
  0x3c   : > { %vm478_vm1 = vcmp.eq.f32.partialorder %v1377_v17, 0.0  ;;  %vm490_vm6 = vcmp.eq.f32.partialorder %v1383_v33, inf  ;;  %v1009_v40 = vpop.eup %1008  ;;  %v445_v60 = vsel %vm443_vm9, %v444_v21, %v442_v29  ;;  %v493_v6 = vand.u32 2147483648, %v1383_v33 }
  0x3d   : > { %vm497_vm3 = vcmp.eq.f32.partialorder %v1386_v13, inf  ;;  %v500_v4 = vand.u32 2147483648, %v1386_v13  ;;  %v456_v12 = vsel %vm455_vm12, %v1345_v32, %v454_v30  ;;  %v468_v59 = vmul.f32 %v1007_v57, %v1364_v24 }
  0x3e   : > { %vm485_vm5 = vcmp.eq.f32.partialorder %v1380_v34, 0.0  ;;  %v643_v3 = vsel %vm642_vm7, %v424_v63, 0.0  ;;  %v645_v1 = vsel %vm644_vm8, %v431_v0, 0.0  ;;  %v1011_v52 = vpop.eup %1010  ;;  %v452_v21 = vsel %vm450_vm11, %v451_v22, %v449_v54 }
  0x3f   : > { %1020 = vrsqrt.f32 %v1396_v35  ;;  %v646_v9 = vadd.f32 %v645_v1, %v643_v3  ;;  %v647_v11 = vsel %vm642_vm7, %v438_v7, 0.0  ;;  %v1013_v8 = vpop.eup %1012  ;;  %v463_v18 = vsel %vm462_vm14, %v1356_v47, %v461_v2 }
  0x40   : > { %v475_v23 = vmul.f32 %v1009_v40, %v1377_v17  ;;  %vm499_vm10 = vcmp.eq.f32.partialorder %v1386_v13, 0.0  ;;  %vm504_vm12 = vcmp.eq.f32.partialorder %v1389_v26, inf  ;;  %v649_v14 = vsel %vm644_vm8, %v445_v60, 0.0  ;;  %v1015_v22 = vpop.eup %1014 }
  0x41   : > { %vm2073_vm11 = vcmp.eq.f32.partialorder %v1345_v32, 0.0  ;;  %vm506_vm9 = vcmp.eq.f32.partialorder %v1389_v26, 0.0  ;;  %v507_v27 = vand.u32 2147483648, %v1389_v26  ;;  %1022 = vrsqrt.f32 %v1399_v36  ;;  %v1017_v29 = vpop.eup %1016 }
  0x42   : > { %v459_v15 = vsel %vm2073_vm11, %v458_v16, %v456_v12  ;;  %v648_v19 = vadd.f32 %v647_v11, %v646_v9  ;;  %v470_v30 = vsel %vm469_vm13, %v1364_v24, %v468_v59  ;;  %v482_v57 = vmul.f32 %v1011_v52, %v1380_v34 }
  0x43   : > { %vm511_vm14 = vcmp.eq.f32.partialorder %v1392_v31, inf  ;;  %v651_v63 = vsel %vm642_vm7, %v452_v21, 0.0  ;;  %v466_v32 = vsel %vm464_vm15, %v465_v28, %v463_v18  ;;  %v489_v16 = vmul.f32 %v1013_v8, %v1383_v33 }
  0x44   : > { %1024 = vrsqrt.f32 %v1402_v37  ;;  %v650_v0 = vadd.f32 %v649_v14, %v648_v19  ;;  %v477_v7 = vsel %vm476_vm2, %v1377_v17, %v475_v23  ;;  %v496_v54 = vmul.f32 %v1015_v22, %v1386_v13 }
  0x45   : > { %vm513_vm13 = vcmp.eq.f32.partialorder %v1392_v31, 0.0  ;;  %v653_v2 = vsel %vm644_vm8, %v459_v15, 0.0  ;;  %v1019_v40 = vpop.eup %1018  ;;  %v473_v47 = vsel %vm471_vm0, %v472_v20, %v470_v30  ;;  %v503_v28 = vmul.f32 %v1017_v29, %v1389_v26 }
  0x46   : > { %1026 = vrsqrt.f32 %v1405_v41  ;;  %v652_v60 = vadd.f32 %v651_v63, %v650_v0  ;;  %v484_v12 = vsel %vm483_vm4, %v1380_v34, %v482_v57  ;;  %v514_v59 = vand.u32 2147483648, %v1392_v31 }
  0x47   : > { %vm518_vm15 = vcmp.eq.f32.partialorder %v1396_v35, inf  ;;  %v655_v3 = vsel %vm642_vm7, %v466_v32, 0.0  ;;  %v480_v24 = vsel %vm478_vm1, %v479_v25, %v477_v7  ;;  %v491_v20 = vsel %vm490_vm6, %v1383_v33, %v489_v16 }
  0x48   : > { %1028 = vrsqrt.f32 %v1408_v42  ;;  %v654_v1 = vadd.f32 %v653_v2, %v652_v60  ;;  %v498_v52 = vsel %vm497_vm3, %v1386_v13, %v496_v54  ;;  %v510_v21 = vmul.f32 %v1019_v40, %v1392_v31 }
  0x49   : > { %vm520_vm0 = vcmp.eq.f32.partialorder %v1396_v35, 0.0  ;;  %v521_v9 = vand.u32 2147483648, %v1396_v35  ;;  %v657_v17 = vsel %vm644_vm8, %v473_v47, 0.0  ;;  %v1021_v25 = vpop.eup %1020  ;;  %v487_v11 = vsel %vm485_vm5, %v486_v5, %v484_v12 }
  0x4a   : > { %v505_v8 = vsel %vm504_vm12, %v1389_v26, %v503_v28  ;;  %1030 = vrsqrt.f32 %v1411_v43  ;;  %v656_v18 = vadd.f32 %v655_v3, %v654_v1  ;;  %vm2074_vm2 = vcmp.eq.f32.partialorder %v1383_v33, 0.0 }
  0x4b   : > { %v494_v23 = vsel %vm2074_vm2, %v493_v6, %v491_v20  ;;  %vm525_vm4 = vcmp.eq.f32.partialorder %v1399_v36, inf  ;;  %vm527_vm1 = vcmp.eq.f32.partialorder %v1399_v36, 0.0  ;;  %v659_v14 = vsel %vm642_vm7, %v480_v24, 0.0  ;;  %v1023_v34 = vpop.eup %1022 }
  0x4c   : > { %v501_v5 = vsel %vm499_vm10, %v500_v4, %v498_v52  ;;  %v528_v22 = vand.u32 2147483648, %v1399_v36  ;;  %1032 = vrsqrt.f32 %v1414_v38  ;;  %v658_v15 = vadd.f32 %v657_v17, %v656_v18 }
  0x4d   : > { %v508_v33 = vsel %vm506_vm9, %v507_v27, %v505_v8  ;;  %v512_v6 = vsel %vm511_vm14, %v1392_v31, %v510_v21  ;;  %v517_v19 = vmul.f32 %v1021_v25, %v1396_v35  ;;  %v661_v29 = vsel %vm644_vm8, %v487_v11, 0.0 }
  0x4e   : > { %v1025_v30 = vpop.eup %1024  ;;  %vm532_vm6 = vcmp.eq.f32.partialorder %v1402_v37, inf  ;;  %vm534_vm3 = vcmp.eq.f32.partialorder %v1402_v37, 0.0  ;;  %1034 = vrsqrt.f32 %v1418_v44  ;;  %v660_v13 = vadd.f32 %v659_v14, %v658_v15 }
  0x4f   : > { %v524_v4 = vmul.f32 %v1023_v34, %v1399_v36  ;;  %v535_v26 = vand.u32 2147483648, %v1402_v37  ;;  %vm539_vm5 = vcmp.eq.f32.partialorder %v1405_v41, inf  ;;  %v663_v27 = vsel %vm642_vm7, %v494_v23, 0.0 }
  0x50   : > { %v1027_v57 = vpop.eup %1026  ;;  %v515_v63 = vsel %vm513_vm13, %v514_v59, %v512_v6  ;;  %vm541_vm9 = vcmp.eq.f32.partialorder %v1405_v41, 0.0  ;;  %1036 = vrsqrt.f32 %v1421_v48  ;;  %v662_v32 = vadd.f32 %v661_v29, %v660_v13 }
  0x51   : > { %v519_v16 = vsel %vm518_vm15, %v1396_v35, %v517_v19  ;;  %v531_v0 = vmul.f32 %v1025_v30, %v1402_v37  ;;  %v542_v7 = vand.u32 2147483648, %v1405_v41  ;;  %v665_v54 = vsel %vm644_vm8, %v501_v5, 0.0 }
  0x52   : > { %v1029_v2 = vpop.eup %1028  ;;  %vm546_vm10 = vcmp.eq.f32.partialorder %v1408_v42, inf  ;;  %vm548_vm12 = vcmp.eq.f32.partialorder %v1408_v42, 0.0  ;;  %1038 = vrsqrt.f32 %v1424_v49  ;;  %v664_v31 = vadd.f32 %v663_v27, %v662_v32 }
  0x53   : > { %v526_v40 = vsel %vm525_vm4, %v1399_v36, %v524_v4  ;;  %v538_v47 = vmul.f32 %v1027_v57, %v1405_v41  ;;  %v549_v28 = vand.u32 2147483648, %v1408_v42  ;;  %v667_v60 = vsel %vm642_vm7, %v508_v33, 0.0 }
  0x54   : > { %v1031_v12 = vpop.eup %1030  ;;  %v522_v59 = vsel %vm520_vm0, %v521_v9, %v519_v16  ;;  %vm553_vm11 = vcmp.eq.f32.partialorder %v1411_v43, inf  ;;  %1040 = vrsqrt.f32 %v1427_v50  ;;  %v666_v3 = vadd.f32 %v665_v54, %v664_v31 }
  0x55   : > { %v533_v24 = vsel %vm532_vm6, %v1402_v37, %v531_v0  ;;  %v545_v20 = vmul.f32 %v1029_v2, %v1408_v42  ;;  %vm555_vm14 = vcmp.eq.f32.partialorder %v1411_v43, 0.0  ;;  %v669_v1 = vsel %vm644_vm8, %v515_v63, 0.0 }
  0x56   : > { %v1033_v52 = vpop.eup %1032  ;;  %v529_v35 = vsel %vm527_vm1, %v528_v22, %v526_v40  ;;  %v556_v21 = vand.u32 2147483648, %v1411_v43  ;;  %1042 = vrsqrt.f32 %v1430_v51  ;;  %v668_v9 = vadd.f32 %v667_v60, %v666_v3 }
  0x57   : > { %v540_v17 = vsel %vm539_vm5, %v1405_v41, %v538_v47  ;;  %v552_v25 = vmul.f32 %v1031_v12, %v1411_v43  ;;  %vm560_vm13 = vcmp.eq.f32.partialorder %v1414_v38, inf  ;;  %v671_v11 = vsel %vm642_vm7, %v522_v59, 0.0 }
  0x58   : > { %v1035_v8 = vpop.eup %1034  ;;  %v536_v36 = vsel %vm534_vm3, %v535_v26, %v533_v24  ;;  %vm562_vm15 = vcmp.eq.f32.partialorder %v1414_v38, 0.0  ;;  %1044 = vrsqrt.f32 %v1433_v55  ;;  %v670_v18 = vadd.f32 %v669_v1, %v668_v9 }
  0x59   : > { %v547_v23 = vsel %vm546_vm10, %v1408_v42, %v545_v20  ;;  %v559_v14 = vmul.f32 %v1033_v52, %v1414_v38  ;;  %v563_v34 = vand.u32 2147483648, %v1414_v38  ;;  %v673_v5 = vsel %vm644_vm8, %v529_v35, 0.0 }
  0x5a   : > { %v1037_v22 = vpop.eup %1036  ;;  %v543_v37 = vsel %vm541_vm9, %v542_v7, %v540_v17  ;;  %vm567_vm0 = vcmp.eq.f32.partialorder %v1418_v44, inf  ;;  %1046 = vrsqrt.f32 %v1436_v56  ;;  %v672_v15 = vadd.f32 %v671_v11, %v670_v18 }
  0x5b   : > { %v554_v33 = vsel %vm553_vm11, %v1411_v43, %v552_v25  ;;  %v566_v6 = vmul.f32 %v1035_v8, %v1418_v44  ;;  %vm569_vm2 = vcmp.eq.f32.partialorder %v1418_v44, 0.0  ;;  %v675_v19 = vsel %vm642_vm7, %v536_v36, 0.0 }
  0x5c   : > { %v1039_v29 = vpop.eup %1038  ;;  %v550_v41 = vsel %vm548_vm12, %v549_v28, %v547_v23  ;;  %v570_v30 = vand.u32 2147483648, %v1418_v44  ;;  %1048 = vrsqrt.f32 %v1440_v58  ;;  %v674_v13 = vadd.f32 %v673_v5, %v672_v15 }
  0x5d   : > { %v561_v4 = vsel %vm560_vm13, %v1414_v38, %v559_v14  ;;  %v573_v26 = vmul.f32 %v1037_v22, %v1421_v48  ;;  %vm574_vm4 = vcmp.eq.f32.partialorder %v1421_v48, inf  ;;  %v677_v27 = vsel %vm644_vm8, %v543_v37, 0.0 }
  0x5e   : > { %v1041_v57 = vpop.eup %1040  ;;  %v557_v42 = vsel %vm555_vm14, %v556_v21, %v554_v33  ;;  %vm576_vm1 = vcmp.eq.f32.partialorder %v1421_v48, 0.0  ;;  %1050 = vrsqrt.f32 %v1443_v62  ;;  %v676_v63 = vadd.f32 %v675_v19, %v674_v13 }
  0x5f   : > { %v568_v32 = vsel %vm567_vm0, %v1418_v44, %v566_v6  ;;  %v577_v16 = vand.u32 2147483648, %v1421_v48  ;;  %v580_v0 = vmul.f32 %v1039_v29, %v1424_v49  ;;  %v679_v7 = vsel %vm642_vm7, %v550_v41, 0.0 }
  0x60   : > { %v1043_v54 = vpop.eup %1042  ;;  %v564_v43 = vsel %vm562_vm15, %v563_v34, %v561_v4  ;;  %vm581_vm6 = vcmp.eq.f32.partialorder %v1424_v49, inf  ;;  %1052 = vrsqrt.f32 %v1446_v39  ;;  %v678_v2 = vadd.f32 %v677_v27, %v676_v63 }
  0x61   : > { %v575_v31 = vsel %vm574_vm4, %v1421_v48, %v573_v26  ;;  %v584_v40 = vand.u32 2147483648, %v1424_v49  ;;  %v587_v47 = vmul.f32 %v1041_v57, %v1427_v50  ;;  %v681_v28 = vsel %vm644_vm8, %v557_v42, 0.0 }
  0x62   : > { %v1045_v60 = vpop.eup %1044  ;;  %v571_v38 = vsel %vm569_vm2, %v570_v30, %v568_v32  ;;  %vm588_vm3 = vcmp.eq.f32.partialorder %v1427_v50, inf  ;;  %1054 = vrsqrt.f32 %v1449_v53  ;;  %v680_v12 = vadd.f32 %v679_v7, %v678_v2 }
  0x63   : > { %v582_v59 = vsel %vm581_vm6, %v1424_v49, %v580_v0  ;;  %vm583_vm5 = vcmp.eq.f32.partialorder %v1424_v49, 0.0  ;;  %v594_v3 = vmul.f32 %v1043_v54, %v1430_v51  ;;  %v683_v24 = vsel %vm642_vm7, %v564_v43, 0.0 }
  0x64   : > { %v1047_v20 = vpop.eup %1046  ;;  %v578_v1 = vsel %vm576_vm1, %v577_v16, %v575_v31  ;;  %v591_v44 = vand.u32 2147483648, %v1427_v50  ;;  %vm595_vm9 = vcmp.eq.f32.partialorder %v1430_v51, inf  ;;  %v682_v52 = vadd.f32 %v681_v28, %v680_v12 }
  0x65   : > { %v589_v35 = vsel %vm588_vm3, %v1427_v50, %v587_v47  ;;  %vm590_vm10 = vcmp.eq.f32.partialorder %v1427_v50, 0.0  ;;  %v601_v21 = vmul.f32 %v1045_v60, %v1433_v55  ;;  %v685_v49 = vsel %vm644_vm8, %v571_v38, 0.0 }
  0x66   : > { %v1049_v9 = vpop.eup %1048  ;;  %v585_v17 = vsel %vm583_vm5, %v584_v40, %v582_v59  ;;  %v598_v25 = vand.u32 2147483648, %v1430_v51  ;;  %vm602_vm12 = vcmp.eq.f32.partialorder %v1433_v55, inf  ;;  %v684_v48 = vadd.f32 %v683_v24, %v682_v52 }
  0x67   : > { %v596_v11 = vsel %vm595_vm9, %v1430_v51, %v594_v3  ;;  %vm597_vm11 = vcmp.eq.f32.partialorder %v1430_v51, 0.0  ;;  %v608_v8 = vmul.f32 %v1047_v20, %v1436_v56  ;;  %v687_v36 = vsel %vm642_vm7, %v578_v1, 0.0 }
  0x68   : > { %v1051_v50 = vpop.eup %1050  ;;  %v592_v18 = vsel %vm590_vm10, %v591_v44, %v589_v35  ;;  %v605_v23 = vand.u32 2147483648, %v1433_v55  ;;  %vm609_vm14 = vcmp.eq.f32.partialorder %v1436_v56, inf  ;;  %v686_v14 = vadd.f32 %v685_v49, %v684_v48 }
  0x69   : > { %v603_v34 = vsel %vm602_vm12, %v1433_v55, %v601_v21  ;;  %vm604_vm13 = vcmp.eq.f32.partialorder %v1433_v55, 0.0  ;;  %v615_v5 = vmul.f32 %v1049_v9, %v1440_v58  ;;  %v689_v22 = vsel %vm644_vm8, %v585_v17, 0.0  ;;  %v714_v9 = vld [vmem:[%s2049_s2] sm:$0x3] }
  0x6a   : > { %v1053_v51 = vpop.eup %1052  ;;  %v599_v37 = vsel %vm597_vm11, %v598_v25, %v596_v11  ;;  %v612_v15 = vand.u32 2147483648, %v1436_v56  ;;  %vm616_vm15 = vcmp.eq.f32.partialorder %v1440_v58, inf  ;;  %v688_v33 = vadd.f32 %v687_v36, %v686_v14 }
  0x6b   : > { %v610_v6 = vsel %vm609_vm14, %v1436_v56, %v608_v8  ;;  %vm611_vm0 = vcmp.eq.f32.partialorder %v1436_v56, 0.0  ;;  %v622_v19 = vmul.f32 %v1051_v50, %v1443_v62  ;;  %v691_v29 = vsel %vm642_vm7, %v592_v18, 0.0  ;;  %v721_v8 = vld [vmem:[%s2050_s3] sm:$0x3] }
  0x6c   : > { %v1055_v55 = vpop.eup %1054  ;;  %v606_v41 = vsel %vm604_vm13, %v605_v23, %v603_v34  ;;  %v619_v30 = vand.u32 2147483648, %v1440_v58  ;;  %vm623_vm2 = vcmp.eq.f32.partialorder %v1443_v62, inf  ;;  %v690_v13 = vadd.f32 %v689_v22, %v688_v33 }
  0x6d   : > { %v617_v4 = vsel %vm616_vm15, %v1440_v58, %v615_v5  ;;  %vm618_vm4 = vcmp.eq.f32.partialorder %v1440_v58, 0.0  ;;  %v629_v26 = vmul.f32 %v1053_v51, %v1446_v39  ;;  %v693_v27 = vsel %vm644_vm8, %v599_v37, 0.0 }
  0x6e   : > { %v613_v56 = vsel %vm611_vm0, %v612_v15, %v610_v6  ;;  %v626_v57 = vand.u32 2147483648, %v1443_v62  ;;  %vm630_vm1 = vcmp.eq.f32.partialorder %v1446_v39, inf  ;;  %v692_v42 = vadd.f32 %v691_v29, %v690_v13 }
  0x6f   : > { %v624_v63 = vsel %vm623_vm2, %v1443_v62, %v622_v19  ;;  %vm625_vm6 = vcmp.eq.f32.partialorder %v1443_v62, 0.0  ;;  %v636_v32 = vmul.f32 %v1055_v55, %v1449_v53  ;;  %v695_v16 = vsel %vm642_vm7, %v606_v41, 0.0  ;;  %v1060_v19 = vld [vmem:[%s1164_s23] sm:$0xff]  ;;  %v1061_v55 = vld [vmem:[%s1164_s23 + $0x8] sm:$0x1] }
  0x70   : > { %v620_v0 = vsel %vm618_vm4, %v619_v30, %v617_v4  ;;  %v633_v58 = vand.u32 2147483648, %v1446_v39  ;;  %vm637_vm3 = vcmp.eq.f32.partialorder %v1449_v53, inf  ;;  %v694_v7 = vadd.f32 %v693_v27, %v692_v42  ;;  %v1062_v30 = vld [vmem:[%s1164_s23 + $0x10] sm:$0xff]  ;;  %v1063_v4 = vld [vmem:[%s1164_s23 + $0x18] sm:$0x1]  ;;  %v1064_v27 = vld [vmem:[%s1164_s23 + $0x20] sm:$0xff] }
  0x71   : > { %v631_v54 = vsel %vm630_vm1, %v1446_v39, %v629_v26  ;;  %vm632_vm5 = vcmp.eq.f32.partialorder %v1446_v39, 0.0  ;;  %v697_v43 = vsel %vm644_vm8, %v613_v56, 0.0  ;;  %v627_v2 = vsel %vm625_vm6, %v626_v57, %v624_v63  ;;  %v1065_v57 = vld [vmem:[%s1164_s23 + $0x28] sm:$0x1]  ;;  %v1066_v63 = vld [vmem:[%s1164_s23 + $0x30] sm:$0xff] }
  0x72   : > { %v640_v31 = vand.u32 2147483648, %v1449_v53  ;;  %v696_v62 = vadd.f32 %v695_v16, %v694_v7  ;;  %v638_v40 = vsel %vm637_vm3, %v1449_v53, %v636_v32  ;;  %vm639_vm9 = vcmp.eq.f32.partialorder %v1449_v53, 0.0  ;;  %v1067_v16 = vld [vmem:[%s1164_s23 + $0x38] sm:$0x1] }
  0x73   : > { %v699_v47 = vsel %vm642_vm7, %v620_v0, 0.0  ;;  %v634_v28 = vsel %vm632_vm5, %v633_v58, %v631_v54  ;;  %v701_v38 = vsel %vm644_vm8, %v627_v2, 0.0  ;;  %vm716_vm10 = vcmask 254976   ;;  %v1068_v58 = vld [vmem:[%s1164_s23 + $0x40] sm:$0xff]  ;;  %v1069_v54 = vld [vmem:[%s1164_s23 + $0x48] sm:$0x1] }
  0x74   : > { %v698_v60 = vadd.f32 %v697_v43, %v696_v62  ;;  %v641_v12 = vsel %vm639_vm9, %v640_v31, %v638_v40  ;;  %v703_v39 = vsel %vm642_vm7, %v634_v28, 0.0  ;;  %v1070_v2 = vld [vmem:[%s1164_s23 + $0x50] sm:$0xff]  ;;  %v1071_v62 = vld [vmem:[%s1164_s23 + $0x58] sm:$0x1] }
  0x75   : > { %v705_v24 = vsel %vm644_vm8, %v641_v12, 0.0  ;;  %v1074_v12 = vld [vmem:[%s1164_s23 + $0x70] sm:$0xff] }
  0x76   : > { %v700_v59 = vadd.f32 %v699_v47, %v698_v60  ;;  %v1072_v47 = vld [vmem:[%s1164_s23 + $0x60] sm:$0xff]  ;;  %v1073_v60 = vld [vmem:[%s1164_s23 + $0x68] sm:$0x1] }
  0x78   : > { %v702_v3 = vadd.f32 %v701_v38, %v700_v59 }
  0x7a   : > { %v704_v20 = vadd.f32 %v703_v39, %v702_v3  ;;  %v1075_v39 = vld [vmem:[%s1164_s23 + $0x78] sm:$0x1] }
  0x7c   : > { %v706_v1 = vadd.f32 %v705_v24, %v704_v20  ;;  %v1076_v24 = vld [vmem:[%s1164_s23 + $0x80] sm:$0xff] }
  0x7e   : > { %v707_v44 = vrot.slane %v706_v1, 4 }
  0x80   : > { %v708_v52 = vadd.f32 %v707_v44, %v706_v1  ;;  %v1077_v1 = vld [vmem:[%s1164_s23 + $0x88] sm:$0x1] }
  0x82   : > { %v709_v35 = vrot.slane %v708_v52, 2 }
  0x84   : > { %v710_v21 = vadd.f32 %v709_v35, %v708_v52  ;;  %v1078_v52 = vld [vmem:[%s1164_s23 + $0x90] sm:$0xff] }
  0x86   : > { %v711_v53 = vrot.slane %v710_v21, 1 }
  0x88   : > { %v712_v49 = vadd.f32 %v711_v53, %v710_v21  ;;  %v1079_v21 = vld [vmem:[%s1164_s23 + $0x98] sm:$0x1] }
  0x8a   : > { %v713_v17 = vmul.f32 0.0069444445, %v712_v49  ;;  %v1080_v49 = vld [vmem:[%s1164_s23 + $0xa0] sm:$0xff] }
  0x8c   : > { %v715_v25 = vmul.f32 %v714_v9, %v713_v17  ;;  %v1081_v17 = vld [vmem:[%s1164_s23 + $0xa8] sm:$0x1] }
  0x8e   : > { %v717_v48 = vsel %vm716_vm10, %v715_v25, 0.0 }
  0x8f   : > { %718 = vadd.xlane.f32.xlu0 %v717_v48  ;;  %v1082_v48 = vld [vmem:[%s1164_s23 + $0xb0] sm:$0xff] }
 0x11c   : > { %v719_v11 = vpop.xlane.xlu0 %718 }
 0x11d   : > { %v720_v36 = vmax.f32 %v719_v11, 0.0 }
 0x11f   : > { %v722_v50 = vmul.f32 %v721_v8, %v720_v36  ;;  %v1083_v8 = vld [vmem:[%s1164_s23 + $0xb8] sm:$0x1] }
 0x121   : > { %v723_v18 = vsel %vm716_vm10, %v722_v50, 0.0  ;;  %v1084_v50 = vld [vmem:[%s1164_s23 + $0xc0] sm:$0xff] }
 0x122   : > { %v724_v23 = vrot.slane %v723_v18, 4 }
 0x124   : > { %v725_v14 = vadd.f32 %v724_v23, %v723_v18  ;;  %v1085_v23 = vld [vmem:[%s1164_s23 + $0xc8] sm:$0x1] }
 0x126   : > { %v726_v34 = vrot.slane %v725_v14, 2 }
 0x128   : > { %v727_v5 = vadd.f32 %v726_v34, %v725_v14  ;;  %v1086_v34 = vld [vmem:[%s1164_s23 + $0xd0] sm:$0xff] }
 0x12a   : > { %v728_v22 = vrot.slane %v727_v5, 1 }
 0x12c   : > { %v729_v51 = vadd.f32 %v728_v22, %v727_v5  ;;  %v1087_v22 = vld [vmem:[%s1164_s23 + $0xd8] sm:$0x1] }
 0x12e   : > { %v977_v37 = vmul.f32 -1.442695, %v729_v51 }
 0x130   : > { %1056 = vpow2.f32 %v977_v37  ;;  %v1088_v37 = vld [vmem:[%s1164_s23 + $0xe0] sm:$0xff] }
 0x13a   : > { %v1057_v15 = vpop.eup %1056 }
 0x13b   : > { %v733_v33 = vadd.f32 1.0, %v1057_v15 }
 0x13d   : > { %1058 = vrcp.f32 %v733_v33  ;;  %v1089_v33 = vld [vmem:[%s1164_s23 + $0xe8] sm:$0x1] }
 0x147   : > { %v1774_v6 = vpop.eup %1058 }
 0x148   : > { %v736_v29 = vmul.f32 %v1060_v19, %v1774_v6  ;;  %v737_v41 = vmul.f32 %v1061_v55, %v1774_v6  ;;  %v738_v13 = vmul.f32 %v1062_v30, %v1774_v6  ;;  %v739_v26 = vmul.f32 %v1063_v4, %v1774_v6 }
 0x149   : > { %v740_v56 = vmul.f32 %v1064_v27, %v1774_v6  ;;  %v741_v42 = vmul.f32 %v1065_v57, %v1774_v6  ;;  %v742_v32 = vmul.f32 %v1066_v63, %v1774_v6  ;;  %v743_v0 = vmul.f32 %v1067_v16, %v1774_v6 }
 0x14a   : > { %v744_v7 = vmul.f32 %v1068_v58, %v1774_v6  ;;  %v745_v43 = vmul.f32 %v1069_v54, %v1774_v6  ;;  %v746_v31 = vmul.f32 %v1070_v2, %v1774_v6  ;;  %v747_v40 = vmul.f32 %v1071_v62, %v1774_v6  ;;  %768 = vst.msk [vmem:[%s1780_s8] sm:$0xff] %vm642_vm7, %v736_v29  ;;  %v1090_v29 = vld [vmem:[%s1164_s23 + $0xf0] sm:$0xff] }
 0x14b   : > { %769 = vst.msk [vmem:[%s1780_s8 + $0x8] sm:$0x1] %vm644_vm8, %v737_v41  ;;  %771 = vst.msk [vmem:[%s1780_s8 + $0x18] sm:$0x1] %vm644_vm8, %v739_v26  ;;  %v748_v28 = vmul.f32 %v1072_v47, %v1774_v6  ;;  %v749_v38 = vmul.f32 %v1073_v60, %v1774_v6  ;;  %v750_v59 = vmul.f32 %v1074_v12, %v1774_v6  ;;  %v2075_v41 = vld [vmem:[#allocation2_spill] sm:$0xff] }
 0x14c   : > { %770 = vst.msk [vmem:[%s1780_s8 + $0x10] sm:$0xff] %vm642_vm7, %v738_v13  ;;  %v751_v3 = vmul.f32 %v1075_v39, %v1774_v6  ;;  %772 = vst.msk [vmem:[%s1780_s8 + $0x20] sm:$0xff] %vm642_vm7, %v740_v56  ;;  %v752_v20 = vmul.f32 %v1076_v24, %v1774_v6  ;;  %v753_v44 = vmul.f32 %v1077_v1, %v1774_v6  ;;  %v1091_v13 = vld [vmem:[%s1188_s26] sm:$0xff]  ;;  %v1092_v26 = vld [vmem:[%s1188_s26 + $0x8] sm:$0x1] }
 0x14d   : > { %773 = vst.msk [vmem:[%s1780_s8 + $0x28] sm:$0x1] %vm644_vm8, %v741_v42  ;;  %775 = vst.msk [vmem:[%s1780_s8 + $0x38] sm:$0x1] %vm644_vm8, %v743_v0  ;;  %v754_v35 = vmul.f32 %v1078_v52, %v1774_v6  ;;  %v755_v53 = vmul.f32 %v1079_v21, %v1774_v6  ;;  %v756_v9 = vmul.f32 %v1080_v49, %v1774_v6  ;;  %v1093_v56 = vld [vmem:[%s1188_s26 + $0x10] sm:$0xff] }
 0x14e   : > { %774 = vst.msk [vmem:[%s1780_s8 + $0x30] sm:$0xff] %vm642_vm7, %v742_v32  ;;  %776 = vst.msk [vmem:[%s1780_s8 + $0x40] sm:$0xff] %vm642_vm7, %v744_v7  ;;  %v757_v25 = vmul.f32 %v1081_v17, %v1774_v6  ;;  %v758_v11 = vmul.f32 %v1082_v48, %v1774_v6  ;;  %v759_v36 = vmul.f32 %v1083_v8, %v1774_v6  ;;  %v1094_v42 = vld [vmem:[%s1188_s26 + $0x18] sm:$0x1]  ;;  %v1095_v32 = vld [vmem:[%s1188_s26 + $0x20] sm:$0xff] }
 0x14f   : > { %777 = vst.msk [vmem:[%s1780_s8 + $0x48] sm:$0x1] %vm644_vm8, %v745_v43  ;;  %779 = vst.msk [vmem:[%s1780_s8 + $0x58] sm:$0x1] %vm644_vm8, %v747_v40  ;;  %v760_v18 = vmul.f32 %v1084_v50, %v1774_v6  ;;  %v761_v14 = vmul.f32 %v1085_v23, %v1774_v6  ;;  %v762_v5 = vmul.f32 %v1086_v34, %v1774_v6  ;;  %v1096_v0 = vld [vmem:[%s1188_s26 + $0x28] sm:$0x1] }
 0x150   : > { %778 = vst.msk [vmem:[%s1780_s8 + $0x50] sm:$0xff] %vm642_vm7, %v746_v31  ;;  %780 = vst.msk [vmem:[%s1780_s8 + $0x60] sm:$0xff] %vm642_vm7, %v748_v28  ;;  %v763_v51 = vmul.f32 %v1087_v22, %v1774_v6  ;;  %v764_v15 = vmul.f32 %v1088_v37, %v1774_v6  ;;  %v765_v19 = vmul.f32 %v1089_v33, %v1774_v6  ;;  %v1097_v7 = vld [vmem:[%s1188_s26 + $0x30] sm:$0xff]  ;;  %v1098_v43 = vld [vmem:[%s1188_s26 + $0x38] sm:$0x1] }
 0x151   : > { %781 = vst.msk [vmem:[%s1780_s8 + $0x68] sm:$0x1] %vm644_vm8, %v749_v38  ;;  %783 = vst.msk [vmem:[%s1780_s8 + $0x78] sm:$0x1] %vm644_vm8, %v751_v3  ;;  %v766_v55 = vmul.f32 %v1090_v29, %v1774_v6  ;;  %v767_v30 = vmul.f32 %v1774_v6, %v2075_v41  ;;  %v800_v4 = vmul.f32 %v1091_v13, %v1774_v6  ;;  %v1099_v31 = vld [vmem:[%s1188_s26 + $0x40] sm:$0xff]  ;;  %v1101_v28 = vld [vmem:[%s1188_s26 + $0x50] sm:$0xff] }
 0x152   : > { %782 = vst.msk [vmem:[%s1780_s8 + $0x70] sm:$0xff] %vm642_vm7, %v750_v59  ;;  %784 = vst.msk [vmem:[%s1780_s8 + $0x80] sm:$0xff] %vm642_vm7, %v752_v20  ;;  %v801_v27 = vmul.f32 %v1092_v26, %v1774_v6  ;;  %v802_v57 = vmul.f32 %v1093_v56, %v1774_v6  ;;  %v803_v63 = vmul.f32 %v1094_v42, %v1774_v6  ;;  %v1100_v40 = vld [vmem:[%s1188_s26 + $0x48] sm:$0x1]  ;;  %v1102_v38 = vld [vmem:[%s1188_s26 + $0x58] sm:$0x1] }
 0x153   : > { %785 = vst.msk [vmem:[%s1780_s8 + $0x88] sm:$0x1] %vm644_vm8, %v753_v44  ;;  %787 = vst.msk [vmem:[%s1780_s8 + $0x98] sm:$0x1] %vm644_vm8, %v755_v53  ;;  %v804_v16 = vmul.f32 %v1095_v32, %v1774_v6  ;;  %v805_v58 = vmul.f32 %v1096_v0, %v1774_v6  ;;  %v806_v54 = vmul.f32 %v1097_v7, %v1774_v6  ;;  %v1103_v59 = vld [vmem:[%s1188_s26 + $0x60] sm:$0xff]  ;;  %v1105_v20 = vld [vmem:[%s1188_s26 + $0x70] sm:$0xff] }
 0x154   : > { %786 = vst.msk [vmem:[%s1780_s8 + $0x90] sm:$0xff] %vm642_vm7, %v754_v35  ;;  %788 = vst.msk [vmem:[%s1780_s8 + $0xa0] sm:$0xff] %vm642_vm7, %v756_v9  ;;  %v807_v2 = vmul.f32 %v1098_v43, %v1774_v6  ;;  %v808_v62 = vmul.f32 %v1099_v31, %v1774_v6  ;;  %v809_v47 = vmul.f32 %v1100_v40, %v1774_v6  ;;  %v1104_v3 = vld [vmem:[%s1188_s26 + $0x68] sm:$0x1]  ;;  %v1106_v44 = vld [vmem:[%s1188_s26 + $0x78] sm:$0x1] }
 0x155   : > { %789 = vst.msk [vmem:[%s1780_s8 + $0xa8] sm:$0x1] %vm644_vm8, %v757_v25  ;;  %791 = vst.msk [vmem:[%s1780_s8 + $0xb8] sm:$0x1] %vm644_vm8, %v759_v36  ;;  %v810_v60 = vmul.f32 %v1101_v28, %v1774_v6  ;;  %v811_v12 = vmul.f32 %v1102_v38, %v1774_v6  ;;  %v812_v39 = vmul.f32 %v1103_v59, %v1774_v6  ;;  %v1107_v35 = vld [vmem:[%s1188_s26 + $0x80] sm:$0xff]  ;;  %v1109_v9 = vld [vmem:[%s1188_s26 + $0x90] sm:$0xff] }
 0x156   : > { %790 = vst.msk [vmem:[%s1780_s8 + $0xb0] sm:$0xff] %vm642_vm7, %v758_v11  ;;  %792 = vst.msk [vmem:[%s1780_s8 + $0xc0] sm:$0xff] %vm642_vm7, %v760_v18  ;;  %v813_v24 = vmul.f32 %v1104_v3, %v1774_v6  ;;  %v814_v1 = vmul.f32 %v1105_v20, %v1774_v6  ;;  %v815_v52 = vmul.f32 %v1106_v44, %v1774_v6  ;;  %v1108_v53 = vld [vmem:[%s1188_s26 + $0x88] sm:$0x1]  ;;  %v1110_v48 = vld [vmem:[%s1188_s26 + $0xa0] sm:$0xff] }
 0x157   : > { %793 = vst.msk [vmem:[%s1780_s8 + $0xc8] sm:$0x1] %vm644_vm8, %v761_v14  ;;  %795 = vst.msk [vmem:[%s1780_s8 + $0xd8] sm:$0x1] %vm644_vm8, %v763_v51  ;;  %v816_v21 = vmul.f32 %v1107_v35, %v1774_v6  ;;  %v817_v49 = vmul.f32 %v1108_v53, %v1774_v6  ;;  %v818_v17 = vmul.f32 %v1109_v9, %v1774_v6  ;;  %v1111_v8 = vld [vmem:[%s1188_s26 + $0xa8] sm:$0x1] }
 0x158   : > { %794 = vst.msk [vmem:[%s1780_s8 + $0xd0] sm:$0xff] %vm642_vm7, %v762_v5  ;;  %796 = vst.msk [vmem:[%s1780_s8 + $0xe0] sm:$0xff] %vm642_vm7, %v764_v15  ;;  %v819_v25 = vmul.f32 %v1774_v6, %v1295_v45  ;;  %v820_v11 = vmul.f32 %v1110_v48, %v1774_v6  ;;  %v821_v36 = vmul.f32 %v1111_v8, %v1774_v6  ;;  %v2076_v50 = vld [vmem:[#allocation5_spill] sm:$0xff]  ;;  %v2077_v23 = vld [vmem:[#allocation6_spill] sm:$0xff] }
 0x159   : > { %797 = vst.msk [vmem:[%s1780_s8 + $0xe8] sm:$0x1] %vm644_vm8, %v765_v19  ;;  %799 = vst.msk [vmem:[%s1780_s8 + $0xf8] sm:$0x1] %vm644_vm8, %v767_v30  ;;  %v822_v45 = vmul.f32 %v1774_v6, %v1303_v61  ;;  %v823_v18 = vmul.f32 %v1774_v6, %v2076_v50  ;;  %v824_v14 = vmul.f32 %v1774_v6, %v2077_v23  ;;  %v2078_v34 = vld [vmem:[#allocation7_spill] sm:$0xff]  ;;  %v2079_v22 = vld [vmem:[#allocation8_spill] sm:$0xff] }
 0x15a   : > { %798 = vst.msk [vmem:[%s1780_s8 + $0xf0] sm:$0xff] %vm642_vm7, %v766_v55  ;;  %832 = vst.msk [vmem:[%s1882_s11] sm:$0xff] %vm642_vm7, %v800_v4  ;;  %v825_v61 = vmul.f32 %v1774_v6, %v1315_v10  ;;  %v826_v5 = vmul.f32 %v1774_v6, %v2078_v34  ;;  %v827_v51 = vmul.f32 %v1774_v6, %v2079_v22  ;;  %v2080_v10 = vld [vmem:[#allocation9_spill] sm:$0xff]  ;;  %v2081_v15 = vld [vmem:[#allocation10_spill] sm:$0xff] }
 0x15b   : > { %833 = vst.msk [vmem:[%s1882_s11 + $0x8] sm:$0x1] %vm644_vm8, %v801_v27  ;;  %835 = vst.msk [vmem:[%s1882_s11 + $0x18] sm:$0x1] %vm644_vm8, %v803_v63  ;;  %v828_v37 = vmul.f32 %v1774_v6, %v2080_v10  ;;  %v829_v33 = vmul.f32 %v1774_v6, %v2081_v15  ;;  %v2082_v19 = vld [vmem:[#allocation11_spill] sm:$0xff]  ;;  %v831_v55 = vmul.f32 %v1774_v6, %v1349_v46 }
 0x15c   : > { %834 = vst.msk [vmem:[%s1882_s11 + $0x10] sm:$0xff] %vm642_vm7, %v802_v57  ;;  %836 = vst.msk [vmem:[%s1882_s11 + $0x20] sm:$0xff] %vm642_vm7, %v804_v16  ;;  %v830_v29 = vmul.f32 %v1774_v6, %v2082_v19 }
 0x15d   : > { %837 = vst.msk [vmem:[%s1882_s11 + $0x28] sm:$0x1] %vm644_vm8, %v805_v58  ;;  %839 = vst.msk [vmem:[%s1882_s11 + $0x38] sm:$0x1] %vm644_vm8, %v807_v2 }
 0x15e   : > { %838 = vst.msk [vmem:[%s1882_s11 + $0x30] sm:$0xff] %vm642_vm7, %v806_v54  ;;  %840 = vst.msk [vmem:[%s1882_s11 + $0x40] sm:$0xff] %vm642_vm7, %v808_v62 }
 0x15f   : > { %841 = vst.msk [vmem:[%s1882_s11 + $0x48] sm:$0x1] %vm644_vm8, %v809_v47  ;;  %843 = vst.msk [vmem:[%s1882_s11 + $0x58] sm:$0x1] %vm644_vm8, %v811_v12 }
 0x160   : > { %842 = vst.msk [vmem:[%s1882_s11 + $0x50] sm:$0xff] %vm642_vm7, %v810_v60  ;;  %844 = vst.msk [vmem:[%s1882_s11 + $0x60] sm:$0xff] %vm642_vm7, %v812_v39 }
 0x161   : > { %845 = vst.msk [vmem:[%s1882_s11 + $0x68] sm:$0x1] %vm644_vm8, %v813_v24  ;;  %847 = vst.msk [vmem:[%s1882_s11 + $0x78] sm:$0x1] %vm644_vm8, %v815_v52 }
 0x162   : > { %846 = vst.msk [vmem:[%s1882_s11 + $0x70] sm:$0xff] %vm642_vm7, %v814_v1  ;;  %848 = vst.msk [vmem:[%s1882_s11 + $0x80] sm:$0xff] %vm642_vm7, %v816_v21 }
 0x163   : > { %849 = vst.msk [vmem:[%s1882_s11 + $0x88] sm:$0x1] %vm644_vm8, %v817_v49  ;;  %851 = vst.msk [vmem:[%s1882_s11 + $0x98] sm:$0x1] %vm644_vm8, %v819_v25 }
 0x164   : > { %850 = vst.msk [vmem:[%s1882_s11 + $0x90] sm:$0xff] %vm642_vm7, %v818_v17  ;;  %852 = vst.msk [vmem:[%s1882_s11 + $0xa0] sm:$0xff] %vm642_vm7, %v820_v11 }
 0x165   : > { %853 = vst.msk [vmem:[%s1882_s11 + $0xa8] sm:$0x1] %vm644_vm8, %v821_v36  ;;  %855 = vst.msk [vmem:[%s1882_s11 + $0xb8] sm:$0x1] %vm644_vm8, %v823_v18 }
 0x166   : > { %854 = vst.msk [vmem:[%s1882_s11 + $0xb0] sm:$0xff] %vm642_vm7, %v822_v45  ;;  %856 = vst.msk [vmem:[%s1882_s11 + $0xc0] sm:$0xff] %vm642_vm7, %v824_v14 }
 0x167   : > { %857 = vst.msk [vmem:[%s1882_s11 + $0xc8] sm:$0x1] %vm644_vm8, %v825_v61  ;;  %859 = vst.msk [vmem:[%s1882_s11 + $0xd8] sm:$0x1] %vm644_vm8, %v827_v51 }
 0x168   : > { %858 = vst.msk [vmem:[%s1882_s11 + $0xd0] sm:$0xff] %vm642_vm7, %v826_v5  ;;  %860 = vst.msk [vmem:[%s1882_s11 + $0xe0] sm:$0xff] %vm642_vm7, %v828_v37 }
 0x169   : > { %861 = vst.msk [vmem:[%s1882_s11 + $0xe8] sm:$0x1] %vm644_vm8, %v829_v33  ;;  %863 = vst.msk [vmem:[%s1882_s11 + $0xf8] sm:$0x1] %vm644_vm8, %v831_v55 }
 0x16a   : > { %862 = vst.msk [vmem:[%s1882_s11 + $0xf0] sm:$0xff] %vm642_vm7, %v830_v29 }
 0x16b PF: > { %s16_s18 = sadd.s32 1, %s1118_s18  }
 0x16c   : > { %p13_p4 = scmp.ge.s32.totalorder %s16_s18, 4  }
 0x16e   :  { %15 = sbr.rel (!%p13_p4) target bundleno = 1 (0x1), region = 81 }

// kernel: reverse.1
= control target key start
LH: loop header
LB: loop body
LE: loop exit
PB: predicated region body
PF: predicated region fallthrough
CT: control target
= control target key end

     0   :  { %s344_s0 = inlined_call_operand.vmem [shape: f32[2,32,16,7], index: 0, kind: input, shape index: {}]   ;;  %s345_s1 = inlined_call_operand.vmem [shape: f32[2,32,16,7], index: 1, kind: output, shape index: {}]  }
   0x1   :  { %v112_v0 = vld [vmem:[%s344_s0 + $0x60] sm:$0xff]  ;;  %v113_v1 = vld [vmem:[%s344_s0 + $0xd0] sm:$0xff]  ;;  %v138_v14 = vld [vmem:[%s344_s0 + $0x68] sm:$0xff] }
   0x2   :  { %v115_v2 = vld [vmem:[%s344_s0 + $0x50] sm:$0xff]  ;;  %4 = vst [vmem:[%s345_s1] sm:$0xff] %v112_v0  ;;  %114 = vst [vmem:[%s345_s1 + $0x70] sm:$0xff] %v113_v1  ;;  %v117_v3 = vld [vmem:[%s344_s0 + $0xc0] sm:$0xff] }
   0x3   :  { %116 = vst [vmem:[%s345_s1 + $0x10] sm:$0xff] %v115_v2  ;;  %v119_v4 = vld [vmem:[%s344_s0 + $0x40] sm:$0xff]  ;;  %v121_v5 = vld [vmem:[%s344_s0 + $0xb0] sm:$0xff]  ;;  %118 = vst [vmem:[%s345_s1 + $0x80] sm:$0xff] %v117_v3 }
   0x4   :  { %120 = vst [vmem:[%s345_s1 + $0x20] sm:$0xff] %v119_v4  ;;  %122 = vst [vmem:[%s345_s1 + $0x90] sm:$0xff] %v121_v5  ;;  %v123_v6 = vld [vmem:[%s344_s0 + $0x30] sm:$0xff]  ;;  %v125_v7 = vld [vmem:[%s344_s0 + $0xa0] sm:$0xff] }
   0x5   :  { %v127_v8 = vld [vmem:[%s344_s0 + $0x20] sm:$0xff]  ;;  %124 = vst [vmem:[%s345_s1 + $0x30] sm:$0xff] %v123_v6  ;;  %126 = vst [vmem:[%s345_s1 + $0xa0] sm:$0xff] %v125_v7  ;;  %v129_v9 = vld [vmem:[%s344_s0 + $0x90] sm:$0xff] }
   0x6   :  { %128 = vst [vmem:[%s345_s1 + $0x40] sm:$0xff] %v127_v8  ;;  %v131_v10 = vld [vmem:[%s344_s0 + $0x10] sm:$0xff]  ;;  %v133_v11 = vld [vmem:[%s344_s0 + $0x80] sm:$0xff]  ;;  %130 = vst [vmem:[%s345_s1 + $0xb0] sm:$0xff] %v129_v9 }
   0x7   :  { %132 = vst [vmem:[%s345_s1 + $0x50] sm:$0xff] %v131_v10  ;;  %134 = vst [vmem:[%s345_s1 + $0xc0] sm:$0xff] %v133_v11  ;;  %v49_v12 = vld [vmem:[%s344_s0] sm:$0xff]  ;;  %v136_v13 = vld [vmem:[%s344_s0 + $0x70] sm:$0xff] }
   0x8   :  { %135 = vst [vmem:[%s345_s1 + $0x60] sm:$0xff] %v49_v12  ;;  %137 = vst [vmem:[%s345_s1 + $0xd0] sm:$0xff] %v136_v13  ;;  %v140_v15 = vld [vmem:[%s344_s0 + $0xd8] sm:$0xff]  ;;  %v144_v17 = vld [vmem:[%s344_s0 + $0xc8] sm:$0xff] }
   0x9   :  { %139 = vst [vmem:[%s345_s1 + $0x8] sm:$0xff] %v138_v14  ;;  %v142_v16 = vld [vmem:[%s344_s0 + $0x58] sm:$0xff]  ;;  %141 = vst [vmem:[%s345_s1 + $0x78] sm:$0xff] %v140_v15  ;;  %v146_v18 = vld [vmem:[%s344_s0 + $0x48] sm:$0xff] }
   0xa   :  { %143 = vst [vmem:[%s345_s1 + $0x18] sm:$0xff] %v142_v16  ;;  %145 = vst [vmem:[%s345_s1 + $0x88] sm:$0xff] %v144_v17  ;;  %v148_v19 = vld [vmem:[%s344_s0 + $0xb8] sm:$0xff]  ;;  %v152_v21 = vld [vmem:[%s344_s0 + $0xa8] sm:$0xff] }
   0xb   :  { %v150_v20 = vld [vmem:[%s344_s0 + $0x38] sm:$0xff]  ;;  %147 = vst [vmem:[%s345_s1 + $0x28] sm:$0xff] %v146_v18  ;;  %149 = vst [vmem:[%s345_s1 + $0x98] sm:$0xff] %v148_v19  ;;  %v154_v22 = vld [vmem:[%s344_s0 + $0x28] sm:$0xff] }
   0xc   :  { %151 = vst [vmem:[%s345_s1 + $0x38] sm:$0xff] %v150_v20  ;;  %v156_v23 = vld [vmem:[%s344_s0 + $0x98] sm:$0xff]  ;;  %153 = vst [vmem:[%s345_s1 + $0xa8] sm:$0xff] %v152_v21  ;;  %v160_v25 = vld [vmem:[%s344_s0 + $0x88] sm:$0xff] }
   0xd   :  { %155 = vst [vmem:[%s345_s1 + $0x48] sm:$0xff] %v154_v22  ;;  %157 = vst [vmem:[%s345_s1 + $0xb8] sm:$0xff] %v156_v23  ;;  %v158_v24 = vld [vmem:[%s344_s0 + $0x18] sm:$0xff]  ;;  %v162_v26 = vld [vmem:[%s344_s0 + $0x8] sm:$0xff] }
   0xe   :  { %159 = vst [vmem:[%s345_s1 + $0x58] sm:$0xff] %v158_v24  ;;  %161 = vst [vmem:[%s345_s1 + $0xc8] sm:$0xff] %v160_v25  ;;  %v164_v27 = vld [vmem:[%s344_s0 + $0x78] sm:$0xff] }
   0xf   :  { %163 = vst [vmem:[%s345_s1 + $0x68] sm:$0xff] %v162_v26  ;;  %165 = vst [vmem:[%s345_s1 + $0xd8] sm:$0xff] %v164_v27 }

// kernel: sftffn_forward.5
= control target key start
LH: loop header
LB: loop body
LE: loop exit
PB: predicated region body
PF: predicated region fallthrough
CT: control target
= control target key end

     0   :  { %8 = vsyncpa [#allocation3], 0  ;;  %s2721_s0 = inlined_call_operand.vmem [shape: f32[2,16,16,32], index: 0, kind: input, shape index: {}]   ;;  %s2722_s1 = inlined_call_operand.vmem [shape: f32[2,16,16,32], index: 1, kind: input, shape index: {}]   ;;  %s2723_s2 = inlined_call_operand.vmem [shape: bf16[32,32], index: 2, kind: input, shape index: {}]   ;;  %s2724_s3 = inlined_call_operand.hbm [shape: f32[2,16,16,32], index: 3, kind: output, shape index: {}]  }
   0x1   :  { %10 = vsyncpa [#allocation3 + $0x1], 0  ;;  %s1865_s12 = smov 0   ;;  %s1867_s13 = smov 0  }
   0x2   :  { %s1869_s14 = smov 0   ;;  %s1871_s15 = smov 0  }
   0x3 LB: > { %s1886_s16 = sadd.s32 4294967295, %s1839_s15   ;;  %s1512_s17 = sadd.s32 4294967294, %s1839_s15   ;;  %s1839_s15 = sphi %s1871_s15, %s2730_s15   ;;  %s1835_s14 = sphi %s1869_s14, %s2729_s14   ;;  %s1831_s13 = sphi %s1867_s13, %s2728_s13   ;;  %s1827_s12 = sphi %s1865_s12, %s2727_s12  }
   0x4   : > { %s1890_s18 = sadd.s32 1, %s1839_s15   ;;  %s96_s19 = sadd.s32 1, %s1835_s14 }
   0x5   : > { %s93_s20 = ssub.s32 %s1839_s15, %s1890_s18  ;;  %p106_p0 = scmp.ne.s32.totalorder %s1835_s14, %s1831_s13 }
   0x6   : > { %p94_p1 = scmp.eq.s32.totalorder %s93_s20, 0  ;;  %p107_p2 = scmp.eq.s32.totalorder %s1886_s16, 1 }
   0x7   : > { %p112_p3 = scmp.ne.s32.totalorder %s1831_s13, %s1827_s12  ;;  %p113_p4 = scmp.eq.s32.totalorder %s1512_s17, 1 }
   0x8   : > { %s1901_s21 = scalar_select %p94_p1, %s1835_s14, %s96_s19  }
   0x9   : > { %p1903_p5 = por %p107_p2, %p106_p0  ;;  %p1907_p6 = por %p113_p4, %p112_p3 }
   0xa   : > { %p1515_p7 = scmp.ge.s32.totalorder %s1839_s15, 1  ;;  %p150_p8 = scmp.lt.s32.totalorder %s1839_s15, 3 }
   0xc   : > { %p151_p9 = pnand %p1515_p7, %p150_p8 }
   0xd   : > { %v1647_v0 = vld [vmem:[%s2723_s2] sm:$0xff] (!%p151_p9)   ;;  %p179_p10 = scmp.lt.s32.totalorder (!%p151_p9), %s1886_s16, 1  ;;  %v1648_v1 = vld [vmem:[%s2723_s2 + $0x8] sm:$0xff] (!%p151_p9)   ;;  %v1841_v28 = vmov (!%p151_p9), -1.0   ;;  %vm1182_vm6 = vcmask (!%p151_p9), 261120   ;;  %s176_s9 = sand.u32 (!%p151_p9), 1, %s1831_s13  }
   0xe   : > { %154 = sbr.rel (%p151_p9) target bundleno = 494 (0x1ee), region = 32  ;;  %1565 = vmatprep.subr.bf16.mxu0 (!%p151_p9), %v1647_v0  ;;  %1601 = vmatprep.subr.bf16.mxu1 (!%p151_p9), %v1647_v0  ;;  %s1516_s10 = sshll.u32 (!%p151_p9), %s176_s9, 8 }
   0xf   : > { %1566 = vmatpush3.bf16.msra.mxu0 (!%p151_p9), %v1647_v0  ;;  %1603 = vmatpush3.bf16.msra.mxu1 (!%p151_p9), %v1647_v0  ;;  %s2603_s11 = scalar_lea.vmem (!%p151_p9), [#allocation2], %s1516_s10  ;;  %s1546_s17 = sshll.u32 (!%p151_p9), %s1886_s16, 12 }
  0x10   : > { %1567 = vmatprep.subr.bf16.mxu0 (!%p151_p9), %v1648_v1  ;;  %1602 = vmatprep.subr.bf16.mxu1 (!%p151_p9), %v1648_v1  ;;  %s1438_s19 = sshll.u32 (!%p151_p9), %s2603_s11, 4  ;;  %s2668_s25 = scalar_lea.hbm (!%p151_p9), %s2724_s3, %s1546_s17  ;;  %s2670_s19 = int_to_ptr.vmem [resolvable:$true] %s1438_s19 }
  0x11   : > { %s1777_s26 = scalar_lea.vmem (!%p151_p9), %s2670_s19, 4096  ;;  %s1842_s27 = smov (!%p151_p9), [#allocation2]  }
  0x12   : > { %p1778_p11 = scmp.ne.s32.totalorder (!%p151_p9), %s2670_s19, %s1777_s26 }
  0x13   : > { %1568 = vmatpush3.bf16.msra.mxu0 (!%p151_p9), %v1648_v1  ;;  %1604 = vmatpush3.bf16.msra.mxu1 (!%p151_p9), %v1648_v1 }
  0x14   : > { %p1779_p12 = pnand (!%p151_p9), %p1778_p11, %p1903_p5 }
  0x15   : > { %s1921_s28 = scalar_select %p179_p10, %s1886_s16, 1 }
  0x16   : > { %s2680_s16 = scalar_lea.sflag [#allocation3], %s176_s9  ;;  %p1780_p13 = pneg %p1779_p12 }
  0x17   : > { %s1544_s29 = sshll.u32 %s1921_s28, 8  ;;  %s1781_s28 = sshll.u32 %s1842_s27, 4  ;;  %s1782_s28 = int_to_ptr.vmem [resolvable:$false] %s1781_s28 }
  0x18   : > { %s1929_s5 = scalar_lea.vmem %s2721_s0, %s1544_s29  ;;  %s2052_s8 = scalar_lea.vmem %s2722_s1, %s1544_s29 }
  0x19   : > { %v190_v2 = vld [vmem:[%s1929_s5] sm:$0xff]  ;;  %v191_v3 = vld [vmem:[%s1929_s5 + $0x8] sm:$0xff]  ;;  %v192_v23 = vld [vmem:[%s1929_s5 + $0x10] sm:$0xff]  ;;  %s1783_s29 = scalar_lea.vmem %s1782_s28, 8192  ;;  %p1784_p0 = scmp.lt.s32.totalorder %s2670_s19, %s1782_s28 }
  0x1a   : > { %v254_v4 = vmul.f32 0.70710677, %v190_v2  ;;  %v255_v5 = vmul.f32 0.70710677, %v191_v3  ;;  %v206_v8 = vld [vmem:[%s1929_s5 + $0x80] sm:$0xff]  ;;  %v207_v9 = vld [vmem:[%s1929_s5 + $0x88] sm:$0xff]  ;;  %p1785_p1 = scmp.lt.s32.totalorder %s1783_s29, %s1777_s26 }
  0x1b   : > { %v270_v13 = vmul.f32 0.70710677, %v206_v8  ;;  %v271_v14 = vmul.f32 0.70710677, %v207_v9  ;;  %v193_v24 = vld [vmem:[%s1929_s5 + $0x18] sm:$0xff]  ;;  %v1937_v25 = vmul.f32 0.5, %v190_v2 }
  0x1c   : > { %v350_v6 = vand.u32 2147483647, %v254_v4  ;;  %v351_v7 = vand.u32 2147483647, %v255_v5  ;;  %vm286_vm0 = vcmp.ge.f32.partialorder %v254_v4, 0.0  ;;  %v1939_v26 = vmul.f32 0.5, %v191_v3  ;;  %p1786_p2 = por %p1785_p1, %p1784_p0 }
  0x1d   : > { %v366_v19 = vand.u32 2147483647, %v270_v13  ;;  %v367_v20 = vand.u32 2147483647, %v271_v14  ;;  %vm287_vm1 = vcmp.ge.f32.partialorder %v255_v5, 0.0  ;;  %v1942_v29 = vsel %vm286_vm0, 1.0, %v1841_v28 }
  0x1e   : > { %v382_v10 = vmul.f32 0.3275911, %v350_v6  ;;  %v383_v11 = vmul.f32 0.3275911, %v351_v7  ;;  %v798_v12 = vsub.f32 0.0, %v350_v6  ;;  %v799_v17 = vsub.f32 0.0, %v351_v7  ;;  %p1787_p3 = pnand %p1786_p2, %p1780_p13 }
  0x1f   : > { %v398_v21 = vmul.f32 0.3275911, %v366_v19  ;;  %v399_v22 = vmul.f32 0.3275911, %v367_v20  ;;  %v1945_v33 = vld [vmem:[%s1929_s5 + $0x90] sm:$0xff]  ;;  %vm302_vm2 = vcmp.ge.f32.partialorder %v270_v13, 0.0 }
  0x20   : > { %v414_v15 = vadd.f32 1.0, %v382_v10  ;;  %v415_v16 = vadd.f32 1.0, %v383_v11  ;;  %v830_v18 = vmul.f32 %v798_v12, %v350_v6  ;;  %v831_v27 = vmul.f32 %v799_v17, %v351_v7  ;;  %v1955_v39 = vld [vmem:[%s1929_s5 + $0x98] sm:$0xff] }
  0x21   : > { %v430_v31 = vadd.f32 1.0, %v398_v21  ;;  %v431_v32 = vadd.f32 1.0, %v399_v22  ;;  %v814_v34 = vsub.f32 0.0, %v366_v19  ;;  %v1947_v35 = vmul.f32 0.70710677, %v192_v23 }
  0x22   : > { %1649 = vrcp.f32 %v414_v15  ;;  %v862_v30 = vmul.f32 1.442695, %v830_v18  ;;  %v1949_v36 = vmul.f32 0.70710677, %v193_v24  ;;  %v1952_v37 = vsel %vm287_vm1, 1.0, %v1841_v28 }
  0x23   : > { %1651 = vrcp.f32 %v415_v16  ;;  %vm303_vm3 = vcmp.ge.f32.partialorder %v271_v14, 0.0  ;;  %v815_v38 = vsub.f32 0.0, %v367_v20  ;;  %v864_v40 = vmul.f32 1.442695, %v831_v27 }
  0x24   : > { %1653 = vrcp.f32 %v430_v31  ;;  %v1957_v41 = vmul.f32 0.5, %v206_v8  ;;  %v1960_v42 = vmul.f32 0.70710677, %v1945_v33  ;;  %v1962_v43 = vmul.f32 0.5, %v207_v9 }
  0x25   : > { %1655 = vrcp.f32 %v431_v32  ;;  %v1965_v44 = vsel %vm302_vm2, 1.0, %v1841_v28  ;;  %v352_v45 = vand.u32 2147483647, %v1947_v35  ;;  %v353_v46 = vand.u32 2147483647, %v1949_v36 }
  0x26   : > { %1657 = vpow2.f32 %v862_v30  ;;  %v1970_v47 = vsel %vm303_vm3, 1.0, %v1841_v28  ;;  %v846_v48 = vmul.f32 %v814_v34, %v366_v19  ;;  %v1973_v49 = vmul.f32 0.70710677, %v1955_v39 }
  0x27   : > { %v847_v50 = vmul.f32 %v815_v38, %v367_v20  ;;  %v384_v51 = vmul.f32 0.3275911, %v352_v45  ;;  %v385_v52 = vmul.f32 0.3275911, %v353_v46  ;;  %v800_v53 = vsub.f32 0.0, %v352_v45 }
  0x28   : > { %1659 = vpow2.f32 %v864_v40  ;;  %v1977_v55 = vmul.f32 0.5, %v192_v23  ;;  %v1979_v56 = vmul.f32 0.5, %v193_v24  ;;  %v368_v57 = vand.u32 2147483647, %v1960_v42 }
  0x29   : > { %v416_v60 = vadd.f32 1.0, %v384_v51  ;;  %v417_v61 = vadd.f32 1.0, %v385_v52  ;;  %v801_v62 = vsub.f32 0.0, %v353_v46  ;;  %v894_v0 = vmul.f32 1.442695, %v846_v48 }
  0x2a   : > { %v832_v1 = vmul.f32 %v800_v53, %v352_v45  ;;  %v369_v2 = vand.u32 2147483647, %v1973_v49  ;;  %v896_v4 = vmul.f32 1.442695, %v847_v50  ;;  %v400_v5 = vmul.f32 0.3275911, %v368_v57 }
  0x2b   : > { %1661 = vrcp.f32 %v416_v60  ;;  %vm288_vm4 = vcmp.ge.f32.partialorder %v1947_v35, 0.0  ;;  %v833_v10 = vmul.f32 %v801_v62, %v353_v46  ;;  %v816_v12 = vsub.f32 0.0, %v368_v57  ;;  %v2007_v50 = vld [vmem:[%s1929_s5 + $0x20] sm:$0xff] }
  0x2c   : > { %v1975_v54 = vpop.eup %1649  ;;  %1663 = vrcp.f32 %v417_v61  ;;  %v401_v7 = vmul.f32 0.3275911, %v369_v2  ;;  %v432_v11 = vadd.f32 1.0, %v400_v5  ;;  %v866_v16 = vmul.f32 1.442695, %v832_v1 }
  0x2d   : > { %v1982_v58 = vpop.eup %1651  ;;  %v510_v59 = vmul.f32 1.0614054, %v1975_v54  ;;  %v817_v20 = vsub.f32 0.0, %v369_v2  ;;  %v848_v24 = vmul.f32 %v816_v12, %v368_v57  ;;  %vm289_vm5 = vcmp.ge.f32.partialorder %v1949_v36, 0.0 }
  0x2e   : > { %v511_v63 = vmul.f32 1.0614054, %v1982_v58  ;;  %v1988_v8 = vpop.eup %1653  ;;  %v433_v17 = vadd.f32 1.0, %v401_v7  ;;  %1665 = vrcp.f32 %v432_v11  ;;  %v868_v31 = vmul.f32 1.442695, %v833_v10 }
  0x2f   : > { %v542_v3 = vadd.f32 -1.4531521, %v510_v59  ;;  %v1991_v13 = vpop.eup %1655  ;;  %v526_v15 = vmul.f32 1.0614054, %v1988_v8  ;;  %v849_v40 = vmul.f32 %v817_v20, %v369_v2  ;;  %v2004_v48 = vsel %vm288_vm4, 1.0, %v1841_v28  ;;  %v2023_v2 = vld [vmem:[%s1929_s5 + $0x28] sm:$0xff] }
  0x30   : > { %v543_v6 = vadd.f32 -1.4531521, %v511_v63  ;;  %v527_v19 = vmul.f32 1.0614054, %v1991_v13  ;;  %v1658_v21 = vpop.eup %1657  ;;  %1667 = vrcp.f32 %v433_v17  ;;  %v898_v53 = vmul.f32 1.442695, %v848_v24 }
  0x31   : > { %v574_v9 = vmul.f32 %v1975_v54, %v542_v3  ;;  %v558_v23 = vadd.f32 -1.4531521, %v526_v15  ;;  %1669 = vpow2.f32 %v894_v0  ;;  %v2015_v61 = vsel %vm289_vm5, 1.0, %v1841_v28 }
  0x32   : > { %v575_v14 = vmul.f32 %v1982_v58, %v543_v6  ;;  %v559_v30 = vadd.f32 -1.4531521, %v527_v19  ;;  %v1660_v32 = vpop.eup %1659  ;;  %1671 = vpow2.f32 %v896_v4  ;;  %v900_v1 = vmul.f32 1.442695, %v849_v40 }
  0x33   : > { %v606_v18 = vadd.f32 1.4214138, %v574_v9  ;;  %v590_v38 = vmul.f32 %v1988_v8, %v558_v23  ;;  %1673 = vpow2.f32 %v866_v16  ;;  %v2028_v36 = vmul.f32 0.70710677, %v2007_v50 }
  0x34   : > { %v607_v22 = vadd.f32 1.4214138, %v575_v14  ;;  %v591_v46 = vmul.f32 %v1991_v13, %v559_v30  ;;  %1675 = vpow2.f32 %v868_v31  ;;  %v2034_v15 = vmul.f32 0.70710677, %v2023_v2 }
  0x35   : > { %v638_v27 = vmul.f32 %v1975_v54, %v606_v18  ;;  %v622_v52 = vadd.f32 1.4214138, %v590_v38  ;;  %v2009_v57 = vpop.eup %1661  ;;  %1677 = vpow2.f32 %v898_v53  ;;  %vm304_vm7 = vcmp.ge.f32.partialorder %v1960_v42, 0.0 }
  0x36   : > { %v639_v34 = vmul.f32 %v1982_v58, %v607_v22  ;;  %v623_v60 = vadd.f32 1.4214138, %v591_v46  ;;  %v2017_v35 = vpop.eup %1663  ;;  %v512_v0 = vmul.f32 1.0614054, %v2009_v57  ;;  %1679 = vpow2.f32 %v900_v1 }
  0x37   : > { %v670_v45 = vadd.f32 -0.28449672, %v638_v27  ;;  %v654_v63 = vmul.f32 %v1988_v8, %v622_v52  ;;  %v513_v5 = vmul.f32 1.0614054, %v2017_v35  ;;  %vm305_vm8 = vcmp.ge.f32.partialorder %v1973_v49, 0.0 }
  0x38   : > { %v671_v51 = vadd.f32 -0.28449672, %v639_v34  ;;  %v655_v4 = vmul.f32 %v1991_v13, %v623_v60  ;;  %v544_v9 = vadd.f32 -1.4531521, %v512_v0  ;;  %v2030_v10 = vpop.eup %1665  ;;  %vm290_vm9 = vcmp.ge.f32.partialorder %v2028_v36, 0.0 }
  0x39   : > { %v702_v59 = vmul.f32 %v1975_v54, %v670_v45  ;;  %v686_v7 = vadd.f32 -0.28449672, %v654_v63  ;;  %v545_v14 = vadd.f32 -1.4531521, %v513_v5  ;;  %v528_v20 = vmul.f32 1.0614054, %v2030_v10 }
  0x3a   : > { %v703_v62 = vmul.f32 %v1982_v58, %v671_v51  ;;  %v687_v12 = vadd.f32 -0.28449672, %v655_v4  ;;  %v2036_v16 = vpop.eup %1667  ;;  %v576_v19 = vmul.f32 %v2009_v57, %v544_v9  ;;  %vm291_vm10 = vcmp.ge.f32.partialorder %v2034_v15, 0.0 }
  0x3b   : > { %v734_v3 = vadd.f32 0.2548296, %v702_v59  ;;  %v718_v18 = vmul.f32 %v1988_v8, %v686_v7  ;;  %v529_v24 = vmul.f32 1.0614054, %v2036_v16  ;;  %v1670_v27 = vpop.eup %1669  ;;  %v560_v38 = vadd.f32 -1.4531521, %v528_v20 }
  0x3c   : > { %v735_v6 = vadd.f32 0.2548296, %v703_v62  ;;  %v719_v23 = vmul.f32 %v1991_v13, %v687_v12  ;;  %v608_v34 = vadd.f32 1.4214138, %v576_v19  ;;  %v1086_v12 = vld [vmem:[%s2052_s8] sm:$0xff]  ;;  %v1087_v19 = vld [vmem:[%s2052_s8 + $0x8] sm:$0xff] }
  0x3d   : > { %v766_v11 = vmul.f32 %v1975_v54, %v734_v3  ;;  %v577_v54 = vmul.f32 %v2017_v35, %v545_v14  ;;  %v750_v31 = vadd.f32 0.2548296, %v718_v18  ;;  %v561_v59 = vadd.f32 -1.4531521, %v529_v24 }
  0x3e   : > { %v767_v17 = vmul.f32 %v1982_v58, %v735_v6  ;;  %v1672_v58 = vpop.eup %1671  ;;  %v751_v45 = vadd.f32 0.2548296, %v719_v23  ;;  %v640_v53 = vmul.f32 %v2009_v57, %v608_v34 }
  0x3f   : > { %v926_v22 = vmul.f32 %v1658_v21, %v766_v11  ;;  %v609_v46 = vadd.f32 1.4214138, %v577_v54  ;;  %v1674_v51 = vpop.eup %1673  ;;  %v782_v21 = vmul.f32 %v1988_v8, %v750_v31  ;;  %v592_v8 = vmul.f32 %v2030_v10, %v560_v38 }
  0x40   : > { %v927_v30 = vmul.f32 %v1660_v32, %v767_v17  ;;  %v1676_v60 = vpop.eup %1675  ;;  %v783_v62 = vmul.f32 %v1991_v13, %v751_v45  ;;  %v672_v3 = vadd.f32 -0.28449672, %v640_v53  ;;  %v593_v4 = vmul.f32 %v2036_v16, %v561_v59 }
  0x41   : > { %v958_v40 = vsub.f32 1.0, %v926_v22  ;;  %v641_v63 = vmul.f32 %v2017_v35, %v609_v46  ;;  %v942_v1 = vmul.f32 %v1670_v27, %v782_v21  ;;  %v624_v9 = vadd.f32 1.4214138, %v592_v8  ;;  %v1678_v11 = vpop.eup %1677  ;;  %v1102_v21 = vld [vmem:[%s2052_s8 + $0x80] sm:$0xff] }
  0x42   : > { %v959_v52 = vsub.f32 1.0, %v927_v30  ;;  %v943_v6 = vmul.f32 %v1672_v58, %v783_v62  ;;  %v704_v13 = vmul.f32 %v2009_v57, %v672_v3  ;;  %v625_v17 = vadd.f32 1.4214138, %v593_v4  ;;  %v1680_v46 = vpop.eup %1679 }
  0x43   : > { %v990_v32 = vmul.f32 %v958_v40, %v1942_v29  ;;  %v673_v7 = vadd.f32 -0.28449672, %v641_v63  ;;  %v974_v14 = vsub.f32 1.0, %v942_v1  ;;  %v656_v22 = vmul.f32 %v2030_v10, %v624_v9 }
  0x44   : > { %v991_v0 = vmul.f32 %v959_v52, %v1952_v37  ;;  %v975_v20 = vsub.f32 1.0, %v943_v6  ;;  %v736_v24 = vadd.f32 0.2548296, %v704_v13  ;;  %v657_v27 = vmul.f32 %v2036_v16, %v625_v17 }
  0x45   : > { %v1022_v5 = vadd.f32 1.0, %v990_v32  ;;  %v705_v37 = vmul.f32 %v2017_v35, %v673_v7  ;;  %v1006_v54 = vmul.f32 %v974_v14, %v1965_v44  ;;  %v688_v34 = vadd.f32 -0.28449672, %v656_v22 }
  0x46   : > { %v1023_v29 = vadd.f32 1.0, %v991_v0  ;;  %v768_v40 = vmul.f32 %v2009_v57, %v736_v24  ;;  %v689_v45 = vadd.f32 -0.28449672, %v657_v27  ;;  %v354_v53 = vand.u32 2147483647, %v2028_v36 }
  0x47   : > { %v1054_v18 = vmul.f32 %v1022_v5, %v1937_v25  ;;  %v1007_v25 = vmul.f32 %v975_v20, %v1970_v47  ;;  %v737_v31 = vadd.f32 0.2548296, %v705_v37  ;;  %v1038_v58 = vadd.f32 1.0, %v1006_v54  ;;  %v1103_v47 = vld [vmem:[%s2052_s8 + $0x88] sm:$0xff]  ;;  %v1089_v37 = vld [vmem:[%s2052_s8 + $0x18] sm:$0xff] }
  0x48   : > { %v1055_v23 = vmul.f32 %v1023_v29, %v1939_v26  ;;  %v720_v44 = vmul.f32 %v2030_v10, %v688_v34  ;;  %v928_v62 = vmul.f32 %v1674_v51, %v768_v40  ;;  %v721_v63 = vmul.f32 %v2036_v16, %v689_v45 }
  0x49   : > { %v1118_v30 = vmul.f32 %v1086_v12, %v1054_v18  ;;  %v1039_v52 = vadd.f32 1.0, %v1007_v25  ;;  %v769_v26 = vmul.f32 %v2017_v35, %v737_v31  ;;  %v1070_v32 = vmul.f32 %v1038_v58, %v1957_v41 }
  0x4a   : > { %v1119_v38 = vmul.f32 %v1087_v19, %v1055_v23  ;;  %v752_v0 = vadd.f32 0.2548296, %v720_v44  ;;  %v355_v1 = vand.u32 2147483647, %v2034_v15  ;;  %v960_v3 = vsub.f32 1.0, %v928_v62  ;;  %v2123_v62 = vld [vmem:[%s1929_s5 + $0x38] sm:$0xff] }
  0x4b   : > { %v1071_v8 = vmul.f32 %v1039_v52, %v1962_v43  ;;  %v929_v57 = vmul.f32 %v1676_v60, %v769_v26  ;;  %v1134_v35 = vmul.f32 %v1102_v21, %v1070_v32  ;;  %v753_v4 = vadd.f32 0.2548296, %v721_v63  ;;  %v1105_v52 = vld [vmem:[%s2052_s8 + $0x98] sm:$0xff] }
  0x4c   : > { %v1150_v59 = vpack.c.bf16 %v1119_v38, %v1118_v30  ;;  %v386_v5 = vmul.f32 0.3275911, %v354_v53  ;;  %v784_v41 = vmul.f32 %v2030_v10, %v752_v0  ;;  %v387_v51 = vmul.f32 0.3275911, %v355_v1  ;;  %v2160_v15 = vld [vmem:[%s1929_s5 + $0xb8] sm:$0xff] }
  0x4d   : > { %v1135_v6 = vmul.f32 %v1103_v47, %v1071_v8  ;;  %v961_v7 = vsub.f32 1.0, %v929_v57  ;;  %v992_v9 = vmul.f32 %v960_v3, %v2004_v48  ;;  %v785_v43 = vmul.f32 %v2036_v16, %v753_v4  ;;  %v2091_v48 = vld [vmem:[%s1929_s5 + $0xa0] sm:$0xff]  ;;  %v1088_v16 = vld [vmem:[%s2052_s8 + $0x10] sm:$0xff] }
  0x4e   : > { %1569 = vmatprep.mubr.msk.bf16.mxu0 %vm1182_vm6, %v1150_v59  ;;  %v418_v60 = vadd.f32 1.0, %v386_v5  ;;  %v944_v14 = vmul.f32 %v1678_v11, %v784_v41  ;;  %v419_v13 = vadd.f32 1.0, %v387_v51  ;;  %v336_v10 = vsel %vm304_vm7, 1.0, %v1841_v28  ;;  %v2118_v59 = vld [vmem:[%s1929_s5 + $0x30] sm:$0xff] }
  0x4f   : > { %v1158_v29 = vpack.c.bf16 %v1135_v6, %v1134_v35  ;;  %v993_v12 = vmul.f32 %v961_v7, %v2015_v61  ;;  %v1024_v17 = vadd.f32 1.0, %v992_v9  ;;  %v945_v18 = vmul.f32 %v1680_v46, %v785_v43  ;;  %v2097_v61 = vld [vmem:[%s1929_s5 + $0xa8] sm:$0xff] }
  0x50   : > { %1681 = vrcp.f32 %v418_v60  ;;  %v337_v19 = vsel %vm305_vm8, 1.0, %v1841_v28  ;;  %v976_v20 = vsub.f32 1.0, %v944_v14  ;;  %v802_v22 = vsub.f32 0.0, %v354_v53 }
  0x51   : > { %1585 = vmatprep.mubr.msk.bf16.mxu1 %vm1182_vm6, %v1158_v29  ;;  %v1025_v49 = vadd.f32 1.0, %v993_v12  ;;  %1683 = vrcp.f32 %v419_v13  ;;  %v1056_v11 = vmul.f32 %v1024_v17, %v1977_v55  ;;  %v977_v42 = vsub.f32 1.0, %v945_v18 }
  0x52   : > { %v240_v54 = vmul.f32 0.5, %v1945_v33  ;;  %v1008_v24 = vmul.f32 %v976_v20, %v336_v10  ;;  %v2104_v27 = vmul.f32 0.70710677, %v2091_v48  ;;  %v241_v25 = vmul.f32 0.5, %v1955_v39  ;;  %v2157_v20 = vld [vmem:[%s1929_s5 + $0xb0] sm:$0xff] }
  0x53   : > { %v1057_v23 = vmul.f32 %v1025_v49, %v1979_v56  ;;  %v1120_v30 = vmul.f32 %v1088_v16, %v1056_v11  ;;  %v1009_v31 = vmul.f32 %v977_v42, %v337_v19  ;;  %v2108_v55 = vmul.f32 0.70710677, %v2097_v61  ;;  %v1104_v56 = vld [vmem:[%s2052_s8 + $0x90] sm:$0xff] }
  0x54   : > { %v1040_v38 = vadd.f32 1.0, %v1008_v24  ;;  %v803_v58 = vsub.f32 0.0, %v355_v1  ;;  %v834_v45 = vmul.f32 %v802_v22, %v354_v53  ;;  %v370_v21 = vand.u32 2147483647, %v2104_v27 }
  0x55   : > { %v1121_v34 = vmul.f32 %v1089_v37, %v1057_v23  ;;  %v1041_v40 = vadd.f32 1.0, %v1009_v31  ;;  %v2114_v39 = vmul.f32 0.5, %v2007_v50  ;;  %v371_v44 = vand.u32 2147483647, %v2108_v55 }
  0x56   : > { %v1072_v46 = vmul.f32 %v1040_v38, %v240_v54  ;;  %v835_v47 = vmul.f32 %v803_v58, %v355_v1  ;;  %v402_v53 = vmul.f32 0.3275911, %v370_v21  ;;  %v870_v50 = vmul.f32 1.442695, %v834_v45 }
  0x57   : > { %v1151_v33 = vpack.c.bf16 %v1121_v34, %v1120_v30  ;;  %v1073_v26 = vmul.f32 %v1041_v40, %v241_v25  ;;  %v403_v57 = vmul.f32 0.3275911, %v371_v44  ;;  %v818_v4 = vsub.f32 0.0, %v370_v21 }
  0x58   : > { %v1136_v32 = vmul.f32 %v1104_v56, %v1072_v46  ;;  %v434_v3 = vadd.f32 1.0, %v402_v53  ;;  %v260_v5 = vmul.f32 0.70710677, %v2118_v59  ;;  %v2134_v41 = vmul.f32 0.70710677, %v2123_v62 }
  0x59   : > { %1570 = vmatmul.mubr.msk.bf16.vlgmr.msra.gmra.mrb[0].mxu0 %vm1182_vm6, %v1151_v33  ;;  %v1137_v8 = vmul.f32 %v1105_v52, %v1073_v26  ;;  %v435_v7 = vadd.f32 1.0, %v403_v57  ;;  %v872_v9 = vmul.f32 1.442695, %v835_v47  ;;  %v819_v43 = vsub.f32 0.0, %v371_v44 }
  0x5a   : > { %v2125_v63 = vpop.eup %1681  ;;  %1685 = vrcp.f32 %v434_v3  ;;  %v2138_v60 = vmul.f32 0.5, %v2023_v2  ;;  %v2143_v29 = vsel %vm290_vm9, 1.0, %v1841_v28  ;;  %v2148_v14 = vsel %vm291_vm10, 1.0, %v1841_v28 }
  0x5b   : > { %v2128_v0 = vpop.eup %1683  ;;  %v514_v35 = vmul.f32 1.0614054, %v2125_v63  ;;  %v1159_v6 = vpack.c.bf16 %v1137_v8, %v1136_v32  ;;  %1687 = vrcp.f32 %v435_v7  ;;  %v850_v17 = vmul.f32 %v818_v4, %v370_v21 }
  0x5c   : > { %v515_v1 = vmul.f32 1.0614054, %v2128_v0  ;;  %v356_v10 = vand.u32 2147483647, %v260_v5  ;;  %1689 = vpow2.f32 %v870_v50  ;;  %v2153_v36 = vmul.f32 0.5, %v2091_v48 }
  0x5d   : > { %v546_v51 = vadd.f32 -1.4531521, %v514_v35  ;;  %1586 = vmatmul.mubr.msk.bf16.vlgmr.msra.gmra.mrb[0].mxu1 %vm1182_vm6, %v1159_v6  ;;  %v357_v18 = vand.u32 2147483647, %v2134_v41  ;;  %1691 = vpow2.f32 %v872_v9  ;;  %v851_v16 = vmul.f32 %v819_v43, %v371_v44 }
  0x5e   : > { %v547_v12 = vadd.f32 -1.4531521, %v515_v1  ;;  %v388_v19 = vmul.f32 0.3275911, %v356_v10  ;;  %v2163_v37 = vmul.f32 0.5, %v2097_v61  ;;  %vm306_vm11 = vcmp.ge.f32.partialorder %v2104_v27, 0.0 }
  0x5f   : > { %v578_v13 = vmul.f32 %v2125_v63, %v546_v51  ;;  %v389_v42 = vmul.f32 0.3275911, %v357_v18  ;;  %vm307_vm12 = vcmp.ge.f32.partialorder %v2108_v55, 0.0  ;;  %v902_v22 = vmul.f32 1.442695, %v850_v17 }
  0x60   : > { %v579_v2 = vmul.f32 %v2128_v0, %v547_v12  ;;  %v420_v23 = vadd.f32 1.0, %v388_v19  ;;  %vm292_vm13 = vcmp.ge.f32.partialorder %v260_v5, 0.0  ;;  %v2170_v30 = vmul.f32 0.70710677, %v2157_v20 }
  0x61   : > { %v610_v49 = vadd.f32 1.4214138, %v578_v13  ;;  %v421_v24 = vadd.f32 1.0, %v389_v42  ;;  %v904_v31 = vmul.f32 1.442695, %v851_v16  ;;  %v2176_v34 = vsel %vm306_vm11, 1.0, %v1841_v28 }
  0x62   : > { %v611_v11 = vadd.f32 1.4214138, %v579_v2  ;;  %1693 = vrcp.f32 %v420_v23  ;;  %v2173_v61 = vmul.f32 0.70710677, %v2160_v15  ;;  %v804_v38 = vsub.f32 0.0, %v356_v10 }
  0x63   : > { %v642_v48 = vmul.f32 %v2125_v63, %v610_v49  ;;  %1695 = vrcp.f32 %v421_v24  ;;  %v2184_v56 = vsel %vm307_vm12, 1.0, %v1841_v28  ;;  %v2187_v45 = vsel %vm292_vm13, 1.0, %v1841_v28 }
  0x64   : > { %v643_v54 = vmul.f32 %v2128_v0, %v611_v11  ;;  %v2178_v58 = vpop.eup %1685  ;;  %1697 = vpow2.f32 %v902_v22  ;;  %v805_v21 = vsub.f32 0.0, %v357_v18  ;;  %v372_v26 = vand.u32 2147483647, %v2170_v30 }
  0x65   : > { %v674_v25 = vadd.f32 -0.28449672, %v642_v48  ;;  %v2189_v33 = vpop.eup %1687  ;;  %v530_v52 = vmul.f32 1.0614054, %v2178_v58  ;;  %1699 = vpow2.f32 %v904_v31  ;;  %v373_v55 = vand.u32 2147483647, %v2173_v61 }
  0x66   : > { %v675_v27 = vadd.f32 -0.28449672, %v643_v54  ;;  %v531_v32 = vmul.f32 1.0614054, %v2189_v33  ;;  %v1690_v47 = vpop.eup %1689  ;;  %v836_v50 = vmul.f32 %v804_v38, %v356_v10  ;;  %v404_v57 = vmul.f32 0.3275911, %v372_v26 }
  0x67   : > { %v706_v40 = vmul.f32 %v2125_v63, %v674_v25  ;;  %v562_v8 = vadd.f32 -1.4531521, %v530_v52  ;;  %v1692_v35 = vpop.eup %1691  ;;  %v405_v5 = vmul.f32 0.3275911, %v373_v55  ;;  %v820_v6 = vsub.f32 0.0, %v372_v26 }
  0x68   : > { %v707_v46 = vmul.f32 %v2128_v0, %v675_v27  ;;  %v563_v4 = vadd.f32 -1.4531521, %v531_v32  ;;  %v837_v51 = vmul.f32 %v805_v21, %v357_v18  ;;  %v436_v9 = vadd.f32 1.0, %v404_v57 }
  0x69   : > { %v738_v44 = vadd.f32 0.2548296, %v706_v40  ;;  %v594_v7 = vmul.f32 %v2178_v58, %v562_v8  ;;  %v437_v13 = vadd.f32 1.0, %v405_v5  ;;  %v821_v17 = vsub.f32 0.0, %v373_v55  ;;  %v1091_v8 = vld [vmem:[%s2052_s8 + $0x28] sm:$0xff] }
  0x6a   : > { %v739_v53 = vadd.f32 0.2548296, %v707_v46  ;;  %v595_v12 = vmul.f32 %v2189_v33, %v563_v4  ;;  %1701 = vrcp.f32 %v436_v9  ;;  %v852_v49 = vmul.f32 %v820_v6, %v372_v26 }
  0x6b   : > { %v770_v3 = vmul.f32 %v2125_v63, %v738_v44  ;;  %v626_v10 = vadd.f32 1.4214138, %v594_v7  ;;  %v874_v11 = vmul.f32 1.442695, %v836_v50  ;;  %1703 = vrcp.f32 %v437_v13 }
  0x6c   : > { %v771_v1 = vmul.f32 %v2128_v0, %v739_v53  ;;  %v2200_v16 = vpop.eup %1693  ;;  %v627_v19 = vadd.f32 1.4214138, %v595_v12  ;;  %v876_v22 = vmul.f32 1.442695, %v837_v51  ;;  %v853_v31 = vmul.f32 %v821_v17, %v373_v55  ;;  %v2214_v55 = vld [vmem:[%s1929_s5 + $0x40] sm:$0xff] }
  0x6d   : > { %v930_v43 = vmul.f32 %v1690_v47, %v770_v3  ;;  %v2202_v0 = vpop.eup %1695  ;;  %v658_v18 = vmul.f32 %v2178_v58, %v626_v10  ;;  %v516_v48 = vmul.f32 1.0614054, %v2200_v16  ;;  %v906_v46 = vmul.f32 1.442695, %v852_v49  ;;  %v2221_v3 = vld [vmem:[%s1929_s5 + $0x48] sm:$0xff] }
  0x6e   : > { %v931_v2 = vmul.f32 %v1692_v35, %v771_v1  ;;  %v1698_v23 = vpop.eup %1697  ;;  %v659_v24 = vmul.f32 %v2189_v33, %v627_v19  ;;  %v517_v25 = vmul.f32 1.0614054, %v2202_v0  ;;  %1705 = vpow2.f32 %v874_v11 }
  0x6f   : > { %v962_v63 = vsub.f32 1.0, %v930_v43  ;;  %v690_v38 = vadd.f32 -0.28449672, %v658_v18  ;;  %v548_v40 = vadd.f32 -1.4531521, %v516_v48  ;;  %v1700_v52 = vpop.eup %1699  ;;  %1707 = vpow2.f32 %v876_v22 }
  0x70   : > { %v963_v42 = vsub.f32 1.0, %v931_v2  ;;  %v691_v26 = vadd.f32 -0.28449672, %v659_v24  ;;  %v549_v44 = vadd.f32 -1.4531521, %v517_v25  ;;  %1709 = vpow2.f32 %v906_v46 }
  0x71   : > { %v994_v54 = vmul.f32 %v962_v63, %v2143_v29  ;;  %v1090_v29 = vld [vmem:[%s2052_s8 + $0x20] sm:$0xff]  ;;  %v722_v47 = vmul.f32 %v2178_v58, %v690_v38  ;;  %v580_v53 = vmul.f32 %v2200_v16, %v548_v40  ;;  %v908_v35 = vmul.f32 1.442695, %v853_v31 }
  0x72   : > { %v995_v27 = vmul.f32 %v963_v42, %v2148_v14  ;;  %v723_v50 = vmul.f32 %v2189_v33, %v691_v26  ;;  %v581_v57 = vmul.f32 %v2202_v0, %v549_v44  ;;  %v2225_v9 = vmul.f32 0.70710677, %v2214_v55 }
  0x73   : > { %v1026_v21 = vadd.f32 1.0, %v994_v54  ;;  %v754_v5 = vadd.f32 0.2548296, %v722_v47  ;;  %v612_v6 = vadd.f32 1.4214138, %v580_v53  ;;  %vm293_vm14 = vcmp.ge.f32.partialorder %v2134_v41, 0.0 }
  0x74   : > { %v1027_v32 = vadd.f32 1.0, %v995_v27  ;;  %v755_v7 = vadd.f32 0.2548296, %v723_v50  ;;  %v613_v51 = vadd.f32 1.4214138, %v581_v57  ;;  %1711 = vpow2.f32 %v908_v35 }
  0x75   : > { %v1058_v14 = vmul.f32 %v1026_v21, %v2114_v39  ;;  %v2227_v39 = vpop.eup %1701  ;;  %v786_v12 = vmul.f32 %v2178_v58, %v754_v5  ;;  %v644_v13 = vmul.f32 %v2200_v16, %v612_v6  ;;  %v358_v22 = vand.u32 2147483647, %v2225_v9  ;;  %v1106_v5 = vld [vmem:[%s2052_s8 + $0xa0] sm:$0xff] }
  0x76   : > { %v1059_v4 = vmul.f32 %v1027_v32, %v2138_v60  ;;  %v2233_v60 = vmul.f32 0.70710677, %v2221_v3  ;;  %v2235_v17 = vpop.eup %1703  ;;  %v787_v2 = vmul.f32 %v2189_v33, %v755_v7  ;;  %v645_v10 = vmul.f32 %v2202_v0, %v613_v51  ;;  %v1107_v7 = vld [vmem:[%s2052_s8 + $0xa8] sm:$0xff] }
  0x77   : > { %v1122_v1 = vmul.f32 %v1090_v29, %v1058_v14  ;;  %v532_v49 = vmul.f32 1.0614054, %v2227_v39  ;;  %v946_v19 = vmul.f32 %v1698_v23, %v786_v12  ;;  %v676_v11 = vadd.f32 -0.28449672, %v644_v13 }
  0x78   : > { %v1123_v43 = vmul.f32 %v1091_v8, %v1059_v4  ;;  %v533_v58 = vmul.f32 1.0614054, %v2235_v17  ;;  %v947_v42 = vmul.f32 %v1700_v52, %v787_v2  ;;  %v677_v18 = vadd.f32 -0.28449672, %v645_v10  ;;  %v1706_v31 = vpop.eup %1705 }
  0x79   : > { %v564_v48 = vadd.f32 -1.4531521, %v532_v49  ;;  %v978_v54 = vsub.f32 1.0, %v946_v19  ;;  %v708_v33 = vmul.f32 %v2200_v16, %v676_v11  ;;  %v359_v25 = vand.u32 2147483647, %v2233_v60  ;;  %v1708_v46 = vpop.eup %1707 }
  0x7a   : > { %v1152_v63 = vpack.c.bf16 %v1123_v43, %v1122_v1  ;;  %v565_v24 = vadd.f32 -1.4531521, %v533_v58  ;;  %v979_v27 = vsub.f32 1.0, %v947_v42  ;;  %v709_v23 = vmul.f32 %v2202_v0, %v677_v18  ;;  %v1710_v14 = vpop.eup %1709 }
  0x7b   : > { %v596_v38 = vmul.f32 %v2227_v39, %v564_v48  ;;  %v390_v40 = vmul.f32 0.3275911, %v358_v22  ;;  %v1010_v52 = vmul.f32 %v978_v54, %v2176_v34  ;;  %v740_v21 = vadd.f32 0.2548296, %v708_v33  ;;  %v2267_v48 = vld [vmem:[%s1929_s5 + $0xc0] sm:$0xff] }
  0x7c   : > { %1573 = vmatprep.mubr.msk.bf16.mxu0 %vm1182_vm6, %v1152_v63  ;;  %v597_v26 = vmul.f32 %v2235_v17, %v565_v24  ;;  %v391_v44 = vmul.f32 0.3275911, %v359_v25  ;;  %v1011_v32 = vmul.f32 %v979_v27, %v2184_v56  ;;  %v741_v29 = vadd.f32 0.2548296, %v709_v23 }
  0x7d   : > { %v628_v47 = vadd.f32 1.4214138, %v596_v38  ;;  %v422_v53 = vadd.f32 1.0, %v390_v40  ;;  %v1042_v8 = vadd.f32 1.0, %v1010_v52  ;;  %v772_v50 = vmul.f32 %v2200_v16, %v740_v21 }
  0x7e   : > { %v629_v57 = vadd.f32 1.4214138, %v597_v26  ;;  %v423_v35 = vadd.f32 1.0, %v391_v44  ;;  %v1043_v4 = vadd.f32 1.0, %v1011_v32  ;;  %v773_v34 = vmul.f32 %v2202_v0, %v741_v29  ;;  %v1712_v43 = vpop.eup %1711 }
  0x7f   : > { %v660_v6 = vmul.f32 %v2227_v39, %v628_v47  ;;  %1713 = vrcp.f32 %v422_v53  ;;  %v1074_v1 = vmul.f32 %v1042_v8, %v2153_v36  ;;  %v932_v56 = vmul.f32 %v1706_v31, %v772_v50  ;;  %v2271_v31 = vld [vmem:[%s1929_s5 + $0xc8] sm:$0xff] }
  0x80   : > { %v661_v51 = vmul.f32 %v2235_v17, %v629_v57  ;;  %1715 = vrcp.f32 %v423_v35  ;;  %v1075_v12 = vmul.f32 %v1043_v4, %v2163_v37  ;;  %v325_v16 = vsel %vm293_vm14, 1.0, %v1841_v28 }
  0x81   : > { %v933_v13 = vmul.f32 %v1708_v46, %v773_v34  ;;  %v692_v0 = vadd.f32 -0.28449672, %v660_v6  ;;  %v1138_v2 = vmul.f32 %v1106_v5, %v1074_v1  ;;  %v964_v10 = vsub.f32 1.0, %v932_v56 }
  0x82   : > { %v693_v49 = vadd.f32 -0.28449672, %v661_v51  ;;  %v806_v36 = vsub.f32 0.0, %v358_v22  ;;  %v1139_v63 = vmul.f32 %v1107_v7, %v1075_v12  ;;  %v807_v58 = vsub.f32 0.0, %v359_v25 }
  0x83   : > { %v965_v19 = vsub.f32 1.0, %v933_v13  ;;  %v724_v11 = vmul.f32 %v2227_v39, %v692_v0  ;;  %v228_v42 = vmul.f32 0.5, %v2118_v59  ;;  %v229_v37 = vmul.f32 0.5, %v2123_v62 }
  0x84   : > { %v996_v41 = vmul.f32 %v964_v10, %v2187_v45  ;;  %v725_v18 = vmul.f32 %v2235_v17, %v693_v49  ;;  %v1160_v54 = vpack.c.bf16 %v1139_v63, %v1138_v2  ;;  %vm308_vm15 = vcmp.ge.f32.partialorder %v2170_v30, 0.0  ;;  %v1092_v45 = vld [vmem:[%s2052_s8 + $0x30] sm:$0xff]  ;;  %v1093_v30 = vld [vmem:[%s2052_s8 + $0x38] sm:$0xff] }
  0x85   : > { %v997_v33 = vmul.f32 %v965_v19, %v325_v16  ;;  %v756_v24 = vadd.f32 0.2548296, %v724_v11  ;;  %vm309_vm0 = vcmp.ge.f32.partialorder %v2173_v61, 0.0  ;;  %v838_v23 = vmul.f32 %v806_v36, %v358_v22  ;;  %v1108_v49 = vld [vmem:[%s2052_s8 + $0xb0] sm:$0xff] }
  0x86   : > { %v1028_v27 = vadd.f32 1.0, %v996_v41  ;;  %v757_v59 = vadd.f32 0.2548296, %v725_v18  ;;  %1589 = vmatprep.mubr.msk.bf16.mxu1 %vm1182_vm6, %v1160_v54  ;;  %v839_v40 = vmul.f32 %v807_v58, %v359_v25  ;;  %v2278_v46 = vmul.f32 0.70710677, %v2267_v48  ;;  %v2307_v41 = vld [vmem:[%s1929_s5 + $0x58] sm:$0xff] }
  0x87   : > { %v1029_v62 = vadd.f32 1.0, %v997_v33  ;;  %v788_v38 = vmul.f32 %v2227_v39, %v756_v24  ;;  %v340_v21 = vsel %vm308_vm15, 1.0, %v1841_v28  ;;  %v2284_v44 = vmul.f32 0.70710677, %v2271_v31 }
  0x88   : > { %v1060_v52 = vmul.f32 %v1028_v27, %v228_v42  ;;  %v789_v26 = vmul.f32 %v2235_v17, %v757_v59  ;;  %v341_v39 = vsel %vm309_vm0, 1.0, %v1841_v28  ;;  %v374_v29 = vand.u32 2147483647, %v2278_v46 }
  0x89   : > { %v2286_v22 = vpop.eup %1713  ;;  %v1061_v32 = vmul.f32 %v1029_v62, %v229_v37  ;;  %v948_v25 = vmul.f32 %v1710_v14, %v788_v38  ;;  %v878_v17 = vmul.f32 1.442695, %v838_v23  ;;  %v880_v5 = vmul.f32 1.442695, %v839_v40  ;;  %v200_v37 = vld [vmem:[%s1929_s5 + $0x50] sm:$0xff] }
  0x8a   : > { %v2292_v47 = vpop.eup %1715  ;;  %v1124_v53 = vmul.f32 %v1092_v45, %v1060_v52  ;;  %v949_v8 = vmul.f32 %v1712_v43, %v789_v26  ;;  %v518_v50 = vmul.f32 1.0614054, %v2286_v22  ;;  %v244_v34 = vmul.f32 0.5, %v2157_v20 }
  0x8b   : > { %v1125_v57 = vmul.f32 %v1093_v30, %v1061_v32  ;;  %v980_v35 = vsub.f32 1.0, %v948_v25  ;;  %v519_v4 = vmul.f32 1.0614054, %v2292_v47  ;;  %v375_v14 = vand.u32 2147483647, %v2284_v44 }
  0x8c   : > { %v981_v6 = vsub.f32 1.0, %v949_v8  ;;  %v550_v61 = vadd.f32 -1.4531521, %v518_v50  ;;  %v406_v51 = vmul.f32 0.3275911, %v374_v29  ;;  %v245_v43 = vmul.f32 0.5, %v2160_v15 }
  0x8d   : > { %v1153_v1 = vpack.c.bf16 %v1125_v57, %v1124_v53  ;;  %v1012_v7 = vmul.f32 %v980_v35, %v340_v21  ;;  %v551_v56 = vadd.f32 -1.4531521, %v519_v4  ;;  %v407_v13 = vmul.f32 0.3275911, %v375_v14  ;;  %v1109_v15 = vld [vmem:[%s2052_s8 + $0xb8] sm:$0xff] }
  0x8e   : > { %v1013_v12 = vmul.f32 %v981_v6, %v341_v39  ;;  %v582_v16 = vmul.f32 %v2286_v22, %v550_v61  ;;  %1717 = vpow2.f32 %v878_v17  ;;  %v438_v2 = vadd.f32 1.0, %v406_v51  ;;  %v2346_v6 = vld [vmem:[%s1929_s5 + $0xd0] sm:$0xff] }
  0x8f   : > { %1574 = vmatmul.mubr.msk.bf16.gmra.mrb[4].mxu0 %vm1182_vm6, %v1153_v1  ;;  %v1044_v0 = vadd.f32 1.0, %v1012_v7  ;;  %v583_v20 = vmul.f32 %v2292_v47, %v551_v56  ;;  %1719 = vpow2.f32 %v880_v5  ;;  %v439_v63 = vadd.f32 1.0, %v407_v13  ;;  %v2352_v7 = vld [vmem:[%s1929_s5 + $0xd8] sm:$0xff] }
  0x90   : > { %v1045_v10 = vadd.f32 1.0, %v1013_v12  ;;  %v614_v36 = vadd.f32 1.4214138, %v582_v16  ;;  %1721 = vrcp.f32 %v438_v2  ;;  %v2310_v54 = vmul.f32 0.5, %v2214_v55 }
  0x91   : > { %v1076_v19 = vmul.f32 %v1044_v0, %v244_v34  ;;  %v615_v11 = vadd.f32 1.4214138, %v583_v20  ;;  %1723 = vrcp.f32 %v439_v63  ;;  %v822_v24 = vsub.f32 0.0, %v374_v29 }
  0x92   : > { %v1077_v58 = vmul.f32 %v1045_v10, %v245_v43  ;;  %v646_v42 = vmul.f32 %v2286_v22, %v614_v36  ;;  %vm294_vm1 = vcmp.ge.f32.partialorder %v2225_v9, 0.0  ;;  %v823_v23 = vsub.f32 0.0, %v375_v14 }
  0x93   : > { %v1140_v18 = vmul.f32 %v1108_v49, %v1076_v19  ;;  %v647_v33 = vmul.f32 %v2292_v47, %v615_v11  ;;  %v2314_v45 = vmul.f32 0.70710677, %v200_v37  ;;  %v2317_v38 = vmul.f32 0.70710677, %v2307_v41 }
  0x94   : > { %v1141_v27 = vmul.f32 %v1109_v15, %v1077_v58  ;;  %v678_v59 = vadd.f32 -0.28449672, %v646_v42  ;;  %v2320_v52 = vmul.f32 0.5, %v2221_v3  ;;  %vm295_vm2 = vcmp.ge.f32.partialorder %v2233_v60, 0.0 }
  0x95   : > { %v679_v62 = vadd.f32 -0.28449672, %v647_v33  ;;  %v326_v30 = vsel %vm294_vm1, 1.0, %v1841_v28  ;;  %v854_v21 = vmul.f32 %v822_v24, %v374_v29  ;;  %v360_v26 = vand.u32 2147483647, %v2314_v45 }
  0x96   : > { %v1161_v40 = vpack.c.bf16 %v1141_v27, %v1140_v18  ;;  %v710_v55 = vmul.f32 %v2286_v22, %v678_v59  ;;  %vm310_vm3 = vcmp.ge.f32.partialorder %v2278_v46, 0.0  ;;  %v855_v39 = vmul.f32 %v823_v23, %v375_v14  ;;  %v1095_v23 = vld [vmem:[%s2052_s8 + $0x48] sm:$0xff] }
  0x97   : > { %v711_v9 = vmul.f32 %v2292_v47, %v679_v62  ;;  %v361_v3 = vand.u32 2147483647, %v2317_v38  ;;  %v327_v60 = vsel %vm295_vm2, 1.0, %v1841_v28  ;;  %v2332_v8 = vmul.f32 0.5, %v2267_v48 }
  0x98   : > { %1590 = vmatmul.mubr.msk.bf16.gmra.mrb[4].mxu1 %vm1182_vm6, %v1161_v40  ;;  %v742_v32 = vadd.f32 0.2548296, %v710_v55  ;;  %v1718_v25 = vpop.eup %1717  ;;  %v392_v50 = vmul.f32 0.3275911, %v360_v26  ;;  %v2336_v57 = vmul.f32 0.5, %v2271_v31  ;;  %vm311_vm4 = vcmp.ge.f32.partialorder %v2284_v44, 0.0 }
  0x99   : > { %v743_v53 = vadd.f32 0.2548296, %v711_v9  ;;  %v1720_v29 = vpop.eup %1719  ;;  %v393_v46 = vmul.f32 0.3275911, %v361_v3  ;;  %v2343_v5 = vsel %vm310_vm3, 1.0, %v1841_v28  ;;  %v2361_v0 = vsel %vm311_vm4, 1.0, %v1841_v28 }
  0x9a   : > { %v774_v17 = vmul.f32 %v2286_v22, %v742_v32  ;;  %v2339_v35 = vpop.eup %1721  ;;  %v910_v48 = vmul.f32 1.442695, %v854_v21  ;;  %v424_v34 = vadd.f32 1.0, %v392_v50  ;;  %v912_v14 = vmul.f32 1.442695, %v855_v39  ;;  %v1094_v44 = vld [vmem:[%s2052_s8 + $0x40] sm:$0xff] }
  0x9b   : > { %v775_v4 = vmul.f32 %v2292_v47, %v743_v53  ;;  %v2348_v61 = vpop.eup %1723  ;;  %v534_v31 = vmul.f32 1.0614054, %v2339_v35  ;;  %v425_v1 = vadd.f32 1.0, %v393_v46  ;;  %v808_v47 = vsub.f32 0.0, %v360_v26  ;;  %v2389_v46 = vld [vmem:[%s1929_s5 + $0x60] sm:$0xff] }
  0x9c   : > { %v934_v22 = vmul.f32 %v1718_v25, %v774_v17  ;;  %v535_v51 = vmul.f32 1.0614054, %v2348_v61  ;;  %1725 = vrcp.f32 %v424_v34  ;;  %v2356_v16 = vmul.f32 0.70710677, %v2346_v6 }
  0x9d   : > { %v935_v56 = vmul.f32 %v1720_v29, %v775_v4  ;;  %v566_v12 = vadd.f32 -1.4531521, %v534_v31  ;;  %1727 = vrcp.f32 %v425_v1  ;;  %v2364_v2 = vmul.f32 0.70710677, %v2352_v7 }
  0x9e   : > { %v966_v43 = vsub.f32 1.0, %v934_v22  ;;  %v567_v20 = vadd.f32 -1.4531521, %v535_v51  ;;  %1729 = vpow2.f32 %v910_v48  ;;  %v2367_v36 = vmul.f32 0.5, %v200_v37  ;;  %v2394_v22 = vld [vmem:[%s1929_s5 + $0x68] sm:$0xff] }
  0x9f   : > { %v967_v13 = vsub.f32 1.0, %v935_v56  ;;  %v598_v49 = vmul.f32 %v2339_v35, %v566_v12  ;;  %1731 = vpow2.f32 %v912_v14  ;;  %v809_v15 = vsub.f32 0.0, %v361_v3 }
  0xa0   : > { %v998_v10 = vmul.f32 %v966_v43, %v326_v30  ;;  %v599_v19 = vmul.f32 %v2348_v61, %v567_v20  ;;  %v840_v42 = vmul.f32 %v808_v47, %v360_v26  ;;  %v376_v18 = vand.u32 2147483647, %v2356_v16 }
  0xa1   : > { %v999_v63 = vmul.f32 %v967_v13, %v327_v60  ;;  %v630_v58 = vadd.f32 1.4214138, %v598_v49  ;;  %v2373_v27 = vmul.f32 0.5, %v2307_v41  ;;  %v377_v59 = vand.u32 2147483647, %v2364_v2 }
  0xa2   : > { %v1030_v11 = vadd.f32 1.0, %v998_v10  ;;  %v631_v24 = vadd.f32 1.4214138, %v599_v19  ;;  %vm296_vm5 = vcmp.ge.f32.partialorder %v2314_v45, 0.0  ;;  %v408_v40 = vmul.f32 0.3275911, %v376_v18 }
  0xa3   : > { %v1031_v33 = vadd.f32 1.0, %v999_v63  ;;  %v662_v62 = vmul.f32 %v2339_v35, %v630_v58  ;;  %v841_v9 = vmul.f32 %v809_v15, %v361_v3  ;;  %v409_v21 = vmul.f32 0.3275911, %v377_v59 }
  0xa4   : > { %v1062_v37 = vmul.f32 %v1030_v11, %v2310_v54  ;;  %v663_v30 = vmul.f32 %v2348_v61, %v631_v24  ;;  %v882_v32 = vmul.f32 1.442695, %v840_v42  ;;  %v440_v39 = vadd.f32 1.0, %v408_v40 }
  0xa5   : > { %v1063_v55 = vmul.f32 %v1031_v33, %v2320_v52  ;;  %v694_v41 = vadd.f32 -0.28449672, %v662_v62  ;;  %v441_v53 = vadd.f32 1.0, %v409_v21  ;;  %v824_v50 = vsub.f32 0.0, %v376_v18 }
  0xa6   : > { %v1126_v26 = vmul.f32 %v1094_v44, %v1062_v37  ;;  %v2382_v25 = vpop.eup %1725  ;;  %v695_v60 = vadd.f32 -0.28449672, %v663_v30  ;;  %1733 = vrcp.f32 %v440_v39  ;;  %v825_v3 = vsub.f32 0.0, %v377_v59 }
  0xa7   : > { %v1127_v54 = vmul.f32 %v1095_v23, %v1063_v55  ;;  %v2384_v29 = vpop.eup %1727  ;;  %v726_v52 = vmul.f32 %v2339_v35, %v694_v41  ;;  %v520_v17 = vmul.f32 1.0614054, %v2382_v25  ;;  %1735 = vrcp.f32 %v441_v53 }
  0xa8   : > { %v727_v48 = vmul.f32 %v2348_v61, %v695_v60  ;;  %v521_v34 = vmul.f32 1.0614054, %v2384_v29  ;;  %v1730_v31 = vpop.eup %1729  ;;  %v884_v56 = vmul.f32 1.442695, %v841_v9  ;;  %v856_v12 = vmul.f32 %v824_v50, %v376_v18 }
  0xa9   : > { %v1154_v4 = vpack.c.bf16 %v1127_v54, %v1126_v26  ;;  %v758_v14 = vadd.f32 0.2548296, %v726_v52  ;;  %v552_v1 = vadd.f32 -1.4531521, %v520_v17  ;;  %v1732_v51 = vpop.eup %1731  ;;  %v2398_v13 = vmul.f32 0.70710677, %v2389_v46 }
  0xaa   : > { %v759_v47 = vadd.f32 0.2548296, %v727_v48  ;;  %v553_v43 = vadd.f32 -1.4531521, %v521_v34  ;;  %v857_v49 = vmul.f32 %v825_v3, %v377_v59  ;;  %v2403_v63 = vmul.f32 0.70710677, %v2394_v22 }
  0xab   : > { %1577 = vmatprep.mubr.msk.bf16.mxu0 %vm1182_vm6, %v1154_v4  ;;  %v790_v20 = vmul.f32 %v2339_v35, %v758_v14  ;;  %v584_v10 = vmul.f32 %v2382_v25, %v552_v1  ;;  %1737 = vpow2.f32 %v882_v32  ;;  %v362_v11 = vand.u32 2147483647, %v2398_v13 }
  0xac   : > { %v791_v19 = vmul.f32 %v2348_v61, %v759_v47  ;;  %v585_v15 = vmul.f32 %v2384_v29, %v553_v43  ;;  %v2411_v58 = vsel %vm296_vm5, 1.0, %v1841_v28  ;;  %1739 = vpow2.f32 %v884_v56 }
  0xad   : > { %v950_v44 = vmul.f32 %v1730_v31, %v790_v20  ;;  %v616_v35 = vadd.f32 1.4214138, %v584_v10  ;;  %v914_v33 = vmul.f32 1.442695, %v856_v12  ;;  %v363_v24 = vand.u32 2147483647, %v2403_v63 }
  0xae   : > { %v951_v42 = vmul.f32 %v1732_v51, %v791_v19  ;;  %v617_v18 = vadd.f32 1.4214138, %v585_v15  ;;  %v916_v37 = vmul.f32 1.442695, %v857_v49  ;;  %v394_v23 = vmul.f32 0.3275911, %v362_v11 }
  0xaf   : > { %v982_v59 = vsub.f32 1.0, %v950_v44  ;;  %v648_v61 = vmul.f32 %v2382_v25, %v616_v35  ;;  %vm297_vm7 = vcmp.ge.f32.partialorder %v2317_v38, 0.0  ;;  %v395_v45 = vmul.f32 0.3275911, %v363_v24  ;;  %v2439_v35 = vld [vmem:[%s1929_s5 + $0xe8] sm:$0xff] }
  0xb0   : > { %v983_v62 = vsub.f32 1.0, %v951_v42  ;;  %v649_v40 = vmul.f32 %v2384_v29, %v617_v18  ;;  %v810_v55 = vsub.f32 0.0, %v362_v11  ;;  %v2417_v30 = vpop.eup %1733  ;;  %v426_v26 = vadd.f32 1.0, %v394_v23 }
  0xb1   : > { %v1014_v9 = vmul.f32 %v982_v59, %v2343_v5  ;;  %v680_v21 = vadd.f32 -0.28449672, %v648_v61  ;;  %v811_v41 = vsub.f32 0.0, %v363_v24  ;;  %v2420_v32 = vpop.eup %1735  ;;  %v536_v60 = vmul.f32 1.0614054, %v2417_v30  ;;  %v1110_v5 = vld [vmem:[%s2052_s8 + $0xc0] sm:$0xff] }
  0xb2   : > { %v1015_v39 = vmul.f32 %v983_v62, %v2361_v0  ;;  %v681_v54 = vadd.f32 -0.28449672, %v649_v40  ;;  %v427_v53 = vadd.f32 1.0, %v395_v45  ;;  %v537_v17 = vmul.f32 1.0614054, %v2420_v32  ;;  %v1111_v0 = vld [vmem:[%s2052_s8 + $0xc8] sm:$0xff] }
  0xb3   : > { %v1046_v50 = vadd.f32 1.0, %v1014_v9  ;;  %v712_v52 = vmul.f32 %v2382_v25, %v680_v21  ;;  %1741 = vrcp.f32 %v426_v26  ;;  %v568_v48 = vadd.f32 -1.4531521, %v536_v60 }
  0xb4   : > { %v1047_v3 = vadd.f32 1.0, %v1015_v39  ;;  %v713_v4 = vmul.f32 %v2384_v29, %v681_v54  ;;  %1743 = vrcp.f32 %v427_v53  ;;  %v569_v14 = vadd.f32 -1.4531521, %v537_v17 }
  0xb5   : > { %v1078_v34 = vmul.f32 %v1046_v50, %v2332_v8  ;;  %v744_v31 = vadd.f32 0.2548296, %v712_v52  ;;  %v842_v1 = vmul.f32 %v810_v55, %v362_v11  ;;  %v1738_v56 = vpop.eup %1737  ;;  %v600_v43 = vmul.f32 %v2417_v30, %v568_v48  ;;  %v2435_v8 = vld [vmem:[%s1929_s5 + $0xe0] sm:$0xff]  ;;  %v1096_v50 = vld [vmem:[%s2052_s8 + $0x50] sm:$0xff] }
  0xb6   : > { %v1079_v51 = vmul.f32 %v1047_v3, %v2336_v57  ;;  %v745_v47 = vadd.f32 0.2548296, %v713_v4  ;;  %1745 = vpow2.f32 %v914_v33  ;;  %v1740_v12 = vpop.eup %1739  ;;  %v601_v49 = vmul.f32 %v2420_v32, %v569_v14 }
  0xb7   : > { %v1142_v20 = vmul.f32 %v1110_v5, %v1078_v34  ;;  %v776_v10 = vmul.f32 %v2382_v25, %v744_v31  ;;  %1747 = vpow2.f32 %v916_v37  ;;  %v632_v11 = vadd.f32 1.4214138, %v600_v43  ;;  %v1097_v5 = vld [vmem:[%s2052_s8 + $0x58] sm:$0xff] }
  0xb8   : > { %v1143_v19 = vmul.f32 %v1111_v0, %v1079_v51  ;;  %v777_v15 = vmul.f32 %v2384_v29, %v745_v47  ;;  %v843_v44 = vmul.f32 %v811_v41, %v363_v24  ;;  %vm312_vm8 = vcmp.ge.f32.partialorder %v2356_v16, 0.0 }
  0xb9   : > { %v936_v57 = vmul.f32 %v1738_v56, %v776_v10  ;;  %v633_v42 = vadd.f32 1.4214138, %v601_v49  ;;  %v886_v18 = vmul.f32 1.442695, %v842_v1  ;;  %v664_v25 = vmul.f32 %v2417_v30, %v632_v11 }
  0xba   : > { %v1162_v33 = vpack.c.bf16 %v1143_v19, %v1142_v20  ;;  %v937_v59 = vmul.f32 %v1740_v12, %v777_v15  ;;  %v2444_v61 = vmul.f32 0.70710677, %v2435_v8  ;;  %v329_v29 = vsel %vm297_vm7, 1.0, %v1841_v28 }
  0xbb   : > { %v968_v37 = vsub.f32 1.0, %v936_v57  ;;  %v665_v24 = vmul.f32 %v2420_v32, %v633_v42  ;;  %v2451_v23 = vmul.f32 0.70710677, %v2439_v35  ;;  %vm313_vm9 = vcmp.ge.f32.partialorder %v2364_v2, 0.0 }
  0xbc   : > { %1593 = vmatprep.mubr.msk.bf16.mxu1 %vm1182_vm6, %v1162_v33  ;;  %v969_v62 = vsub.f32 1.0, %v937_v59  ;;  %v696_v40 = vadd.f32 -0.28449672, %v664_v25  ;;  %v888_v45 = vmul.f32 1.442695, %v843_v44  ;;  %v344_v38 = vsel %vm312_vm8, 1.0, %v1841_v28 }
  0xbd   : > { %v2455_v55 = vpop.eup %1741  ;;  %v1000_v9 = vmul.f32 %v968_v37, %v2411_v58  ;;  %v697_v21 = vadd.f32 -0.28449672, %v665_v24  ;;  %v2462_v26 = vand.u32 2147483647, %v2444_v61  ;;  %1749 = vpow2.f32 %v886_v18 }
  0xbe   : > { %v2464_v41 = vpop.eup %1743  ;;  %v1001_v39 = vmul.f32 %v969_v62, %v329_v29  ;;  %v728_v54 = vmul.f32 %v2417_v30, %v696_v40  ;;  %v522_v60 = vmul.f32 1.0614054, %v2455_v55  ;;  %v2472_v52 = vand.u32 2147483647, %v2451_v23  ;;  %v2493_v29 = vld [vmem:[%s1929_s5 + $0x78] sm:$0xff] }
  0xbf   : > { %v1032_v53 = vadd.f32 1.0, %v1000_v9  ;;  %v729_v58 = vmul.f32 %v2420_v32, %v697_v21  ;;  %v523_v16 = vmul.f32 1.0614054, %v2464_v41  ;;  %1751 = vpow2.f32 %v888_v45 }
  0xc0   : > { %v1746_v17 = vpop.eup %1745  ;;  %v1033_v3 = vadd.f32 1.0, %v1001_v39  ;;  %v760_v4 = vadd.f32 0.2548296, %v728_v54  ;;  %v554_v48 = vadd.f32 -1.4531521, %v522_v60  ;;  %v248_v33 = vmul.f32 0.5, %v2346_v6 }
  0xc1   : > { %v1748_v34 = vpop.eup %1747  ;;  %v1064_v0 = vmul.f32 %v1032_v53, %v2367_v36  ;;  %v761_v31 = vadd.f32 0.2548296, %v729_v58  ;;  %v555_v14 = vadd.f32 -1.4531521, %v523_v16  ;;  %v410_v1 = vmul.f32 0.3275911, %v2462_v26 }
  0xc2   : > { %v1065_v56 = vmul.f32 %v1033_v3, %v2373_v27  ;;  %v792_v51 = vmul.f32 %v2417_v30, %v760_v4  ;;  %v586_v47 = vmul.f32 %v2455_v55, %v554_v48  ;;  %v411_v43 = vmul.f32 0.3275911, %v2472_v52  ;;  %v1112_v53 = vld [vmem:[%s2052_s8 + $0xd0] sm:$0xff]  ;;  %v1113_v16 = vld [vmem:[%s2052_s8 + $0xd8] sm:$0xff] }
  0xc3   : > { %v1128_v12 = vmul.f32 %v1096_v50, %v1064_v0  ;;  %v793_v20 = vmul.f32 %v2420_v32, %v761_v31  ;;  %v587_v10 = vmul.f32 %v2464_v41, %v555_v14  ;;  %v442_v49 = vadd.f32 1.0, %v410_v1  ;;  %v2488_v32 = vld [vmem:[%s1929_s5 + $0x70] sm:$0xff] }
  0xc4   : > { %v1129_v36 = vmul.f32 %v1097_v5, %v1065_v56  ;;  %v952_v19 = vmul.f32 %v1746_v17, %v792_v51  ;;  %v618_v15 = vadd.f32 1.4214138, %v586_v47  ;;  %v443_v11 = vadd.f32 1.0, %v411_v43 }
  0xc5   : > { %v345_v27 = vsel %vm313_vm9, 1.0, %v1841_v28  ;;  %v953_v30 = vmul.f32 %v1748_v34, %v793_v20  ;;  %v619_v44 = vadd.f32 1.4214138, %v587_v10  ;;  %1753 = vrcp.f32 %v442_v49 }
  0xc6   : > { %v1155_v57 = vpack.c.bf16 %v1129_v36, %v1128_v12  ;;  %v984_v42 = vsub.f32 1.0, %v952_v19  ;;  %v650_v18 = vmul.f32 %v2455_v55, %v618_v15  ;;  %1755 = vrcp.f32 %v443_v11 }
  0xc7   : > { %v985_v59 = vsub.f32 1.0, %v953_v30  ;;  %v651_v25 = vmul.f32 %v2464_v41, %v619_v44  ;;  %v1750_v37 = vpop.eup %1749  ;;  %v249_v2 = vmul.f32 0.5, %v2352_v7  ;;  %v826_v40 = vsub.f32 0.0, %v2462_v26  ;;  %v2529_v44 = vld [vmem:[%s1929_s5 + $0xf0] sm:$0xff] }
  0xc8   : > { %1578 = vmatmul.mubr.msk.bf16.gmra.mrb[8].mxu0 %vm1182_vm6, %v1155_v57  ;;  %v1016_v24 = vmul.f32 %v984_v42, %v344_v38  ;;  %v682_v62 = vadd.f32 -0.28449672, %v650_v18  ;;  %vm298_vm10 = vcmp.ge.f32.partialorder %v2398_v13, 0.0  ;;  %v2500_v9 = vmul.f32 0.70710677, %v2488_v32 }
  0xc9   : > { %v1017_v45 = vmul.f32 %v985_v59, %v345_v27  ;;  %v683_v6 = vadd.f32 -0.28449672, %v651_v25  ;;  %v1752_v21 = vpop.eup %1751  ;;  %v827_v60 = vsub.f32 0.0, %v2472_v52  ;;  %v2505_v7 = vmul.f32 0.70710677, %v2493_v29 }
  0xca   : > { %v1048_v39 = vadd.f32 1.0, %v1016_v24  ;;  %v714_v54 = vmul.f32 %v2455_v55, %v682_v62  ;;  %vm299_vm11 = vcmp.ge.f32.partialorder %v2403_v63, 0.0  ;;  %v858_v3 = vmul.f32 %v826_v40, %v2462_v26  ;;  %v1098_v24 = vld [vmem:[%s2052_s8 + $0x60] sm:$0xff] }
  0xcb   : > { %v1049_v38 = vadd.f32 1.0, %v1017_v45  ;;  %v715_v50 = vmul.f32 %v2464_v41, %v683_v6  ;;  %v330_v4 = vsel %vm298_vm10, 1.0, %v1841_v28  ;;  %v364_v34 = vand.u32 2147483647, %v2500_v9 }
  0xcc   : > { %v1080_v58 = vmul.f32 %v1048_v39, %v248_v33  ;;  %v746_v17 = vadd.f32 0.2548296, %v714_v54  ;;  %v859_v14 = vmul.f32 %v827_v60, %v2472_v52  ;;  %v365_v1 = vand.u32 2147483647, %v2505_v7  ;;  %v2534_v33 = vld [vmem:[%s1929_s5 + $0xf8] sm:$0xff]  ;;  %v1099_v54 = vld [vmem:[%s2052_s8 + $0x68] sm:$0xff] }
  0xcd   : > { %v1081_v5 = vmul.f32 %v1049_v38, %v249_v2  ;;  %v747_v48 = vadd.f32 0.2548296, %v715_v50  ;;  %v331_v26 = vsel %vm299_vm11, 1.0, %v1841_v28  ;;  %v396_v47 = vmul.f32 0.3275911, %v364_v34 }
  0xce   : > { %v1144_v0 = vmul.f32 %v1112_v53, %v1080_v58  ;;  %v778_v31 = vmul.f32 %v2455_v55, %v746_v17  ;;  %v918_v20 = vmul.f32 1.442695, %v858_v3  ;;  %v397_v55 = vmul.f32 0.3275911, %v365_v1 }
  0xcf   : > { %v2519_v56 = vpop.eup %1753  ;;  %v1145_v63 = vmul.f32 %v1113_v16, %v1081_v5  ;;  %v779_v51 = vmul.f32 %v2464_v41, %v747_v48  ;;  %v428_v36 = vadd.f32 1.0, %v396_v47  ;;  %v920_v11 = vmul.f32 1.442695, %v859_v14 }
  0xd0   : > { %v2523_v13 = vpop.eup %1755  ;;  %v938_v43 = vmul.f32 %v1750_v37, %v778_v31  ;;  %v538_v12 = vmul.f32 1.0614054, %v2519_v56  ;;  %v429_v27 = vadd.f32 1.0, %v397_v55  ;;  %v234_v57 = vmul.f32 0.5, %v2389_v46 }
  0xd1   : > { %v1163_v10 = vpack.c.bf16 %v1145_v63, %v1144_v0  ;;  %v939_v52 = vmul.f32 %v1752_v21, %v779_v51  ;;  %v539_v49 = vmul.f32 1.0614054, %v2523_v13  ;;  %1757 = vrcp.f32 %v428_v36 }
  0xd2   : > { %v970_v19 = vsub.f32 1.0, %v938_v43  ;;  %v570_v15 = vadd.f32 -1.4531521, %v538_v12  ;;  %1759 = vrcp.f32 %v429_v27  ;;  %v235_v59 = vmul.f32 0.5, %v2394_v22 }
  0xd3   : > { %1594 = vmatmul.mubr.msk.bf16.gmra.mrb[8].mxu1 %vm1182_vm6, %v1163_v10  ;;  %v971_v41 = vsub.f32 1.0, %v939_v52  ;;  %v571_v30 = vadd.f32 -1.4531521, %v539_v49  ;;  %1761 = vpow2.f32 %v918_v20  ;;  %v2540_v40 = vmul.f32 0.70710677, %v2529_v44 }
  0xd4   : > { %v1002_v42 = vmul.f32 %v970_v19, %v330_v4  ;;  %v602_v18 = vmul.f32 %v2519_v56, %v570_v15  ;;  %1763 = vpow2.f32 %v920_v11  ;;  %v812_v6 = vsub.f32 0.0, %v364_v34 }
  0xd5   : > { %v1003_v25 = vmul.f32 %v971_v41, %v331_v26  ;;  %v603_v37 = vmul.f32 %v2523_v13, %v571_v30  ;;  %v2543_v21 = vmul.f32 0.70710677, %v2534_v33  ;;  %v813_v60 = vsub.f32 0.0, %v365_v1 }
  0xd6   : > { %v1034_v2 = vadd.f32 1.0, %v1002_v42  ;;  %v634_v62 = vadd.f32 1.4214138, %v602_v18  ;;  %v380_v38 = vand.u32 2147483647, %v2540_v40  ;;  %v844_v4 = vmul.f32 %v812_v6, %v364_v34 }
  0xd7   : > { %v1035_v46 = vadd.f32 1.0, %v1003_v25  ;;  %v635_v45 = vadd.f32 1.4214138, %v603_v37  ;;  %v381_v17 = vand.u32 2147483647, %v2543_v21  ;;  %v845_v31 = vmul.f32 %v813_v60, %v365_v1 }
  0xd8   : > { %v1066_v39 = vmul.f32 %v1034_v2, %v234_v57  ;;  %v666_v22 = vmul.f32 %v2519_v56, %v634_v62  ;;  %v412_v48 = vmul.f32 0.3275911, %v380_v38  ;;  %vm314_vm12 = vcmp.ge.f32.partialorder %v2444_v61, 0.0 }
  0xd9   : > { %v1067_v53 = vmul.f32 %v1035_v46, %v235_v59  ;;  %v667_v50 = vmul.f32 %v2523_v13, %v635_v45  ;;  %v413_v14 = vmul.f32 0.3275911, %v381_v17  ;;  %vm315_vm13 = vcmp.ge.f32.partialorder %v2451_v23, 0.0 }
  0xda   : > { %v1130_v58 = vmul.f32 %v1098_v24, %v1066_v39  ;;  %v698_v16 = vadd.f32 -0.28449672, %v666_v22  ;;  %v444_v47 = vadd.f32 1.0, %v412_v48  ;;  %v890_v52 = vmul.f32 1.442695, %v844_v4 }
  0xdb   : > { %v1131_v3 = vmul.f32 %v1099_v54, %v1067_v53  ;;  %v699_v5 = vadd.f32 -0.28449672, %v667_v50  ;;  %v2551_v63 = vpop.eup %1757  ;;  %v445_v20 = vadd.f32 1.0, %v413_v14  ;;  %v892_v15 = vmul.f32 1.442695, %v845_v31 }
  0xdc   : > { %v730_v0 = vmul.f32 %v2519_v56, %v698_v16  ;;  %v2555_v43 = vpop.eup %1759  ;;  %v524_v34 = vmul.f32 1.0614054, %v2551_v63  ;;  %1765 = vrcp.f32 %v444_v47  ;;  %v346_v41 = vsel %vm314_vm12, 1.0, %v1841_v28 }
  0xdd   : > { %v1156_v26 = vpack.c.bf16 %v1131_v3, %v1130_v58  ;;  %v731_v51 = vmul.f32 %v2523_v13, %v699_v5  ;;  %v1762_v55 = vpop.eup %1761  ;;  %v525_v10 = vmul.f32 1.0614054, %v2555_v43  ;;  %1767 = vrcp.f32 %v445_v20  ;;  %v1114_v58 = vld [vmem:[%s2052_s8 + $0xe0] sm:$0xff] }
  0xde   : > { %v762_v12 = vadd.f32 0.2548296, %v730_v0  ;;  %v1764_v49 = vpop.eup %1763  ;;  %v556_v19 = vadd.f32 -1.4531521, %v524_v34  ;;  %v347_v30 = vsel %vm315_vm13, 1.0, %v1841_v28  ;;  %1769 = vpow2.f32 %v890_v52 }
  0xdf   : > { %1581 = vmatprep.mubr.msk.bf16.mxu0 %vm1182_vm6, %v1156_v26  ;;  %v763_v1 = vadd.f32 0.2548296, %v731_v51  ;;  %v557_v27 = vadd.f32 -1.4531521, %v525_v10  ;;  %v828_v59 = vsub.f32 0.0, %v380_v38  ;;  %1771 = vpow2.f32 %v892_v15 }
  0xe0   : > { %v794_v36 = vmul.f32 %v2519_v56, %v762_v12  ;;  %v588_v42 = vmul.f32 %v2551_v63, %v556_v19  ;;  %v250_v24 = vmul.f32 0.5, %v2435_v8  ;;  %v251_v46 = vmul.f32 0.5, %v2439_v35  ;;  %v1115_v8 = vld [vmem:[%s2052_s8 + $0xe8] sm:$0xff] }
  0xe1   : > { %v795_v11 = vmul.f32 %v2523_v13, %v763_v1  ;;  %v589_v56 = vmul.f32 %v2555_v43, %v557_v27  ;;  %v829_v13 = vsub.f32 0.0, %v381_v17  ;;  %v860_v39 = vmul.f32 %v828_v59, %v380_v38 }
  0xe2   : > { %v954_v57 = vmul.f32 %v1762_v55, %v794_v36  ;;  %v620_v37 = vadd.f32 1.4214138, %v588_v42  ;;  %vm300_vm14 = vcmp.ge.f32.partialorder %v2500_v9, 0.0  ;;  %vm301_vm15 = vcmp.ge.f32.partialorder %v2505_v7, 0.0 }
  0xe3   : > { %v955_v18 = vmul.f32 %v1764_v49, %v795_v11  ;;  %v621_v61 = vadd.f32 1.4214138, %v589_v56  ;;  %v861_v60 = vmul.f32 %v829_v13, %v381_v17  ;;  %v922_v14 = vmul.f32 1.442695, %v860_v39 }
  0xe4   : > { %v986_v25 = vsub.f32 1.0, %v954_v57  ;;  %v652_v62 = vmul.f32 %v2551_v63, %v620_v37  ;;  %v332_v11 = vsel %vm300_vm14, 1.0, %v1841_v28  ;;  %v333_v7 = vsel %vm301_vm15, 1.0, %v1841_v28 }
  0xe5   : > { %v987_v2 = vsub.f32 1.0, %v955_v18  ;;  %v653_v6 = vmul.f32 %v2555_v43, %v621_v61  ;;  %v924_v47 = vmul.f32 1.442695, %v861_v60  ;;  %1773 = vpow2.f32 %v922_v14  ;;  %v1100_v61 = vld [vmem:[%s2052_s8 + $0x70] sm:$0xff] }
  0xe6   : > { %v1018_v23 = vmul.f32 %v986_v25, %v346_v41  ;;  %v684_v22 = vadd.f32 -0.28449672, %v652_v62  ;;  %v1766_v53 = vpop.eup %1765  ;;  %v237_v56 = vmul.f32 0.5, %v2493_v29  ;;  %v1101_v62 = vld [vmem:[%s2052_s8 + $0x78] sm:$0xff]  ;;  %vm316_vm0 = vcmp.ge.f32.partialorder %v2540_v40, 0.0 }
  0xe7   : > { %v1019_v45 = vmul.f32 %v987_v2, %v347_v30  ;;  %v685_v16 = vadd.f32 -0.28449672, %v653_v6  ;;  %v1768_v3 = vpop.eup %1767  ;;  %v540_v48 = vmul.f32 1.0614054, %v1766_v53  ;;  %1775 = vpow2.f32 %v924_v47 }
  0xe8   : > { %v1050_v54 = vadd.f32 1.0, %v1018_v23  ;;  %v716_v4 = vmul.f32 %v2551_v63, %v684_v22  ;;  %v541_v31 = vmul.f32 1.0614054, %v1768_v3  ;;  %v1770_v17 = vpop.eup %1769  ;;  %vm317_vm1 = vcmp.ge.f32.partialorder %v2543_v21, 0.0 }
  0xe9   : > { %v1051_v50 = vadd.f32 1.0, %v1019_v45  ;;  %v717_v35 = vmul.f32 %v2555_v43, %v685_v16  ;;  %v572_v51 = vadd.f32 -1.4531521, %v540_v48  ;;  %v1772_v55 = vpop.eup %1771  ;;  %v348_v16 = vsel %vm316_vm0, 1.0, %v1841_v28 }
  0xea   : > { %v1082_v5 = vmul.f32 %v1050_v54, %v250_v24  ;;  %v748_v38 = vadd.f32 0.2548296, %v716_v4  ;;  %v573_v20 = vadd.f32 -1.4531521, %v541_v31  ;;  %v252_v40 = vmul.f32 0.5, %v2529_v44  ;;  %v1116_v31 = vld [vmem:[%s2052_s8 + $0xf0] sm:$0xff] }
  0xeb   : > { %v1083_v0 = vmul.f32 %v1051_v50, %v251_v46  ;;  %v749_v34 = vadd.f32 0.2548296, %v717_v35  ;;  %v604_v10 = vmul.f32 %v1766_v53, %v572_v51  ;;  %v253_v21 = vmul.f32 0.5, %v2534_v33 }
  0xec   : > { %v1146_v26 = vmul.f32 %v1114_v58, %v1082_v5  ;;  %v780_v1 = vmul.f32 %v2551_v63, %v748_v38  ;;  %v605_v36 = vmul.f32 %v1768_v3, %v573_v20 }
  0xed   : > { %v1147_v12 = vmul.f32 %v1115_v8, %v1083_v0  ;;  %v781_v49 = vmul.f32 %v2555_v43, %v749_v34  ;;  %v636_v15 = vadd.f32 1.4214138, %v604_v10  ;;  %v236_v43 = vmul.f32 0.5, %v2488_v32 }
  0xee   : > { %v940_v19 = vmul.f32 %v1770_v17, %v780_v1  ;;  %v637_v9 = vadd.f32 1.4214138, %v605_v36  ;;  %v349_v8 = vsel %vm317_vm1, 1.0, %v1841_v28 }
  0xef   : > { %v1164_v52 = vpack.c.bf16 %v1147_v12, %v1146_v26  ;;  %v941_v27 = vmul.f32 %v1772_v55, %v781_v49  ;;  %v668_v63 = vmul.f32 %v1766_v53, %v636_v15  ;;  %v1774_v45 = vpop.eup %1773  ;;  %v1117_v26 = vld [vmem:[%s2052_s8 + $0xf8] sm:$0xff] }
  0xf0   : > { %v972_v41 = vsub.f32 1.0, %v940_v19  ;;  %v669_v57 = vmul.f32 %v1768_v3, %v637_v9 }
  0xf1   : > { %1597 = vmatprep.mubr.msk.bf16.mxu1 %vm1182_vm6, %v1164_v52  ;;  %v973_v30 = vsub.f32 1.0, %v941_v27  ;;  %v700_v18 = vadd.f32 -0.28449672, %v668_v63  ;;  %v1776_v54 = vpop.eup %1775 }
  0xf2   : > { %v1004_v42 = vmul.f32 %v972_v41, %v332_v11  ;;  %v701_v25 = vadd.f32 -0.28449672, %v669_v57 }
  0xf3   : > { %v1005_v59 = vmul.f32 %v973_v30, %v333_v7  ;;  %v732_v13 = vmul.f32 %v1766_v53, %v700_v18 }
  0xf4   : > { %v1036_v37 = vadd.f32 1.0, %v1004_v42  ;;  %v733_v24 = vmul.f32 %v1768_v3, %v701_v25 }
  0xf5   : > { %v1037_v2 = vadd.f32 1.0, %v1005_v59  ;;  %v764_v46 = vadd.f32 0.2548296, %v732_v13 }
  0xf6   : > { %v1068_v23 = vmul.f32 %v1036_v37, %v236_v43  ;;  %v765_v39 = vadd.f32 0.2548296, %v733_v24 }
  0xf7   : > { %v1069_v6 = vmul.f32 %v1037_v2, %v237_v56  ;;  %v796_v32 = vmul.f32 %v1766_v53, %v764_v46 }
  0xf8   : > { %v1132_v22 = vmul.f32 %v1100_v61, %v1068_v23  ;;  %v797_v29 = vmul.f32 %v1768_v3, %v765_v39 }
  0xf9   : > { %v1133_v60 = vmul.f32 %v1101_v62, %v1069_v6  ;;  %v956_v50 = vmul.f32 %v1774_v45, %v796_v32 }
  0xfa   : > { %v957_v5 = vmul.f32 %v1776_v54, %v797_v29 }
  0xfb   : > { %v1157_v58 = vpack.c.bf16 %v1133_v60, %v1132_v22  ;;  %v988_v4 = vsub.f32 1.0, %v956_v50 }
  0xfc   : > { %v989_v48 = vsub.f32 1.0, %v957_v5 }
  0xfd   : > { %1582 = vmatmul.mubr.msk.bf16.gmra.mrb[12].mxu0 %vm1182_vm6, %v1157_v58  ;;  %v1020_v53 = vmul.f32 %v988_v4, %v348_v16 }
  0xfe   : > { %v1021_v3 = vmul.f32 %v989_v48, %v349_v8 }
  0xff   : > { %v1052_v0 = vadd.f32 1.0, %v1020_v53 }
 0x100   : > { %v1053_v35 = vadd.f32 1.0, %v1021_v3 }
 0x101   : > { %v1084_v14 = vmul.f32 %v1052_v0, %v252_v40 }
 0x102   : > { %v1085_v38 = vmul.f32 %v1053_v35, %v253_v21 }
 0x103   : > { %v1148_v51 = vmul.f32 %v1116_v31, %v1084_v14 }
 0x104   : > { %v1149_v28 = vmul.f32 %v1117_v26, %v1085_v38 }
 0x106   : > { %v1165_v47 = vpack.c.bf16 %v1149_v28, %v1148_v51 }
 0x108   : > { %1598 = vmatmul.mubr.msk.bf16.gmra.mrb[12].mxu1 %vm1182_vm6, %v1165_v47 }
 0x12c   : > { %v1571_v17 = vpop.f32.mrb[0].mxu0 }
 0x12d   : > { %1394 = vst.msk [vmem:[%s2603_s11 + $0x10] sm:$0xff] %vm1182_vm6, %v1571_v17  ;;  %v1265_v44 = vpop.f32.mrb[1].mxu0 }
 0x12e   : > { %1392 = vst.msk [vmem:[%s2603_s11] sm:$0xff] %vm1182_vm6, %v1265_v44  ;;  %v1572_v33 = vpop.f32.mrb[2].mxu0 }
 0x12f   : > { %1395 = vst.msk [vmem:[%s2603_s11 + $0x18] sm:$0xff] %vm1182_vm6, %v1572_v33  ;;  %v1268_v12 = vpop.f32.mrb[3].mxu0 }
 0x130   : > { %1393 = vst.msk [vmem:[%s2603_s11 + $0x8] sm:$0xff] %vm1182_vm6, %v1268_v12  ;;  %v1587_v34 = vpop.f32.mrb[0].mxu1 }
 0x131   : > { %1410 = vst.msk [vmem:[%s2603_s11 + $0x90] sm:$0xff] %vm1182_vm6, %v1587_v34  ;;  %v1329_v20 = vpop.f32.mrb[1].mxu1 }
 0x132   : > { %1408 = vst.msk [vmem:[%s2603_s11 + $0x80] sm:$0xff] %vm1182_vm6, %v1329_v20  ;;  %v1588_v55 = vpop.f32.mrb[2].mxu1 }
 0x133   : > { %1411 = vst.msk [vmem:[%s2603_s11 + $0x98] sm:$0xff] %vm1182_vm6, %v1588_v55  ;;  %v1332_v1 = vpop.f32.mrb[3].mxu1 }
 0x134   : > { %1409 = vst.msk [vmem:[%s2603_s11 + $0x88] sm:$0xff] %vm1182_vm6, %v1332_v1 }
 0x162   : > { %v1575_v10 = vpop.f32.mrb[4].mxu0 }
 0x163   : > { %1398 = vst.msk [vmem:[%s2603_s11 + $0x30] sm:$0xff] %vm1182_vm6, %v1575_v10  ;;  %v1281_v52 = vpop.f32.mrb[5].mxu0 }
 0x164   : > { %1396 = vst.msk [vmem:[%s2603_s11 + $0x20] sm:$0xff] %vm1182_vm6, %v1281_v52  ;;  %v1576_v49 = vpop.f32.mrb[6].mxu0 }
 0x165   : > { %1399 = vst.msk [vmem:[%s2603_s11 + $0x38] sm:$0xff] %vm1182_vm6, %v1576_v49  ;;  %v1284_v36 = vpop.f32.mrb[7].mxu0 }
 0x166   : > { %1397 = vst.msk [vmem:[%s2603_s11 + $0x28] sm:$0xff] %vm1182_vm6, %v1284_v36 }
 0x16b   : > { %v1591_v19 = vpop.f32.mrb[4].mxu1 }
 0x16c   : > { %1414 = vst.msk [vmem:[%s2603_s11 + $0xb0] sm:$0xff] %vm1182_vm6, %v1591_v19  ;;  %v1345_v15 = vpop.f32.mrb[5].mxu1 }
 0x16d   : > { %1412 = vst.msk [vmem:[%s2603_s11 + $0xa0] sm:$0xff] %vm1182_vm6, %v1345_v15  ;;  %v1592_v11 = vpop.f32.mrb[6].mxu1 }
 0x16e   : > { %1415 = vst.msk [vmem:[%s2603_s11 + $0xb8] sm:$0xff] %vm1182_vm6, %v1592_v11  ;;  %v1348_v27 = vpop.f32.mrb[7].mxu1 }
 0x16f   : > { %1413 = vst.msk [vmem:[%s2603_s11 + $0xa8] sm:$0xff] %vm1182_vm6, %v1348_v27 }
 0x19b   : > { %v1579_v9 = vpop.f32.mrb[8].mxu0 }
 0x19c   : > { %1402 = vst.msk [vmem:[%s2603_s11 + $0x50] sm:$0xff] %vm1182_vm6, %v1579_v9  ;;  %v1297_v7 = vpop.f32.mrb[9].mxu0 }
 0x19d   : > { %1400 = vst.msk [vmem:[%s2603_s11 + $0x40] sm:$0xff] %vm1182_vm6, %v1297_v7  ;;  %v1580_v41 = vpop.f32.mrb[10].mxu0 }
 0x19e   : > { %1403 = vst.msk [vmem:[%s2603_s11 + $0x58] sm:$0xff] %vm1182_vm6, %v1580_v41  ;;  %v1300_v63 = vpop.f32.mrb[11].mxu0 }
 0x19f   : > { %1401 = vst.msk [vmem:[%s2603_s11 + $0x48] sm:$0xff] %vm1182_vm6, %v1300_v63 }
 0x1a6   : > { %v1595_v30 = vpop.f32.mrb[8].mxu1 }
 0x1a7   : > { %1418 = vst.msk [vmem:[%s2603_s11 + $0xd0] sm:$0xff] %vm1182_vm6, %v1595_v30  ;;  %v1361_v57 = vpop.f32.mrb[9].mxu1 }
 0x1a8   : > { %1416 = vst.msk [vmem:[%s2603_s11 + $0xc0] sm:$0xff] %vm1182_vm6, %v1361_v57  ;;  %v1596_v43 = vpop.f32.mrb[10].mxu1 }
 0x1a9   : > { %1419 = vst.msk [vmem:[%s2603_s11 + $0xd8] sm:$0xff] %vm1182_vm6, %v1596_v43  ;;  %v1364_v42 = vpop.f32.mrb[11].mxu1 }
 0x1aa   : > { %1417 = vst.msk [vmem:[%s2603_s11 + $0xc8] sm:$0xff] %vm1182_vm6, %v1364_v42 }
 0x1d0   : > { %v1583_v18 = vpop.f32.mrb[12].mxu0 }
 0x1d1   : > { %1406 = vst.msk [vmem:[%s2603_s11 + $0x70] sm:$0xff] %vm1182_vm6, %v1583_v18  ;;  %v1313_v56 = vpop.f32.mrb[13].mxu0 }
 0x1d2   : > { %1404 = vst.msk [vmem:[%s2603_s11 + $0x60] sm:$0xff] %vm1182_vm6, %v1313_v56  ;;  %v1584_v59 = vpop.f32.mrb[14].mxu0 }
 0x1d3   : > { %1407 = vst.msk [vmem:[%s2603_s11 + $0x78] sm:$0xff] %vm1182_vm6, %v1584_v59  ;;  %v1316_v25 = vpop.f32.mrb[15].mxu0 }
 0x1d4   : > { %1405 = vst.msk [vmem:[%s2603_s11 + $0x68] sm:$0xff] %vm1182_vm6, %v1316_v25 }
 0x1db   : > { %v1599_v37 = vpop.f32.mrb[12].mxu1 }
 0x1dc   : > { %1422 = vst.msk [vmem:[%s2603_s11 + $0xf0] sm:$0xff] %vm1182_vm6, %v1599_v37  ;;  %v1377_v13 = vpop.f32.mrb[13].mxu1 }
 0x1dd   : > { %1420 = vst.msk [vmem:[%s2603_s11 + $0xe0] sm:$0xff] %vm1182_vm6, %v1377_v13  ;;  %v1600_v2 = vpop.f32.mrb[14].mxu1 }
 0x1de   : > { %1423 = vst.msk [vmem:[%s2603_s11 + $0xf8] sm:$0xff] %vm1182_vm6, %v1600_v2  ;;  %v1380_v61 = vpop.f32.mrb[15].mxu1 }
 0x1df   : > { %1421 = vst.msk [vmem:[%s2603_s11 + $0xe8] sm:$0xff] %vm1182_vm6, %v1380_v61 }
 0x1e0   : > { %1790 = shalt.err (!%p1787_p3)
}
 0x1e1   : > { %s1791_s30 = scalar_lea.hbm %s2668_s25, 4096  ;;  %s1795_s6 = scalar_lea.hbm %s2724_s3, 8192 }
 0x1e2   : > { %p1792_p4 = scmp.ne.s32.totalorder %s2668_s25, %s1791_s30  ;;  %p1796_p9 = scmp.lt.u32.totalorder %s2668_s25, %s2724_s3 }
 0x1e3   : > { %p1797_p10 = scmp.lt.u32.totalorder %s1795_s6, %s1791_s30  ;;  %p1799_p12 = scmp.lt.u32.totalorder %s1791_s30, %s2668_s25 }
 0x1e4   : > { %p1793_p7 = pnand %p1792_p4, %p1903_p5 }
 0x1e5   : > { %p1798_p11 = por %p1797_p10, %p1796_p9 }
 0x1e6   : > { %p1794_p8 = pneg %p1793_p7 }
 0x1e7   : > { %p1800_p13 = por %p1799_p12, %p1798_p11 }
 0x1e9   : > { %p1801_p0 = pnand %p1800_p13, %p1794_p8 }
 0x1eb   : > { %1804 = shalt.err (!%p1801_p0)
}
 0x1ec   : > { %s1843_s9 = smov 128   ;;  %s1844_s10 = smov 8  }
 0x1ed   : > { %1605 = dma.vmem_to_hbm [thread:$0]  (%p1903_p5), %s2670_s19, 4096, %s2668_s25, %s2680_s16, %s1843_s9, %s1843_s9, %s1844_s10  }
 0x1ee PF: > { %p1611_p1 = scmp.ge.s32.totalorder %s1839_s15, 2  ;;  %s1453_s11 = sand.u32 1, %s1827_s12  }
 0x1ef   : > { %s1454_s17 = scalar_lea.sflag [#allocation3], %s1453_s11 }
 0x1f0   : > { %p1608_p2 = pnand %p1611_p1, %p1907_p6 }
 0x1f2   : > { %1822 = dma.done.wait (!%p1608_p2), %s1454_s17, 4096  }
 0x1f3   : > { %1824 = vsyncadd (!%p1608_p2), %s1454_s17, 4294963200  ;;  %p13_p3 = scmp.ge.s32.totalorder %s1890_s18, 4   ;;  %s2727_s12 = smov %s1831_s13 }
 0x1f4   : > { %s2728_s13 = smov %s1835_s14  ;;  %s2729_s14 = smov %s1901_s21 }
 0x1f5   : > { %s2730_s15 = smov %s1890_s18  ;;  %15 = sbr.rel (!%p13_p3) target bundleno = 3 (0x3), region = 70 }
 0x1fc   :  { %1459 = vsyncpa [#allocation3], 1 }
 0x1fd   :  { %1461 = vsyncpa [#allocation3 + $0x1], 1 }

</bundles_post_ra>
